<compile_context>
chip_gen: v7x
topology: tpu7x:2x2x1
jax: 0.10.0
libtpu: 0.0.40
codegen_flags: <defaults>
</compile_context>

<pallas_src>
import functools
import math

import jax
import jax.numpy as jnp
from jax import lax
from jax.experimental import pallas as pl
from jax.experimental.pallas import tpu as pltpu

EPS_LN = 1e-5              # nn.TransformerEncoderLayer layer_norm_eps default
EPS_BN = 1e-5              # nn.BatchNorm2d eps default
MXU_DTYPE = jnp.bfloat16   # MXU operand dtype (accumulation / LN / softmax stay f32)
ACT_DTYPE = jnp.bfloat16   # residual-stream (HBM activation) dtype
LANE = 128
VMEM_LIMIT = 64 * 1024 * 1024  # scoped VMEM limit: 4x v5e default, 2x v6e default, <= v7x phys

_SINGLE_BUFFER_OK = None   # resolved by _resolve_buffered_support() (eager, before jit)


# ---------------------------------------------------------------------------
# Capability probe: single-buffered constant operands (pl.Buffered(1))
# ---------------------------------------------------------------------------

def _probe_kernel(x_ref, o_ref):
    o_ref[...] = x_ref[...]


def _resolve_buffered_support():
    """One tiny eager compile to check pipeline_mode=pl.Buffered(1) support."""
    global _SINGLE_BUFFER_OK
    if _SINGLE_BUFFER_OK is not None:
        return
    try:
        spec = pl.BlockSpec((8, 128), lambda i: (0, 0), pipeline_mode=pl.Buffered(1))
        fn = pl.pallas_call(
            _probe_kernel,
            out_shape=jax.ShapeDtypeStruct((8, 128), jnp.float32),
            grid=(2,),
            in_specs=[spec],
            out_specs=pl.BlockSpec((8, 128), lambda i: (0, 0)),
        )
        jax.block_until_ready(fn(jnp.zeros((8, 128), jnp.float32)))
        _SINGLE_BUFFER_OK = True
    except Exception:  # pragma: no cover - older/newer Pallas without pipeline_mode
        _SINGLE_BUFFER_OK = False


def _const_spec(shape):
    """BlockSpec for a grid-invariant operand (1-D grid); single-buffered if supported."""
    idx = lambda i, n=len(shape): (0,) * n
    if _SINGLE_BUFFER_OK:
        return pl.BlockSpec(shape, idx, pipeline_mode=pl.Buffered(1))
    return pl.BlockSpec(shape, idx)


def _mosaic_params():
    return pltpu.CompilerParams(dimension_semantics=("parallel",),
                                vmem_limit_bytes=VMEM_LIMIT)


# ---------------------------------------------------------------------------
# In-kernel helpers
# ---------------------------------------------------------------------------

def _layernorm(z, g, b):
    m = jnp.mean(z, axis=-1, keepdims=True)
    v = jnp.mean(jnp.square(z - m), axis=-1, keepdims=True)
    return (z - m) * lax.rsqrt(v + EPS_LN) * g + b


# ---------------------------------------------------------------------------
# Pallas kernels
# ---------------------------------------------------------------------------

def _patch_embed_kernel(x_ref, w_ref, b_ref, scale_ref, shift_ref, o_ref):
    # Conv2d(stride=kernel=patch) as matmul + bias, ReLU, eval BatchNorm2d folded to scale/shift.
    acc = jnp.dot(x_ref[...].astype(MXU_DTYPE), w_ref[...],
                  preferred_element_type=jnp.float32) + b_ref[...]
    acc = jnp.maximum(acc, 0.0)
    o_ref[...] = (acc * scale_ref[...] + shift_ref[...]).astype(o_ref.dtype)


def _encoder_layer_kernel(tok_ref, wqkv_ref, bqkv_ref, wo_ref, bo_ref,
                          ln1g_ref, ln1b_ref, w1_ref, b1_ref, w2_ref, b2_ref,
                          ln2g_ref, ln2b_ref, o_ref, *, seq_len, num_heads, blk_seqs):
    """One post-norm TransformerEncoderLayer for `blk_seqs` sequences of length `seq_len`."""
    f32 = jnp.float32
    S, nh, nb = seq_len, num_heads, blk_seqs
    R, E = tok_ref.shape                       # R = nb * S
    hd = E // nh

    tok_b = tok_ref[...]                       # (R, E) bf16 residual stream
    tok = tok_b.astype(f32)

    # ---- QKV projection for the whole row block (1/sqrt(hd) folded into Q weights) ----
    qkv = jnp.dot(tok_b, wqkv_ref[...], preferred_element_type=f32) + bqkv_ref[...]  # (R, 3E)

    # ---- heads-batched attention, one small loop over the sequences in this block ----
    outs = []
    for b in range(nb):
        # (S, 3E) -> (3E, S) -> (3*nh, hd, S): head-major layout from ONE transpose +
        # tile-aligned sublane reshape (no per-head lane slicing).
        qkv_t = qkv[b * S:(b + 1) * S, :].T.reshape(3 * nh, hd, S)
        q_s = jnp.swapaxes(qkv_t[:nh], 1, 2).astype(MXU_DTYPE)        # (nh, S, hd)
        k_t = qkv_t[nh:2 * nh].astype(MXU_DTYPE)                      # (nh, hd, S) = K_h^T
        v_t = qkv_t[2 * nh:].astype(MXU_DTYPE)                        # (nh, hd, S) = V_h^T

        s = jnp.einsum("hqd,hdk->hqk", q_s, k_t,
                       preferred_element_type=f32)                     # (nh, S, S) batched NN
        s = s - jnp.max(s, axis=-1, keepdims=True)
        p = jnp.exp(s)
        p = p * pl.reciprocal(jnp.sum(p, axis=-1, keepdims=True), approx=True)

        o_t = jnp.einsum("hdk,hqk->hdq", v_t, p.astype(MXU_DTYPE),
                         preferred_element_type=f32)                   # (nh, hd, S) batched NT
        outs.append(o_t.reshape(E, S).T)                               # (S, E): heads merged

    o_all = outs[0] if nb == 1 else jnp.concatenate(outs, axis=0)      # (R, E)

    attn = jnp.dot(o_all.astype(MXU_DTYPE), wo_ref[...],
                   preferred_element_type=f32) + bo_ref[...]
    x1 = _layernorm(tok + attn, ln1g_ref[...], ln1b_ref[...])

    # ---- feed-forward: Linear(E, dff) + ReLU + Linear(dff, E), residual + LN2 ----
    h = jnp.maximum(jnp.dot(x1.astype(MXU_DTYPE), w1_ref[...],
                            preferred_element_type=f32) + b1_ref[...], 0.0)
    ff = jnp.dot(h.astype(MXU_DTYPE), w2_ref[...],
                 preferred_element_type=f32) + b2_ref[...]
    x2 = _layernorm(x1 + ff, ln2g_ref[...], ln2b_ref[...])
    o_ref[...] = x2.astype(o_ref.dtype)


def _mean_fc_kernel(x_ref, w_ref, b_ref, o_ref, *, seq_len):
    # mean over the sequence axis for each sequence in the block, then Linear(E, padded C)
    R, E = x_ref.shape
    nb = R // seq_len
    x = x_ref[...].astype(jnp.float32).reshape(nb, seq_len, E)
    m = jnp.mean(x, axis=1)                                            # (nb, E)
    acc = jnp.dot(m.astype(MXU_DTYPE), w_ref[...],
                  preferred_element_type=jnp.float32) + b_ref[...]
    o_ref[...] = acc


# ---------------------------------------------------------------------------
# pallas_call wrappers
# ---------------------------------------------------------------------------

def _row_tile(m, cap=1024):
    """Largest multiple-of-8 row tile dividing m that still leaves a grid of >= 2 steps."""
    best = m
    t = 8
    limit = min(cap, m // 2)
    while t <= limit:
        if m % t == 0:
            best = t
        t += 8
    return best


def _seq_block(batch, seq_len, target_rows=512):
    """Largest divisor of `batch` whose block (divisor * seq_len rows) stays <= target_rows."""
    best = 1
    for cand in range(1, batch + 1):
        if batch % cand == 0 and cand * seq_len <= target_rows:
            best = cand
    return best


def pallas_patch_embed(patches, w, b, scale, shift):
    M, K = patches.shape
    N = w.shape[1]
    tm = _row_tile(M)
    return pl.pallas_call(
        _patch_embed_kernel,
        out_shape=jax.ShapeDtypeStruct((M, N), ACT_DTYPE),
        grid=(M // tm,),
        in_specs=[pl.BlockSpec((tm, K), lambda i: (i, 0)),
                  _const_spec((K, N)),
                  _const_spec((1, N)),
                  _const_spec((1, N)),
                  _const_spec((1, N))],
        out_specs=pl.BlockSpec((tm, N), lambda i: (i, 0)),
        compiler_params=_mosaic_params(),
    )(patches, w, b, scale, shift)


def pallas_encoder_layer(tok, lp, *, seq_len, num_heads, blk_seqs):
    M, E = tok.shape
    rows = blk_seqs * seq_len
    dff = lp["w1"].shape[1]
    row_spec = pl.BlockSpec((rows, E), lambda i: (i, 0))
    return pl.pallas_call(
        functools.partial(_encoder_layer_kernel, seq_len=seq_len,
                          num_heads=num_heads, blk_seqs=blk_seqs),
        out_shape=jax.ShapeDtypeStruct((M, E), tok.dtype),
        grid=(M // rows,),
        in_specs=[row_spec,
                  _const_spec((E, 3 * E)), _const_spec((1, 3 * E)),
                  _const_spec((E, E)), _const_spec((1, E)),
                  _const_spec((1, E)), _const_spec((1, E)),
                  _const_spec((E, dff)), _const_spec((1, dff)),
                  _const_spec((dff, E)), _const_spec((1, E)),
                  _const_spec((1, E)), _const_spec((1, E))],
        out_specs=row_spec,
        input_output_aliases={0: 0},   # residual stream updated in place; each step reads its
                                       # whole block before writing and in/out blocks match.
        compiler_params=_mosaic_params(),
    )(tok, lp["in_proj_w"], lp["in_proj_b"], lp["out_proj_w"], lp["out_proj_b"],
      lp["ln1_g"], lp["ln1_b"], lp["w1"], lp["b1"], lp["w2"], lp["b2"],
      lp["ln2_g"], lp["ln2_b"])


def pallas_mean_fc(tok2d, w, b, *, seq_len, batch):
    _, E = tok2d.shape
    cp = w.shape[1]                                    # lane-dense (padded to 128) classifier
    nb = 8 if batch % 8 == 0 else batch                # keep output block sublane-aligned / full
    return pl.pallas_call(
        functools.partial(_mean_fc_kernel, seq_len=seq_len),
        out_shape=jax.ShapeDtypeStruct((batch, cp), jnp.float32),
        grid=(batch // nb,),
        in_specs=[pl.BlockSpec((nb * seq_len, E), lambda i: (i, 0)),
                  _const_spec((E, cp)),
                  _const_spec((1, cp))],
        out_specs=pl.BlockSpec((nb, cp), lambda i: (i, 0)),
        compiler_params=_mosaic_params(),
    )(tok2d, w, b)


# ---------------------------------------------------------------------------
# Parameters: raw (PyTorch-like, f32) and Pallas-prepared (transposed, folded, bf16)
# ---------------------------------------------------------------------------

def init_raw_params(key, *, num_classes, embed_dim, num_heads, num_layers, patch_size,
                    dim_feedforward=2048, in_channels=3):
    del num_heads  # layout-independent at init; folding happens in prepare_pallas_params
    E = embed_dim
    keys = jax.random.split(key, 8 + num_layers)

    def normal(k, shape, s=0.1):
        return (s * jax.random.normal(k, shape)).astype(jnp.float32)

    raw = {
        "conv_w": normal(keys[0], (E, in_channels * patch_size * patch_size)),
        "conv_b": normal(keys[1], (E,)),
        "bn_gamma": 1.0 + normal(keys[2], (E,)),
        "bn_beta": normal(keys[3], (E,)),
        "bn_mean": normal(keys[4], (E,)),
        "bn_var": 1.0 + jnp.abs(normal(keys[5], (E,))),
        "fc_w": normal(keys[6], (num_classes, E)),
        "fc_b": normal(keys[7], (num_classes,)),
        "layers": [],
    }
    for li in range(num_layers):
        lk = jax.random.split(keys[8 + li], 12)
        raw["layers"].append(dict(
            in_proj_w=normal(lk[0], (3 * E, E)),
            in_proj_b=normal(lk[1], (3 * E,)),
            out_proj_w=normal(lk[2], (E, E)),
            out_proj_b=normal(lk[3], (E,)),
            ln1_g=1.0 + normal(lk[4], (E,)),
            ln1_b=normal(lk[5], (E,)),
            lin1_w=normal(lk[6], (dim_feedforward, E)),
            lin1_b=normal(lk[7], (dim_feedforward,)),
            lin2_w=normal(lk[8], (E, dim_feedforward)),
            lin2_b=normal(lk[9], (E,)),
            ln2_g=1.0 + normal(lk[10], (E,)),
            ln2_b=normal(lk[11], (E,)),
        ))
    return raw


def prepare_pallas_params(raw, *, num_heads):
    """Pre-transpose / fold / cast the PyTorch-layout weights for the Pallas kernels."""
    _resolve_buffered_support()                        # eager probe, before any jit tracing
    E = raw["conv_w"].shape[0]
    hd = E // num_heads
    q_scale = 1.0 / math.sqrt(hd)                      # folded into Q weights (zero runtime cost)

    bn_scale = raw["bn_gamma"] / jnp.sqrt(raw["bn_var"] + EPS_BN)
    nc = raw["fc_w"].shape[0]
    nc_pad = ((nc + LANE - 1) // LANE) * LANE          # lane-dense classifier output
    fc_w = jnp.pad(raw["fc_w"].T, ((0, 0), (0, nc_pad - nc)))
    fc_b = jnp.pad(raw["fc_b"], (0, nc_pad - nc))

    params = {
        "conv_w": raw["conv_w"].T.astype(MXU_DTYPE),                 # (C*p*p, E)
        "conv_b": raw["conv_b"].reshape(1, E),
        "bn_scale": bn_scale.reshape(1, E),
        "bn_shift": (raw["bn_beta"] - raw["bn_mean"] * bn_scale).reshape(1, E),
        "fc_w": fc_w.astype(MXU_DTYPE),                              # (E, nc_pad)
        "fc_b": fc_b.reshape(1, nc_pad),
        "layers": [],
    }
    for lr in raw["layers"]:
        wqkv = lr["in_proj_w"].T                                     # (E, 3E)
        wqkv = wqkv.at[:, :E].multiply(q_scale)
        bqkv = lr["in_proj_b"].at[:E].multiply(q_scale)
        params["layers"].append(dict(
            in_proj_w=wqkv.astype(MXU_DTYPE),
            in_proj_b=bqkv.reshape(1, 3 * E),
            out_proj_w=lr["out_proj_w"].T.astype(MXU_DTYPE),         # (E, E)
            out_proj_b=lr["out_proj_b"].reshape(1, E),
            ln1_g=lr["ln1_g"].reshape(1, E), ln1_b=lr["ln1_b"].reshape(1, E),
            w1=lr["lin1_w"].T.astype(MXU_DTYPE),                     # (E, dff)
            b1=lr["lin1_b"].reshape(1, -1),
            w2=lr["lin2_w"].T.astype(MXU_DTYPE),                     # (dff, E)
            b2=lr["lin2_b"].reshape(1, E),
            ln2_g=lr["ln2_g"].reshape(1, E), ln2_b=lr["ln2_b"].reshape(1, E),
        ))
    return params


# ---------------------------------------------------------------------------
# Forward pass (Pallas) — mirrors PyTorch Transformer.forward (eval mode)
# ---------------------------------------------------------------------------

def transformer_forward(params, x, *, num_classes, num_heads, patch_size):
    # NOTE: all dropout layers act as identity (inference / eval-mode semantics).
    B, C, H, W = x.shape
    p = patch_size
    Hp, Wp = H // p, W // p
    S = Hp * Wp
    E = params["conv_w"].shape[1]

    # im2col with rows ordered (b, hp, wp): token layout is (B, S, E) flattened to (B*S, E)
    # so every sequence's S rows are contiguous for the encoder-layer BlockSpecs.
    patches = (x.reshape(B, C, Hp, p, Wp, p)
                 .transpose(0, 2, 4, 1, 3, 5)
                 .reshape(B * S, C * p * p))
    tok = pallas_patch_embed(patches, params["conv_w"], params["conv_b"],
                             params["bn_scale"], params["bn_shift"])     # (B*S, E) bf16

    nb = _seq_block(B, S)                       # sequences packed per grid step (~<=512 rows)
    for lp in params["layers"]:
        tok = pallas_encoder_layer(tok, lp, seq_len=S, num_heads=num_heads, blk_seqs=nb)

    # PyTorch x.mean(dim=0) over the (seq-first) sequence axis == per-sequence mean here.
    logits = pallas_mean_fc(tok, params["fc_w"], params["fc_b"], seq_len=S, batch=B)
    return logits[:, :num_classes]


# ---------------------------------------------------------------------------
# Pure-JAX f32 reference (PyTorch semantics) for the correctness check
# ---------------------------------------------------------------------------

def reference_forward(raw, x, *, num_heads, patch_size):
    B, C, H, W = x.shape
    p = patch_size
    Hp, Wp = H // p, W // p
    S = Hp * Wp
    E = raw["conv_w"].shape[0]
    nh = num_heads
    hd = E // nh

    def ln(z, g, b):
        m = z.mean(-1, keepdims=True)
        v = ((z - m) ** 2).mean(-1, keepdims=True)
        return (z - m) / jnp.sqrt(v + EPS_LN) * g + b

    patches = (x.reshape(B, C, Hp, p, Wp, p).transpose(0, 2, 4, 1, 3, 5)
                 .reshape(B, S, C * p * p))
    y = jnp.maximum(patches @ raw["conv_w"].T + raw["conv_b"], 0.0)
    scale = raw["bn_gamma"] / jnp.sqrt(raw["bn_var"] + EPS_BN)
    tok = (y - raw["bn_mean"]) * scale + raw["bn_beta"]                  # (B, S, E)

    for lr in raw["layers"]:
        qkv = tok @ lr["in_proj_w"].T + lr["in_proj_b"]
        q, k, v = jnp.split(qkv, 3, axis=-1)
        qh = q.reshape(B, S, nh, hd).transpose(0, 2, 1, 3)
        kh = k.reshape(B, S, nh, hd).transpose(0, 2, 1, 3)
        vh = v.reshape(B, S, nh, hd).transpose(0, 2, 1, 3)
        s = jnp.einsum("bhqd,bhkd->bhqk", qh, kh) / math.sqrt(hd)
        o = jnp.einsum("bhqk,bhkd->bhqd", jax.nn.softmax(s, axis=-1), vh)
        o = o.transpose(0, 2, 1, 3).reshape(B, S, E)
        attn = o @ lr["out_proj_w"].T + lr["out_proj_b"]
        tok = ln(tok + attn, lr["ln1_g"], lr["ln1_b"])
        ff = (jnp.maximum(tok @ lr["lin1_w"].T + lr["lin1_b"], 0.0)
              @ lr["lin2_w"].T + lr["lin2_b"])
        tok = ln(tok + ff, lr["ln2_g"], lr["ln2_b"])
    return tok.mean(axis=1) @ raw["fc_w"].T + raw["fc_b"]


# ---------------------------------------------------------------------------

if __name__ == "__main__":
    num_classes, embed_dim, num_heads, num_layers, patch_size = 10, 32, 4, 2, 4
    B, H, W = 2, 16, 16

    key = jax.random.PRNGKey(0)
    pkey, xkey = jax.random.split(key)
    raw = init_raw_params(pkey, num_classes=num_classes, embed_dim=embed_dim,
                          num_heads=num_heads, num_layers=num_layers,
                          patch_size=patch_size, dim_feedforward=2048)
    params = prepare_pallas_params(raw, num_heads=num_heads)
    x = jax.random.normal(xkey, (B, 3, H, W), dtype=jnp.float32)

    fwd = jax.jit(functools.partial(transformer_forward, num_classes=num_classes,
                                    num_heads=num_heads, patch_size=patch_size))
    out = fwd(params, x)
    jax.block_until_ready(out)

    ref = reference_forward(raw, x, num_heads=num_heads, patch_size=patch_size)
    assert out.shape == (B, num_classes), out.shape
    max_err = float(jnp.max(jnp.abs(out - ref)))
    # bf16 weights + bf16 residual stream + approx softmax reciprocal vs. an f32 reference:
    # inference-grade tolerance.
    assert max_err < 5e-2, f"mismatch vs reference: {max_err}"
    print("KERNEL_OK")
</pallas_src>

<mosaic_0001>
module attributes {stable_mosaic.version = 11 : i64} {
  func.func @_probe_kernel(%arg0: i32, %arg1: memref<8x128xf32, #tpu.memory_space<vmem>>, %arg2: memref<8x128xf32, #tpu.memory_space<vmem>>) attributes {dimension_semantics = [#tpu.dimension_semantics<arbitrary>], iteration_bounds = array<i64: 2>, scalar_prefetch = 0 : i64, scratch_operands = 0 : i64, tpu.core_type = #tpu.core_type<tc>, window_params = [{pipeline_mode = #tpu.pipeline_mode<synchronous>, transform_indices = @transform_0, window_bounds = array<i64: 8, 128>}, {pipeline_mode = #tpu.pipeline_mode<synchronous>, transform_indices = @transform_1, window_bounds = array<i64: 8, 128>}]} {
    %c0 = arith.constant 0 : index
    %c0_0 = arith.constant 0 : index
    %0 = vector.load %arg1[%c0, %c0_0] : memref<8x128xf32, #tpu.memory_space<vmem>>, vector<8x128xf32>
    %c0_1 = arith.constant 0 : index
    %c0_2 = arith.constant 0 : index
    %1 = vector.load %arg2[%c0_1, %c0_2] : memref<8x128xf32, #tpu.memory_space<vmem>>, vector<8x128xf32>
    tpu.vector_store %arg2[%c0_1, %c0_2], %0 {strides = array<i32>} : memref<8x128xf32, #tpu.memory_space<vmem>>, vector<8x128xf32>,
    return
  }
  func.func @transform_0(%arg0: i32) -> (i32, i32) {
    %c0_i32 = arith.constant 0 : i32
    %c0_i32_0 = arith.constant 0 : i32
    %c0_i32_1 = arith.constant 0 : i32
    return %c0_i32, %c0_i32_0 : i32, i32
  }
  func.func @transform_1(%arg0: i32) -> (i32, i32) {
    %c0_i32 = arith.constant 0 : i32
    %c0_i32_0 = arith.constant 0 : i32
    %c0_i32_1 = arith.constant 0 : i32
    return %c0_i32, %c0_i32_0 : i32, i32
  }
}

module attributes {stable_mosaic.version = 11 : i64} {
  func.func @_patch_embed_kernel(%arg0: i32, %arg1: memref<16x48xf32, #tpu.memory_space<vmem>>, %arg2: memref<48x32xbf16, #tpu.memory_space<vmem>>, %arg3: memref<1x32xf32, #tpu.memory_space<vmem>>, %arg4: memref<1x32xf32, #tpu.memory_space<vmem>>, %arg5: memref<1x32xf32, #tpu.memory_space<vmem>>, %arg6: memref<16x32xbf16, #tpu.memory_space<vmem>>) attributes {dimension_semantics = [#tpu.dimension_semantics<parallel>], iteration_bounds = array<i64: 2>, scalar_prefetch = 0 : i64, scratch_operands = 0 : i64, tpu.core_type = #tpu.core_type<tc>, window_params = [{transform_indices = @transform_0, window_bounds = array<i64: 16, 48>}, {pipeline_mode = #tpu.pipeline_mode<synchronous>, transform_indices = @transform_1, window_bounds = array<i64: 48, 32>}, {pipeline_mode = #tpu.pipeline_mode<synchronous>, transform_indices = @transform_2, window_bounds = array<i64: 1, 32>}, {pipeline_mode = #tpu.pipeline_mode<synchronous>, transform_indices = @transform_3, window_bounds = array<i64: 1, 32>}, {pipeline_mode = #tpu.pipeline_mode<synchronous>, transform_indices = @transform_4, window_bounds = array<i64: 1, 32>}, {transform_indices = @transform_5, window_bounds = array<i64: 16, 32>}]} {
    %c0 = arith.constant 0 : index
    %c0_0 = arith.constant 0 : index
    %0 = vector.load %arg1[%c0, %c0_0] : memref<16x48xf32, #tpu.memory_space<vmem>>, vector<16x48xf32>
    %1 = arith.truncf %0 : vector<16x48xf32> to vector<16x48xbf16>
    %c0_1 = arith.constant 0 : index
    %c0_2 = arith.constant 0 : index
    %2 = vector.load %arg2[%c0_1, %c0_2] : memref<48x32xbf16, #tpu.memory_space<vmem>>, vector<48x32xbf16>
    %cst = arith.constant dense<0.000000e+00> : vector<16x32xf32>
    %3 = tpu.matmul %1, %2, %cst {dimension_numbers = #tpu.dot_dimension_numbers<[1], [0], [0], [1], [0, 0, 1, 1], [], []>} : vector<16x48xbf16>, vector<48x32xbf16>, vector<16x32xf32> -> vector<16x32xf32>
    %c0_3 = arith.constant 0 : index
    %c0_4 = arith.constant 0 : index
    %4 = vector.load %arg3[%c0_3, %c0_4] : memref<1x32xf32, #tpu.memory_space<vmem>>, vector<1x32xf32>
    %5 = vector.broadcast %4 : vector<1x32xf32> to vector<16x32xf32>
    %6 = arith.addf %3, %5 : vector<16x32xf32>
    %cst_5 = arith.constant 0.000000e+00 : f32
    %7 = vector.broadcast %cst_5 : f32 to vector<16x32xf32>
    %8 = arith.maximumf %6, %7 : vector<16x32xf32>
    %c0_6 = arith.constant 0 : index
    %c0_7 = arith.constant 0 : index
    %9 = vector.load %arg4[%c0_6, %c0_7] : memref<1x32xf32, #tpu.memory_space<vmem>>, vector<1x32xf32>
    %10 = vector.broadcast %9 : vector<1x32xf32> to vector<16x32xf32>
    %11 = arith.mulf %8, %10 : vector<16x32xf32>
    %c0_8 = arith.constant 0 : index
    %c0_9 = arith.constant 0 : index
    %12 = vector.load %arg5[%c0_8, %c0_9] : memref<1x32xf32, #tpu.memory_space<vmem>>, vector<1x32xf32>
    %13 = vector.broadcast %12 : vector<1x32xf32> to vector<16x32xf32>
    %14 = arith.addf %11, %13 : vector<16x32xf32>
    %15 = arith.truncf %14 : vector<16x32xf32> to vector<16x32xbf16>
    %c0_10 = arith.constant 0 : index
    %c0_11 = arith.constant 0 : index
    %16 = vector.load %arg6[%c0_10, %c0_11] : memref<16x32xbf16, #tpu.memory_space<vmem>>, vector<16x32xbf16>
    tpu.vector_store %arg6[%c0_10, %c0_11], %15 {strides = array<i32>} : memref<16x32xbf16, #tpu.memory_space<vmem>>, vector<16x32xbf16>,
    return
  }
  func.func @transform_0(%arg0: i32) -> (i32, i32) {
    %c0_i32 = arith.constant 0 : i32
    %c0_i32_0 = arith.constant 0 : i32
    return %arg0, %c0_i32 : i32, i32
  }
  func.func @transform_1(%arg0: i32) -> (i32, i32) {
    %c0_i32 = arith.constant 0 : i32
    %c0_i32_0 = arith.constant 0 : i32
    %c0_i32_1 = arith.constant 0 : i32
    return %c0_i32, %c0_i32_0 : i32, i32
  }
  func.func @transform_2(%arg0: i32) -> (i32, i32) {
    %c0_i32 = arith.constant 0 : i32
    %c0_i32_0 = arith.constant 0 : i32
    %c0_i32_1 = arith.constant 0 : i32
    return %c0_i32, %c0_i32_0 : i32, i32
  }
  func.func @transform_3(%arg0: i32) -> (i32, i32) {
    %c0_i32 = arith.constant 0 : i32
    %c0_i32_0 = arith.constant 0 : i32
    %c0_i32_1 = arith.constant 0 : i32
    return %c0_i32, %c0_i32_0 : i32, i32
  }
  func.func @transform_4(%arg0: i32) -> (i32, i32) {
    %c0_i32 = arith.constant 0 : i32
    %c0_i32_0 = arith.constant 0 : i32
    %c0_i32_1 = arith.constant 0 : i32
    return %c0_i32, %c0_i32_0 : i32, i32
  }
  func.func @transform_5(%arg0: i32) -> (i32, i32) {
    %c0_i32 = arith.constant 0 : i32
    %c0_i32_0 = arith.constant 0 : i32
    return %arg0, %c0_i32 : i32, i32
  }
}

module attributes {stable_mosaic.version = 11 : i64} {
  func.func @_encoder_layer_kernel(%arg0: i32, %arg1: memref<32x32xbf16, #tpu.memory_space<vmem>>, %arg2: memref<32x96xbf16, #tpu.memory_space<vmem>>, %arg3: memref<1x96xf32, #tpu.memory_space<vmem>>, %arg4: memref<32x32xbf16, #tpu.memory_space<vmem>>, %arg5: memref<1x32xf32, #tpu.memory_space<vmem>>, %arg6: memref<1x32xf32, #tpu.memory_space<vmem>>, %arg7: memref<1x32xf32, #tpu.memory_space<vmem>>, %arg8: memref<32x2048xbf16, #tpu.memory_space<vmem>>, %arg9: memref<1x2048xf32, #tpu.memory_space<vmem>>, %arg10: memref<2048x32xbf16, #tpu.memory_space<vmem>>, %arg11: memref<1x32xf32, #tpu.memory_space<vmem>>, %arg12: memref<1x32xf32, #tpu.memory_space<vmem>>, %arg13: memref<1x32xf32, #tpu.memory_space<vmem>>, %arg14: memref<32x32xbf16, #tpu.memory_space<vmem>>) attributes {dimension_semantics = [#tpu.dimension_semantics<parallel>], iteration_bounds = array<i64: 1>, scalar_prefetch = 0 : i64, scratch_operands = 0 : i64, tpu.core_type = #tpu.core_type<tc>, window_params = [{transform_indices = @transform_0, window_bounds = array<i64: 32, 32>}, {pipeline_mode = #tpu.pipeline_mode<synchronous>, transform_indices = @transform_1, window_bounds = array<i64: 32, 96>}, {pipeline_mode = #tpu.pipeline_mode<synchronous>, transform_indices = @transform_2, window_bounds = array<i64: 1, 96>}, {pipeline_mode = #tpu.pipeline_mode<synchronous>, transform_indices = @transform_3, window_bounds = array<i64: 32, 32>}, {pipeline_mode = #tpu.pipeline_mode<synchronous>, transform_indices = @transform_4, window_bounds = array<i64: 1, 32>}, {pipeline_mode = #tpu.pipeline_mode<synchronous>, transform_indices = @transform_5, window_bounds = array<i64: 1, 32>}, {pipeline_mode = #tpu.pipeline_mode<synchronous>, transform_indices = @transform_6, window_bounds = array<i64: 1, 32>}, {pipeline_mode = #tpu.pipeline_mode<synchronous>, transform_indices = @transform_7, window_bounds = array<i64: 32, 2048>}, {pipeline_mode = #tpu.pipeline_mode<synchronous>, transform_indices = @transform_8, window_bounds = array<i64: 1, 2048>}, {pipeline_mode = #tpu.pipeline_mode<synchronous>, transform_indices = @transform_9, window_bounds = array<i64: 2048, 32>}, {pipeline_mode = #tpu.pipeline_mode<synchronous>, transform_indices = @transform_10, window_bounds = array<i64: 1, 32>}, {pipeline_mode = #tpu.pipeline_mode<synchronous>, transform_indices = @transform_11, window_bounds = array<i64: 1, 32>}, {pipeline_mode = #tpu.pipeline_mode<synchronous>, transform_indices = @transform_12, window_bounds = array<i64: 1, 32>}, {transform_indices = @transform_13, window_bounds = array<i64: 32, 32>}]} {
    %c0 = arith.constant 0 : index
    %c0_0 = arith.constant 0 : index
    %0 = vector.load %arg1[%c0, %c0_0] : memref<32x32xbf16, #tpu.memory_space<vmem>>, vector<32x32xbf16>
    %1 = arith.extf %0 : vector<32x32xbf16> to vector<32x32xf32>
    %c0_1 = arith.constant 0 : index
    %c0_2 = arith.constant 0 : index
    %2 = vector.load %arg2[%c0_1, %c0_2] : memref<32x96xbf16, #tpu.memory_space<vmem>>, vector<32x96xbf16>
    %cst = arith.constant dense<0.000000e+00> : vector<32x96xf32>
    %3 = tpu.matmul %0, %2, %cst {dimension_numbers = #tpu.dot_dimension_numbers<[1], [0], [0], [1], [0, 0, 1, 1], [], []>} : vector<32x32xbf16>, vector<32x96xbf16>, vector<32x96xf32> -> vector<32x96xf32>
    %c0_3 = arith.constant 0 : index
    %c0_4 = arith.constant 0 : index
    %4 = vector.load %arg3[%c0_3, %c0_4] : memref<1x96xf32, #tpu.memory_space<vmem>>, vector<1x96xf32>
    %5 = vector.broadcast %4 : vector<1x96xf32> to vector<32x96xf32>
    %6 = arith.addf %3, %5 : vector<32x96xf32>
    %7 = vector.extract_strided_slice %6 {offsets = [0, 0], sizes = [16, 96], strides = [1, 1]} : vector<32x96xf32> to vector<16x96xf32>
    %8 = tpu.transpose %7, [1, 0] : vector<16x96xf32> -> vector<96x16xf32>
    %9 = vector.shape_cast %8 : vector<96x16xf32> to vector<12x8x16xf32>
    %10 = vector.extract_strided_slice %9 {offsets = [0, 0, 0], sizes = [4, 8, 16], strides = [1, 1, 1]} : vector<12x8x16xf32> to vector<4x8x16xf32>
    %11 = tpu.transpose %10, [0, 2, 1] : vector<4x8x16xf32> -> vector<4x16x8xf32>
    %12 = arith.truncf %11 : vector<4x16x8xf32> to vector<4x16x8xbf16>
    %13 = vector.extract_strided_slice %9 {offsets = [4, 0, 0], sizes = [4, 8, 16], strides = [1, 1, 1]} : vector<12x8x16xf32> to vector<4x8x16xf32>
    %14 = arith.truncf %13 : vector<4x8x16xf32> to vector<4x8x16xbf16>
    %15 = vector.extract_strided_slice %9 {offsets = [8, 0, 0], sizes = [4, 8, 16], strides = [1, 1, 1]} : vector<12x8x16xf32> to vector<4x8x16xf32>
    %16 = arith.truncf %15 : vector<4x8x16xf32> to vector<4x8x16xbf16>
    "tpu.trace_start"() <{level = 10 : i32, message = "hqd,hdk->hqk"}> : () -> ()
    %cst_5 = arith.constant dense<0.000000e+00> : vector<4x16x16xf32>
    %17 = tpu.matmul %12, %14, %cst_5 {dimension_numbers = #tpu.dot_dimension_numbers<[2], [1], [1], [2], [0, 0, 0, 1, 1, 2], [0], [0]>} : vector<4x16x8xbf16>, vector<4x8x16xbf16>, vector<4x16x16xf32> -> vector<4x16x16xf32>
    "tpu.trace_stop"() : () -> ()
    %cst_6 = arith.constant dense<0xFF800000> : vector<4x16xf32>
    %18 = vector.multi_reduction <maximumf>, %17, %cst_6 [2] : vector<4x16x16xf32> to vector<4x16xf32>
    %19 = vector.shape_cast %18 : vector<4x16xf32> to vector<4x16x1xf32>
    %20 = vector.broadcast %19 : vector<4x16x1xf32> to vector<4x16x16xf32>
    %21 = arith.subf %17, %20 : vector<4x16x16xf32>
    %22 = math.exp %21 : vector<4x16x16xf32>
    %cst_7 = arith.constant dense<0.000000e+00> : vector<4x16xf32>
    %23 = vector.multi_reduction <add>, %22, %cst_7 [2] : vector<4x16x16xf32> to vector<4x16xf32>
    %24 = vector.shape_cast %23 : vector<4x16xf32> to vector<4x16x1xf32>
    %25 = tpu.reciprocal %24 {approx = true} : vector<4x16x1xf32> -> vector<4x16x1xf32>
    %26 = vector.broadcast %25 : vector<4x16x1xf32> to vector<4x16x16xf32>
    %27 = arith.mulf %22, %26 : vector<4x16x16xf32>
    %28 = arith.truncf %27 : vector<4x16x16xf32> to vector<4x16x16xbf16>
    "tpu.trace_start"() <{level = 10 : i32, message = "hdk,hqk->hdq"}> : () -> ()
    %cst_8 = arith.constant dense<0.000000e+00> : vector<4x8x16xf32>
    %29 = tpu.matmul %16, %28, %cst_8 {dimension_numbers = #tpu.dot_dimension_numbers<[2], [2], [1], [1], [0, 0, 0, 1, 1, 1], [0], [0]>} : vector<4x8x16xbf16>, vector<4x16x16xbf16>, vector<4x8x16xf32> -> vector<4x8x16xf32>
    "tpu.trace_stop"() : () -> ()
    %30 = vector.shape_cast %29 : vector<4x8x16xf32> to vector<32x16xf32>
    %31 = tpu.transpose %30, [1, 0] : vector<32x16xf32> -> vector<16x32xf32>
    %32 = vector.extract_strided_slice %6 {offsets = [16, 0], sizes = [16, 96], strides = [1, 1]} : vector<32x96xf32> to vector<16x96xf32>
    %33 = tpu.transpose %32, [1, 0] : vector<16x96xf32> -> vector<96x16xf32>
    %34 = vector.shape_cast %33 : vector<96x16xf32> to vector<12x8x16xf32>
    %35 = vector.extract_strided_slice %34 {offsets = [0, 0, 0], sizes = [4, 8, 16], strides = [1, 1, 1]} : vector<12x8x16xf32> to vector<4x8x16xf32>
    %36 = tpu.transpose %35, [0, 2, 1] : vector<4x8x16xf32> -> vector<4x16x8xf32>
    %37 = arith.truncf %36 : vector<4x16x8xf32> to vector<4x16x8xbf16>
    %38 = vector.extract_strided_slice %34 {offsets = [4, 0, 0], sizes = [4, 8, 16], strides = [1, 1, 1]} : vector<12x8x16xf32> to vector<4x8x16xf32>
    %39 = arith.truncf %38 : vector<4x8x16xf32> to vector<4x8x16xbf16>
    %40 = vector.extract_strided_slice %34 {offsets = [8, 0, 0], sizes = [4, 8, 16], strides = [1, 1, 1]} : vector<12x8x16xf32> to vector<4x8x16xf32>
    %41 = arith.truncf %40 : vector<4x8x16xf32> to vector<4x8x16xbf16>
    "tpu.trace_start"() <{level = 10 : i32, message = "hqd,hdk->hqk"}> : () -> ()
    %cst_9 = arith.constant dense<0.000000e+00> : vector<4x16x16xf32>
    %42 = tpu.matmul %37, %39, %cst_9 {dimension_numbers = #tpu.dot_dimension_numbers<[2], [1], [1], [2], [0, 0, 0, 1, 1, 2], [0], [0]>} : vector<4x16x8xbf16>, vector<4x8x16xbf16>, vector<4x16x16xf32> -> vector<4x16x16xf32>
    "tpu.trace_stop"() : () -> ()
    %cst_10 = arith.constant dense<0xFF800000> : vector<4x16xf32>
    %43 = vector.multi_reduction <maximumf>, %42, %cst_10 [2] : vector<4x16x16xf32> to vector<4x16xf32>
    %44 = vector.shape_cast %43 : vector<4x16xf32> to vector<4x16x1xf32>
    %45 = vector.broadcast %44 : vector<4x16x1xf32> to vector<4x16x16xf32>
    %46 = arith.subf %42, %45 : vector<4x16x16xf32>
    %47 = math.exp %46 : vector<4x16x16xf32>
    %cst_11 = arith.constant dense<0.000000e+00> : vector<4x16xf32>
    %48 = vector.multi_reduction <add>, %47, %cst_11 [2] : vector<4x16x16xf32> to vector<4x16xf32>
    %49 = vector.shape_cast %48 : vector<4x16xf32> to vector<4x16x1xf32>
    %50 = tpu.reciprocal %49 {approx = true} : vector<4x16x1xf32> -> vector<4x16x1xf32>
    %51 = vector.broadcast %50 : vector<4x16x1xf32> to vector<4x16x16xf32>
    %52 = arith.mulf %47, %51 : vector<4x16x16xf32>
    %53 = arith.truncf %52 : vector<4x16x16xf32> to vector<4x16x16xbf16>
    "tpu.trace_start"() <{level = 10 : i32, message = "hdk,hqk->hdq"}> : () -> ()
    %cst_12 = arith.constant dense<0.000000e+00> : vector<4x8x16xf32>
    %54 = tpu.matmul %41, %53, %cst_12 {dimension_numbers = #tpu.dot_dimension_numbers<[2], [2], [1], [1], [0, 0, 0, 1, 1, 1], [0], [0]>} : vector<4x8x16xbf16>, vector<4x16x16xbf16>, vector<4x8x16xf32> -> vector<4x8x16xf32>
    "tpu.trace_stop"() : () -> ()
    %55 = vector.shape_cast %54 : vector<4x8x16xf32> to vector<32x16xf32>
    %56 = tpu.transpose %55, [1, 0] : vector<32x16xf32> -> vector<16x32xf32>
    %57 = tpu.concatenate %31, %56 in 0 : vector<16x32xf32>, vector<16x32xf32> -> vector<32x32xf32>
    %58 = arith.truncf %57 : vector<32x32xf32> to vector<32x32xbf16>
    %c0_13 = arith.constant 0 : index
    %c0_14 = arith.constant 0 : index
    %59 = vector.load %arg4[%c0_13, %c0_14] : memref<32x32xbf16, #tpu.memory_space<vmem>>, vector<32x32xbf16>
    %cst_15 = arith.constant dense<0.000000e+00> : vector<32x32xf32>
    %60 = tpu.matmul %58, %59, %cst_15 {dimension_numbers = #tpu.dot_dimension_numbers<[1], [0], [0], [1], [0, 0, 1, 1], [], []>} : vector<32x32xbf16>, vector<32x32xbf16>, vector<32x32xf32> -> vector<32x32xf32>
    %c0_16 = arith.constant 0 : index
    %c0_17 = arith.constant 0 : index
    %61 = vector.load %arg5[%c0_16, %c0_17] : memref<1x32xf32, #tpu.memory_space<vmem>>, vector<1x32xf32>
    %62 = vector.broadcast %61 : vector<1x32xf32> to vector<32x32xf32>
    %63 = arith.addf %60, %62 : vector<32x32xf32>
    %64 = arith.addf %1, %63 : vector<32x32xf32>
    %c0_18 = arith.constant 0 : index
    %c0_19 = arith.constant 0 : index
    %65 = vector.load %arg6[%c0_18, %c0_19] : memref<1x32xf32, #tpu.memory_space<vmem>>, vector<1x32xf32>
    %c0_20 = arith.constant 0 : index
    %c0_21 = arith.constant 0 : index
    %66 = vector.load %arg7[%c0_20, %c0_21] : memref<1x32xf32, #tpu.memory_space<vmem>>, vector<1x32xf32>
    %cst_22 = arith.constant dense<0.000000e+00> : vector<32xf32>
    %67 = vector.multi_reduction <add>, %64, %cst_22 [1] : vector<32x32xf32> to vector<32xf32>
    %68 = vector.shape_cast %67 : vector<32xf32> to vector<32x1xf32>
    %cst_23 = arith.constant 3.200000e+01 : f32
    %69 = vector.broadcast %cst_23 : f32 to vector<32x1xf32>
    %70 = arith.divf %68, %69 : vector<32x1xf32>
    %71 = vector.broadcast %70 : vector<32x1xf32> to vector<32x32xf32>
    %72 = arith.subf %64, %71 : vector<32x32xf32>
    %73 = arith.mulf %72, %72 : vector<32x32xf32>
    %cst_24 = arith.constant dense<0.000000e+00> : vector<32xf32>
    %74 = vector.multi_reduction <add>, %73, %cst_24 [1] : vector<32x32xf32> to vector<32xf32>
    %75 = vector.shape_cast %74 : vector<32xf32> to vector<32x1xf32>
    %cst_25 = arith.constant 3.200000e+01 : f32
    %76 = vector.broadcast %cst_25 : f32 to vector<32x1xf32>
    %77 = arith.divf %75, %76 : vector<32x1xf32>
    %78 = vector.broadcast %70 : vector<32x1xf32> to vector<32x32xf32>
    %79 = arith.subf %64, %78 : vector<32x32xf32>
    %cst_26 = arith.constant 9.99999974E-6 : f32
    %80 = vector.broadcast %cst_26 : f32 to vector<32x1xf32>
    %81 = arith.addf %77, %80 : vector<32x1xf32>
    %82 = math.rsqrt %81 : vector<32x1xf32>
    %83 = vector.broadcast %82 : vector<32x1xf32> to vector<32x32xf32>
    %84 = arith.mulf %79, %83 : vector<32x32xf32>
    %85 = vector.broadcast %65 : vector<1x32xf32> to vector<32x32xf32>
    %86 = arith.mulf %84, %85 : vector<32x32xf32>
    %87 = vector.broadcast %66 : vector<1x32xf32> to vector<32x32xf32>
    %88 = arith.addf %86, %87 : vector<32x32xf32>
    %89 = arith.truncf %88 : vector<32x32xf32> to vector<32x32xbf16>
    %c0_27 = arith.constant 0 : index
    %c0_28 = arith.constant 0 : index
    %90 = vector.load %arg8[%c0_27, %c0_28] : memref<32x2048xbf16, #tpu.memory_space<vmem>>, vector<32x2048xbf16>
    %cst_29 = arith.constant dense<0.000000e+00> : vector<32x2048xf32>
    %91 = tpu.matmul %89, %90, %cst_29 {dimension_numbers = #tpu.dot_dimension_numbers<[1], [0], [0], [1], [0, 0, 1, 1], [], []>} : vector<32x32xbf16>, vector<32x2048xbf16>, vector<32x2048xf32> -> vector<32x2048xf32>
    %c0_30 = arith.constant 0 : index
    %c0_31 = arith.constant 0 : index
    %92 = vector.load %arg9[%c0_30, %c0_31] : memref<1x2048xf32, #tpu.memory_space<vmem>>, vector<1x2048xf32>
    %93 = vector.broadcast %92 : vector<1x2048xf32> to vector<32x2048xf32>
    %94 = arith.addf %91, %93 : vector<32x2048xf32>
    %cst_32 = arith.constant 0.000000e+00 : f32
    %95 = vector.broadcast %cst_32 : f32 to vector<32x2048xf32>
    %96 = arith.maximumf %94, %95 : vector<32x2048xf32>
    %97 = arith.truncf %96 : vector<32x2048xf32> to vector<32x2048xbf16>
    %c0_33 = arith.constant 0 : index
    %c0_34 = arith.constant 0 : index
    %98 = vector.load %arg10[%c0_33, %c0_34] : memref<2048x32xbf16, #tpu.memory_space<vmem>>, vector<2048x32xbf16>
    %cst_35 = arith.constant dense<0.000000e+00> : vector<32x32xf32>
    %99 = tpu.matmul %97, %98, %cst_35 {dimension_numbers = #tpu.dot_dimension_numbers<[1], [0], [0], [1], [0, 0, 1, 1], [], []>} : vector<32x2048xbf16>, vector<2048x32xbf16>, vector<32x32xf32> -> vector<32x32xf32>
    %c0_36 = arith.constant 0 : index
    %c0_37 = arith.constant 0 : index
    %100 = vector.load %arg11[%c0_36, %c0_37] : memref<1x32xf32, #tpu.memory_space<vmem>>, vector<1x32xf32>
    %101 = vector.broadcast %100 : vector<1x32xf32> to vector<32x32xf32>
    %102 = arith.addf %99, %101 : vector<32x32xf32>
    %103 = arith.addf %88, %102 : vector<32x32xf32>
    %c0_38 = arith.constant 0 : index
    %c0_39 = arith.constant 0 : index
    %104 = vector.load %arg12[%c0_38, %c0_39] : memref<1x32xf32, #tpu.memory_space<vmem>>, vector<1x32xf32>
    %c0_40 = arith.constant 0 : index
    %c0_41 = arith.constant 0 : index
    %105 = vector.load %arg13[%c0_40, %c0_41] : memref<1x32xf32, #tpu.memory_space<vmem>>, vector<1x32xf32>
    %cst_42 = arith.constant dense<0.000000e+00> : vector<32xf32>
    %106 = vector.multi_reduction <add>, %103, %cst_42 [1] : vector<32x32xf32> to vector<32xf32>
    %107 = vector.shape_cast %106 : vector<32xf32> to vector<32x1xf32>
    %cst_43 = arith.constant 3.200000e+01 : f32
    %108 = vector.broadcast %cst_43 : f32 to vector<32x1xf32>
    %109 = arith.divf %107, %108 : vector<32x1xf32>
    %110 = vector.broadcast %109 : vector<32x1xf32> to vector<32x32xf32>
    %111 = arith.subf %103, %110 : vector<32x32xf32>
    %112 = arith.mulf %111, %111 : vector<32x32xf32>
    %cst_44 = arith.constant dense<0.000000e+00> : vector<32xf32>
    %113 = vector.multi_reduction <add>, %112, %cst_44 [1] : vector<32x32xf32> to vector<32xf32>
    %114 = vector.shape_cast %113 : vector<32xf32> to vector<32x1xf32>
    %cst_45 = arith.constant 3.200000e+01 : f32
    %115 = vector.broadcast %cst_45 : f32 to vector<32x1xf32>
    %116 = arith.divf %114, %115 : vector<32x1xf32>
    %117 = vector.broadcast %109 : vector<32x1xf32> to vector<32x32xf32>
    %118 = arith.subf %103, %117 : vector<32x32xf32>
    %cst_46 = arith.constant 9.99999974E-6 : f32
    %119 = vector.broadcast %cst_46 : f32 to vector<32x1xf32>
    %120 = arith.addf %116, %119 : vector<32x1xf32>
    %121 = math.rsqrt %120 : vector<32x1xf32>
    %122 = vector.broadcast %121 : vector<32x1xf32> to vector<32x32xf32>
    %123 = arith.mulf %118, %122 : vector<32x32xf32>
    %124 = vector.broadcast %104 : vector<1x32xf32> to vector<32x32xf32>
    %125 = arith.mulf %123, %124 : vector<32x32xf32>
    %126 = vector.broadcast %105 : vector<1x32xf32> to vector<32x32xf32>
    %127 = arith.addf %125, %126 : vector<32x32xf32>
    %128 = arith.truncf %127 : vector<32x32xf32> to vector<32x32xbf16>
    %c0_47 = arith.constant 0 : index
    %c0_48 = arith.constant 0 : index
    %129 = vector.load %arg14[%c0_47, %c0_48] : memref<32x32xbf16, #tpu.memory_space<vmem>>, vector<32x32xbf16>
    tpu.vector_store %arg14[%c0_47, %c0_48], %128 {strides = array<i32>} : memref<32x32xbf16, #tpu.memory_space<vmem>>, vector<32x32xbf16>,
    return
  }
  func.func @transform_0(%arg0: i32) -> (i32, i32) {
    %c0_i32 = arith.constant 0 : i32
    %c0_i32_0 = arith.constant 0 : i32
    return %arg0, %c0_i32 : i32, i32
  }
  func.func @transform_1(%arg0: i32) -> (i32, i32) {
    %c0_i32 = arith.constant 0 : i32
    %c0_i32_0 = arith.constant 0 : i32
    %c0_i32_1 = arith.constant 0 : i32
    return %c0_i32, %c0_i32_0 : i32, i32
  }
  func.func @transform_2(%arg0: i32) -> (i32, i32) {
    %c0_i32 = arith.constant 0 : i32
    %c0_i32_0 = arith.constant 0 : i32
    %c0_i32_1 = arith.constant 0 : i32
    return %c0_i32, %c0_i32_0 : i32, i32
  }
  func.func @transform_3(%arg0: i32) -> (i32, i32) {
    %c0_i32 = arith.constant 0 : i32
    %c0_i32_0 = arith.constant 0 : i32
    %c0_i32_1 = arith.constant 0 : i32
    return %c0_i32, %c0_i32_0 : i32, i32
  }
  func.func @transform_4(%arg0: i32) -> (i32, i32) {
    %c0_i32 = arith.constant 0 : i32
    %c0_i32_0 = arith.constant 0 : i32
    %c0_i32_1 = arith.constant 0 : i32
    return %c0_i32, %c0_i32_0 : i32, i32
  }
  func.func @transform_5(%arg0: i32) -> (i32, i32) {
    %c0_i32 = arith.constant 0 : i32
    %c0_i32_0 = arith.constant 0 : i32
    %c0_i32_1 = arith.constant 0 : i32
    return %c0_i32, %c0_i32_0 : i32, i32
  }
  func.func @transform_6(%arg0: i32) -> (i32, i32) {
    %c0_i32 = arith.constant 0 : i32
    %c0_i32_0 = arith.constant 0 : i32
    %c0_i32_1 = arith.constant 0 : i32
    return %c0_i32, %c0_i32_0 : i32, i32
  }
  func.func @transform_7(%arg0: i32) -> (i32, i32) {
    %c0_i32 = arith.constant 0 : i32
    %c0_i32_0 = arith.constant 0 : i32
    %c0_i32_1 = arith.constant 0 : i32
    return %c0_i32, %c0_i32_0 : i32, i32
  }
  func.func @transform_8(%arg0: i32) -> (i32, i32) {
    %c0_i32 = arith.constant 0 : i32
    %c0_i32_0 = arith.constant 0 : i32
    %c0_i32_1 = arith.constant 0 : i32
    return %c0_i32, %c0_i32_0 : i32, i32
  }
  func.func @transform_9(%arg0: i32) -> (i32, i32) {
    %c0_i32 = arith.constant 0 : i32
    %c0_i32_0 = arith.constant 0 : i32
    %c0_i32_1 = arith.constant 0 : i32
    return %c0_i32, %c0_i32_0 : i32, i32
  }
  func.func @transform_10(%arg0: i32) -> (i32, i32) {
    %c0_i32 = arith.constant 0 : i32
    %c0_i32_0 = arith.constant 0 : i32
    %c0_i32_1 = arith.constant 0 : i32
    return %c0_i32, %c0_i32_0 : i32, i32
  }
  func.func @transform_11(%arg0: i32) -> (i32, i32) {
    %c0_i32 = arith.constant 0 : i32
    %c0_i32_0 = arith.constant 0 : i32
    %c0_i32_1 = arith.constant 0 : i32
    return %c0_i32, %c0_i32_0 : i32, i32
  }
  func.func @transform_12(%arg0: i32) -> (i32, i32) {
    %c0_i32 = arith.constant 0 : i32
    %c0_i32_0 = arith.constant 0 : i32
    %c0_i32_1 = arith.constant 0 : i32
    return %c0_i32, %c0_i32_0 : i32, i32
  }
  func.func @transform_13(%arg0: i32) -> (i32, i32) {
    %c0_i32 = arith.constant 0 : i32
    %c0_i32_0 = arith.constant 0 : i32
    return %arg0, %c0_i32 : i32, i32
  }
}

module attributes {stable_mosaic.version = 11 : i64} {
  func.func @_mean_fc_kernel(%arg0: i32, %arg1: memref<32x32xbf16, #tpu.memory_space<vmem>>, %arg2: memref<32x128xbf16, #tpu.memory_space<vmem>>, %arg3: memref<1x128xf32, #tpu.memory_space<vmem>>, %arg4: memref<2x128xf32, #tpu.memory_space<vmem>>) attributes {dimension_semantics = [#tpu.dimension_semantics<parallel>], iteration_bounds = array<i64: 1>, scalar_prefetch = 0 : i64, scratch_operands = 0 : i64, tpu.core_type = #tpu.core_type<tc>, window_params = [{transform_indices = @transform_0, window_bounds = array<i64: 32, 32>}, {pipeline_mode = #tpu.pipeline_mode<synchronous>, transform_indices = @transform_1, window_bounds = array<i64: 32, 128>}, {pipeline_mode = #tpu.pipeline_mode<synchronous>, transform_indices = @transform_2, window_bounds = array<i64: 1, 128>}, {transform_indices = @transform_3, window_bounds = array<i64: 2, 128>}]} {
    %c0 = arith.constant 0 : index
    %c0_0 = arith.constant 0 : index
    %0 = vector.load %arg1[%c0, %c0_0] : memref<32x32xbf16, #tpu.memory_space<vmem>>, vector<32x32xbf16>
    %1 = arith.extf %0 : vector<32x32xbf16> to vector<32x32xf32>
    %2 = vector.shape_cast %1 : vector<32x32xf32> to vector<2x16x32xf32>
    %cst = arith.constant dense<0.000000e+00> : vector<2x32xf32>
    %3 = vector.multi_reduction <add>, %2, %cst [1] : vector<2x16x32xf32> to vector<2x32xf32>
    %cst_1 = arith.constant 1.600000e+01 : f32
    %4 = vector.broadcast %cst_1 : f32 to vector<2x32xf32>
    %5 = arith.divf %3, %4 : vector<2x32xf32>
    %6 = arith.truncf %5 : vector<2x32xf32> to vector<2x32xbf16>
    %c0_2 = arith.constant 0 : index
    %c0_3 = arith.constant 0 : index
    %7 = vector.load %arg2[%c0_2, %c0_3] : memref<32x128xbf16, #tpu.memory_space<vmem>>, vector<32x128xbf16>
    %cst_4 = arith.constant dense<0.000000e+00> : vector<2x128xf32>
    %8 = tpu.matmul %6, %7, %cst_4 {dimension_numbers = #tpu.dot_dimension_numbers<[1], [0], [0], [1], [0, 0, 1, 1], [], []>} : vector<2x32xbf16>, vector<32x128xbf16>, vector<2x128xf32> -> vector<2x128xf32>
    %c0_5 = arith.constant 0 : index
    %c0_6 = arith.constant 0 : index
    %9 = vector.load %arg3[%c0_5, %c0_6] : memref<1x128xf32, #tpu.memory_space<vmem>>, vector<1x128xf32>
    %10 = vector.broadcast %9 : vector<1x128xf32> to vector<2x128xf32>
    %11 = arith.addf %8, %10 : vector<2x128xf32>
    %c0_7 = arith.constant 0 : index
    %c0_8 = arith.constant 0 : index
    %12 = vector.load %arg4[%c0_7, %c0_8] : memref<2x128xf32, #tpu.memory_space<vmem>>, vector<2x128xf32>
    tpu.vector_store %arg4[%c0_7, %c0_8], %11 {strides = array<i32>} : memref<2x128xf32, #tpu.memory_space<vmem>>, vector<2x128xf32>,
    return
  }
  func.func @transform_0(%arg0: i32) -> (i32, i32) {
    %c0_i32 = arith.constant 0 : i32
    %c0_i32_0 = arith.constant 0 : i32
    return %arg0, %c0_i32 : i32, i32
  }
  func.func @transform_1(%arg0: i32) -> (i32, i32) {
    %c0_i32 = arith.constant 0 : i32
    %c0_i32_0 = arith.constant 0 : i32
    %c0_i32_1 = arith.constant 0 : i32
    return %c0_i32, %c0_i32_0 : i32, i32
  }
  func.func @transform_2(%arg0: i32) -> (i32, i32) {
    %c0_i32 = arith.constant 0 : i32
    %c0_i32_0 = arith.constant 0 : i32
    %c0_i32_1 = arith.constant 0 : i32
    return %c0_i32, %c0_i32_0 : i32, i32
  }
  func.func @transform_3(%arg0: i32) -> (i32, i32) {
    %c0_i32 = arith.constant 0 : i32
    %c0_i32_0 = arith.constant 0 : i32
    return %arg0, %c0_i32 : i32, i32
  }
}

</mosaic_0001>

<bundles_post_ra>
// kernel: tpu_custom_call.1
= control target key start
LH: loop header
LB: loop body
LE: loop exit
PB: predicated region body
PF: predicated region fallthrough
CT: control target
= control target key end

     0   :  { %6 = vsyncpa [#allocation3], 0  ;;  %s340_s0 = inlined_call_operand.hbm [shape: f32[8,128], index: 0, kind: input, shape index: {}]   ;;  %s341_s1 = inlined_call_operand.hbm [shape: f32[8,128], index: 1, kind: output, shape index: {}]  }
   0x1   :  { %7 = vsyncpa [#allocation4], 0  ;;  %s261_s6 = smov 0  }
   0x2 LB: > { %s144_s7 = sadd.s32 4294967295, %s247_s6   ;;  %p145_p0 = scmp.ge.s32.totalorder %s247_s6, 1  ;;  %s247_s6 = sphi %s261_s6, %s13_s6  }
   0x3   : > { %p60_p1 = scmp.lt.s32.totalorder %s247_s6, 3  ;;  %p275_p3 = scmp.eq.s32.totalorder %s144_s7, 0 }
   0x4   : > { %s249_s10 = smov [#allocation2]   ;;  %s179_s15 = scalar_lea.hbm %s340_s0, 128 }
   0x5   : > { %p269_p2 = pnand %p145_p0, %p60_p1  ;;  %s73_s11 = sshll.u32 %s249_s10, 4  ;;  %s74_s11 = int_to_ptr.vmem [resolvable:$true] %s73_s11 }
   0x6   : > { %s346_s9 = scalar_select %p275_p3, 1, 0 }
   0x7   : > { %s345_s8 = scalar_select %p269_p2, 1, 0 }
   0x8   : > { %p161_p4 = pneg %p269_p2  ;;  %p180_p6 = scmp.ne.s32.totalorder %s340_s0, %s179_s15 }
   0x9   : > { %p186_p10 = scmp.lt.u32.totalorder %s179_s15, %s340_s0 }
   0xa   : > { %p283_p5 = pnand %p275_p3, %p161_p4 }
   0xc   : > { %p181_p7 = pneg %p283_p5 }
   0xe   : > { %p182_p8 = pnand %p181_p7, %p180_p6 }
  0x10   : > { %p183_p9 = pneg %p182_p8 }
  0x12   : > { %p188_p11 = pnand %p186_p10, %p183_p9 }
  0x14   : > { %191 = shalt.err (!%p188_p11)
}
  0x15   : > { %s192_s20 = scalar_lea.vmem %s74_s11, 128  ;;  %p200_p1 = scmp.lt.s32.totalorder %s74_s11, %s74_s11 }
  0x16   : > { %p193_p12 = scmp.ne.s32.totalorder %s74_s11, %s192_s20  ;;  %p201_p4 = scmp.lt.s32.totalorder %s192_s20, %s192_s20 }
  0x18   : > { %p195_p13 = pnand %p193_p12, %p181_p7  ;;  %p202_p3 = por %p201_p4, %p200_p1 }
  0x1a   : > { %p196_p0 = pneg %p195_p13 }
  0x1c   : > { %p203_p2 = pnand %p202_p3, %p196_p0 }
  0x1e   : > { %206 = shalt.err (!%p203_p2)
}
  0x1f   : > { %164 = dma.hbm_to_vmem [thread:$0]  (!%p283_p5), %s340_s0, 128, %s74_s11, [#allocation3]  }
  0x20   : > { %p348_p6 = scmp.ne.s32.totalorder %s345_s8, 0 }
  0x21   : > { %p349_p8 = scmp.ne.s32.totalorder (!%p348_p6), %s346_s9, 0 }
  0x22   : > { %86 = sbr.rel (%p348_p6) target bundleno = 67 (0x43), region = 24 }
  0x29   : > { %238 = dma.done.wait (%p349_p8), [#allocation3], 128  }
  0x2a   : > { %240 = vsyncadd (%p349_p8), [#allocation3], 4294967168  ;;  %s250_s23 = smov [#allocation5]   ;;  %p311_p2 = scmp.eq.s32.totalorder %s144_s7, 1  ;;  %v96_v0 = vld [vmem:[#allocation2] sm:$0xff] }
  0x2b   : > { %s105_s24 = sshll.u32 %s250_s23, 4  ;;  %97 = vst [vmem:[#allocation5] sm:$0xff] %v96_v0  ;;  %s106_s24 = int_to_ptr.vmem [resolvable:$true] %s105_s24 }
  0x2c   : > { %s207_s26 = scalar_lea.vmem %s106_s24, 128  ;;  %p214_p9 = scmp.lt.s32.totalorder %s106_s24, %s106_s24 }
  0x2d   : > { %p208_p3 = scmp.ne.s32.totalorder %s106_s24, %s207_s26  ;;  %p215_p10 = scmp.lt.s32.totalorder %s207_s26, %s207_s26 }
  0x2f   : > { %p209_p5 = pnand %p208_p3, %p311_p2  ;;  %p216_p11 = por %p215_p10, %p214_p9 }
  0x31   : > { %p210_p7 = pneg %p209_p5 }
  0x33   : > { %p217_p12 = pnand %p216_p11, %p210_p7 }
  0x35   : > { %220 = shalt.err (!%p217_p12)
}
  0x36   : > { %s221_s29 = scalar_lea.hbm %s341_s1, 128 }
  0x37   : > { %p222_p13 = scmp.ne.s32.totalorder %s341_s1, %s221_s29  ;;  %p227_p4 = scmp.lt.u32.totalorder %s221_s29, %s341_s1 }
  0x39   : > { %p223_p0 = pnand %p222_p13, %p311_p2 }
  0x3b   : > { %p224_p1 = pneg %p223_p0 }
  0x3d   : > { %p229_p6 = pnand %p227_p4, %p224_p1 }
  0x3f   : > { %232 = shalt.err (!%p229_p6)
}
  0x40   : > { %158 = dma.vmem_to_hbm [thread:$0]  (%p311_p2), %s106_s24, 128, %s341_s1, [#allocation4]  }
  0x41   : > { %242 = dma.done.wait (%p311_p2), [#allocation4], 128  }
  0x42   : > { %244 = vsyncadd (%p311_p2), [#allocation4], 4294967168 }
  0x43 PF: > { %s13_s6 = sadd.s32 1, %s247_s6  }
  0x44   : > { %p10_p8 = scmp.ge.s32.totalorder %s13_s6, 4  }
  0x46   :  { %12 = sbr.rel (!%p10_p8) target bundleno = 2 (0x2), region = 53 }
  0x4d   :  { %118 = vsyncpa [#allocation3], 1 }
  0x4e   :  { %120 = vsyncpa [#allocation3 + $0x1], 1 }
  0x4f   :  { %121 = vsyncpa [#allocation4], 1 }
  0x50   :  { %123 = vsyncpa [#allocation4 + $0x1], 1 }

// kernel: transformer_forward.4
= control target key start
LH: loop header
LB: loop body
LE: loop exit
PB: predicated region body
PF: predicated region fallthrough
CT: control target
= control target key end

     0   :  { %10 = vsyncpa [#allocation3], 0  ;;  %s1221_s0 = inlined_call_operand.hbm [shape: f32[32,48], index: 0, kind: input, shape index: {}]   ;;  %s1222_s1 = inlined_call_operand.hbm [shape: bf16[48,32], index: 1, kind: input, shape index: {}]   ;;  %s1223_s2 = inlined_call_operand.hbm [shape: f32[1,32], index: 2, kind: input, shape index: {}]   ;;  %s1224_s3 = inlined_call_operand.hbm [shape: f32[1,32], index: 3, kind: input, shape index: {}]   ;;  %s1225_s4 = inlined_call_operand.hbm [shape: f32[1,32], index: 4, kind: input, shape index: {}]   ;;  %s1226_s5 = inlined_call_operand.hbm [shape: bf16[32,32], index: 5, kind: output, shape index: {}]  }
   0x1   :  { %12 = vsyncpa [#allocation3 + $0x1], 0 }
   0x2   :  { %13 = vsyncpa [#allocation6], 0 }
   0x3   :  { %14 = vsyncpa [#allocation9], 0 }
   0x4   :  { %15 = vsyncpa [#allocation4], 0 }
   0x5   :  { %17 = vsyncpa [#allocation4 + $0x1], 0  ;;  %s942_s18 = smov 0   ;;  %s944_s19 = smov 0  }
   0x6   :  { %s946_s20 = smov 0   ;;  %s948_s21 = smov 0  }
   0x7 LB: > { %s963_s22 = sadd.s32 4294967295, %s896_s21   ;;  %s533_s23 = sadd.s32 4294967294, %s896_s21   ;;  %s896_s21 = sphi %s948_s21, %s1249_s21   ;;  %s892_s20 = sphi %s946_s20, %s1248_s20   ;;  %s888_s19 = sphi %s944_s19, %s1247_s19   ;;  %s884_s18 = sphi %s942_s18, %s1246_s18  }
   0x8   : > { %p43_p0 = scmp.ne.s32.totalorder %s888_s19, %s884_s18  ;;  %p1227_p1 = scmp.eq.s32.totalorder %s963_s22, 0 }
   0x9   : > { %p157_p3 = scmp.eq.s32.totalorder %s533_s23, 1  ;;  %p534_p5 = scmp.ge.s32.totalorder %s896_s21, 1 }
   0xa   : > { %p972_p4 = por %p1227_p1, %p43_p0  ;;  %p164_p7 = scmp.lt.s32.totalorder %s896_s21, 3 }
   0xb   : > { %p977_p6 = por %p157_p3, %p43_p0  ;;  %s898_s27 = smov [#allocation5]  }
   0xc   : > { %s1230_s24 = scalar_select %p972_p4, 1, 0 }
   0xd   : > { %s1231_s25 = scalar_select %p977_p6, 1, 0 }
   0xe   : > { %p982_p8 = pnand %p534_p5, %p164_p7  ;;  %s176_s28 = sshll.u32 %s898_s27, 4  ;;  %s986_s28 = int_to_ptr.vmem [resolvable:$true] %s176_s28 }
   0xf   : > { %s899_s30 = smov [#allocation8]   ;;  %s900_s7 = smov [#allocation7]  }
  0x10   : > { %s1232_s26 = scalar_select %p982_p8, 1, 0 }
  0x11   : > { %p602_p9 = pneg %p982_p8  ;;  %s201_s6 = sshll.u32 %s899_s30, 4  ;;  %s997_s6 = int_to_ptr.vmem [resolvable:$true] %s201_s6 }
  0x12   : > { %s999_s8 = sshll.u32 %s900_s7, 4  ;;  %s680_s11 = scalar_lea.hbm %s1222_s1, 384  ;;  %s191_s8 = int_to_ptr.vmem [resolvable:$true] %s999_s8 }
  0x13   : > { %p993_p11 = pnand %p602_p9, %p1227_p1  ;;  %p681_p12 = scmp.ne.s32.totalorder %s1222_s1, %s680_s11 }
  0x14   : > { %p687_p5 = scmp.lt.u32.totalorder %s680_s11, %s1222_s1 }
  0x15   : > { %p1009_p13 = pneg %p993_p11 }
  0x17   : > { %p683_p0 = pnand %p1009_p13, %p681_p12 }
  0x19   : > { %p684_p3 = pneg %p683_p0 }
  0x1b   : > { %p689_p7 = pnand %p687_p5, %p684_p3 }
  0x1d   : > { %692 = shalt.err (!%p689_p7)
}
  0x1e   : > { %s693_s17 = scalar_lea.vmem %s986_s28, 384  ;;  %p701_p2 = scmp.lt.s32.totalorder %s986_s28, %s986_s28 }
  0x1f   : > { %p694_p9 = scmp.ne.s32.totalorder %s986_s28, %s693_s17  ;;  %p702_p6 = scmp.lt.s32.totalorder %s693_s17, %s693_s17 }
  0x21   : > { %p696_p10 = pnand %p694_p9, %p1009_p13  ;;  %p703_p12 = por %p702_p6, %p701_p2 }
  0x23   : > { %p697_p1 = pneg %p696_p10 }
  0x25   : > { %p704_p0 = pnand %p703_p12, %p697_p1 }
  0x27   : > { %707 = shalt.err (!%p704_p0)
}
  0x28   : > { %s901_s23 = smov 64   ;;  %s902_s27 = smov 4  }
  0x29   : > { %605 = dma.hbm_to_vmem [thread:$0]  (!%p993_p11), %s1222_s1, 384, %s986_s28, [#allocation6], %s901_s23, %s901_s23, %s902_s27  }
  0x2a   : > { %s708_s11 = scalar_lea.hbm %s1224_s3, 16 }
  0x2b   : > { %p709_p2 = scmp.ne.s32.totalorder %s1224_s3, %s708_s11  ;;  %p715_p10 = scmp.lt.u32.totalorder %s708_s11, %s1224_s3 }
  0x2d   : > { %p711_p1 = pnand %p709_p2, %p1009_p13 }
  0x2f   : > { %p712_p6 = pneg %p711_p1 }
  0x31   : > { %p717_p3 = pnand %p715_p10, %p712_p6 }
  0x33   : > { %720 = shalt.err (!%p717_p3)
}
  0x34   : > { %s721_s28 = scalar_lea.vmem %s997_s6, 16  ;;  %s728_s17 = scalar_lea.vmem %s997_s6, 32 }
  0x35   : > { %p722_p5 = scmp.ne.s32.totalorder %s997_s6, %s721_s28  ;;  %p729_p12 = scmp.lt.s32.totalorder %s997_s6, %s997_s6 }
  0x36   : > { %p730_p0 = scmp.lt.s32.totalorder %s728_s17, %s721_s28 }
  0x37   : > { %p724_p7 = pnand %p722_p5, %p1009_p13 }
  0x38   : > { %p731_p2 = por %p730_p0, %p729_p12 }
  0x39   : > { %p725_p9 = pneg %p724_p7 }
  0x3b   : > { %p732_p1 = pnand %p731_p2, %p725_p9 }
  0x3d   : > { %735 = shalt.err (!%p732_p1)
}
  0x3e   : > { %611 = dma.hbm_to_vmem [thread:$0]  (!%p993_p11), %s1224_s3, 16, %s997_s6, [#allocation9]  }
  0x3f   : > { %s736_s9 = scalar_lea.hbm %s1223_s2, 16 }
  0x40   : > { %p737_p6 = scmp.ne.s32.totalorder %s1223_s2, %s736_s9  ;;  %p743_p5 = scmp.lt.u32.totalorder %s736_s9, %s1223_s2 }
  0x42   : > { %p739_p10 = pnand %p737_p6, %p1009_p13 }
  0x44   : > { %p740_p3 = pneg %p739_p10 }
  0x46   : > { %p745_p7 = pnand %p743_p5, %p740_p3 }
  0x48   : > { %748 = shalt.err (!%p745_p7)
}
  0x49   : > { %s749_s15 = scalar_lea.vmem %s191_s8, 16  ;;  %s756_s6 = scalar_lea.vmem %s191_s8, 32 }
  0x4a   : > { %p750_p9 = scmp.ne.s32.totalorder %s191_s8, %s749_s15  ;;  %p757_p2 = scmp.lt.s32.totalorder %s191_s8, %s191_s8 }
  0x4b   : > { %p758_p1 = scmp.lt.s32.totalorder %s756_s6, %s749_s15 }
  0x4c   : > { %p752_p12 = pnand %p750_p9, %p1009_p13 }
  0x4d   : > { %p759_p4 = por %p758_p1, %p757_p2 }
  0x4e   : > { %p753_p0 = pneg %p752_p12 }
  0x50   : > { %p760_p8 = pnand %p759_p4, %p753_p0 }
  0x52   : > { %763 = shalt.err (!%p760_p8)
}
  0x53   : > { %608 = dma.hbm_to_vmem [thread:$0]  (!%p993_p11), %s1223_s2, 16, %s191_s8, [#allocation6]  }
  0x54   : > { %s903_s17 = smov [#allocation10]   ;;  %s764_s7 = scalar_lea.hbm %s1225_s4, 16 }
  0x55   : > { %s212_s23 = sshll.u32 %s903_s17, 4  ;;  %p765_p6 = scmp.ne.s32.totalorder %s1225_s4, %s764_s7  ;;  %s213_s23 = int_to_ptr.vmem [resolvable:$true] %s212_s23 }
  0x56   : > { %p771_p10 = scmp.lt.u32.totalorder %s764_s7, %s1225_s4 }
  0x57   : > { %p767_p4 = pnand %p765_p6, %p1009_p13 }
  0x59   : > { %p768_p8 = pneg %p767_p4 }
  0x5b   : > { %p773_p3 = pnand %p771_p10, %p768_p8 }
  0x5d   : > { %776 = shalt.err (!%p773_p3)
}
  0x5e   : > { %s777_s8 = scalar_lea.vmem %s213_s23, 16  ;;  %s784_s13 = scalar_lea.vmem %s213_s23, 32 }
  0x5f   : > { %p778_p5 = scmp.ne.s32.totalorder %s213_s23, %s777_s8  ;;  %p785_p12 = scmp.lt.s32.totalorder %s213_s23, %s213_s23 }
  0x60   : > { %p786_p0 = scmp.lt.s32.totalorder %s784_s13, %s777_s8 }
  0x61   : > { %p780_p7 = pnand %p778_p5, %p1009_p13 }
  0x62   : > { %p787_p2 = por %p786_p0, %p785_p12 }
  0x63   : > { %p781_p9 = pneg %p780_p7 }
  0x65   : > { %p788_p1 = pnand %p787_p2, %p781_p9 }
  0x67   : > { %791 = shalt.err (!%p788_p1)
}
  0x68   : > { %614 = dma.hbm_to_vmem [thread:$0]  (!%p993_p11), %s1225_s4, 16, %s213_s23, [#allocation9]  }
  0x69   : > { %s1092_s14 = sadd.s32 1, %s896_s21   ;;  %s30_s16 = sadd.s32 1, %s892_s20 }
  0x6a   : > { %s27_s29 = ssub.s32 %s896_s21, %s1092_s14  ;;  %p37_p13 = scmp.ne.s32.totalorder %s892_s20, %s888_s19 }
  0x6b   : > { %p28_p6 = scmp.eq.s32.totalorder %s27_s29, 0  ;;  %p38_p4 = scmp.eq.s32.totalorder %s896_s21, 0 }
  0x6c   : > { %p1235_p8 = scmp.eq.s32.totalorder %s963_s22, 1  ;;  %p627_p3 = scmp.lt.s32.totalorder %s896_s21, 2 }
  0x6d   : > { %s1108_s17 = scalar_select %p28_p6, %s892_s20, %s30_s16  }
  0x6e   : > { %p1102_p10 = por %p1235_p8, %p37_p13  ;;  %p39_p5 = por %p38_p4, %p37_p13 }
  0x6f   : > { %s223_s27 = sand.u32 1, %s892_s20   ;;  %s564_s23 = sshll.u32 %s896_s21, 8 }
  0x70   : > { %s540_s30 = sshll.u32 %s223_s27, 4  ;;  %s1115_s10 = scalar_lea.hbm %s1221_s0, %s564_s23 }
  0x71   : > { %s227_s11 = scalar_lea.vmem [#allocation2], %s540_s30  ;;  %p1119_p11 = pnand %p627_p3, %p39_p5 }
  0x72   : > { %s234_s12 = sshll.u32 %s227_s11, 4  ;;  %s1123_s13 = scalar_lea.sflag [#allocation3], %s223_s27  ;;  %s1117_s12 = int_to_ptr.vmem [resolvable:$true] %s234_s12 }
  0x73   : > { %s792_s15 = scalar_lea.hbm %s1115_s10, 256  ;;  %p794_p9 = pneg %p1119_p11 }
  0x74   : > { %p793_p7 = scmp.ne.s32.totalorder %s1115_s10, %s792_s15  ;;  %s797_s29 = scalar_lea.hbm %s1221_s0, 512 }
  0x75   : > { %p798_p2 = scmp.lt.u32.totalorder %s1115_s10, %s1221_s0  ;;  %p799_p1 = scmp.lt.u32.totalorder %s797_s29, %s792_s15 }
  0x76   : > { %p795_p12 = pnand %p794_p9, %p793_p7  ;;  %p801_p6 = scmp.lt.u32.totalorder %s792_s15, %s1115_s10 }
  0x77   : > { %p800_p13 = por %p799_p1, %p798_p2 }
  0x78   : > { %p796_p0 = pneg %p795_p12 }
  0x79   : > { %p802_p4 = por %p801_p6, %p800_p13 }
  0x7b   : > { %p803_p8 = pnand %p802_p4, %p796_p0 }
  0x7d   : > { %806 = shalt.err (!%p803_p8)
}
  0x7e   : > { %s807_s27 = scalar_lea.vmem %s1117_s12, 256  ;;  %s904_s7 = smov [#allocation2]  }
  0x7f   : > { %p808_p3 = scmp.ne.s32.totalorder %s1117_s12, %s807_s27  ;;  %s812_s9 = sshll.u32 %s904_s7, 4  ;;  %s813_s9 = int_to_ptr.vmem [resolvable:$false] %s812_s9 }
  0x80   : > { %s814_s11 = scalar_lea.vmem %s813_s9, 512  ;;  %p815_p12 = scmp.lt.s32.totalorder %s1117_s12, %s813_s9 }
  0x81   : > { %p810_p5 = pnand %p808_p3, %p794_p9  ;;  %p816_p2 = scmp.lt.s32.totalorder %s814_s11, %s807_s27 }
  0x83   : > { %p811_p7 = pneg %p810_p5  ;;  %p817_p1 = por %p816_p2, %p815_p12 }
  0x85   : > { %p818_p13 = pnand %p817_p1, %p811_p7 }
  0x87   : > { %821 = shalt.err (!%p818_p13)
}
  0x88   : > { %s905_s15 = smov 128   ;;  %s906_s6 = smov 8  }
  0x89   : > { %618 = dma.hbm_to_vmem [thread:$0]  (!%p1119_p11), %s1115_s10, 256, %s1117_s12, %s1123_s13, %s905_s15, %s905_s15, %s906_s6  }
  0x8a   : > { %p1238_p9 = scmp.ne.s32.totalorder %s1232_s26, 0 }
  0x8b   : > { %s1154_s16 = sand.u32 (!%p1238_p9), 1, %s888_s19   ;;  %p1239_p0 = scmp.ne.s32.totalorder (!%p1238_p9), %s1230_s24, 0 }
  0x8c   : > { %246 = sbr.rel (%p1238_p9) target bundleno = 406 (0x196), region = 40  ;;  %s544_s29 = sshll.u32 (!%p1238_p9), %s1154_s16, 4 }
  0x8d   : > { %s249_s30 = scalar_lea.sflag (!%p1238_p9), [#allocation3], %s1154_s16  ;;  %s252_s23 = scalar_lea.vmem (!%p1238_p9), [#allocation2], %s544_s29 }
  0x93   : > { %867 = dma.done.wait (%p1239_p0), %s249_s30, 256  }
  0x94   : > { %869 = vsyncadd (%p1239_p0), %s249_s30, 4294967040  ;;  %p1240_p6 = scmp.eq.s32.totalorder %s963_s22, 0 }
  0x96   : > { %871 = dma.done.wait (%p1240_p6), [#allocation6], 400   ;;  %p1241_p11 = pmov %p1240_p6 }
  0x97   : > { %p1242_p4 = pmov %p1240_p6 }
  0x98   : > { %873 = vsyncadd (%p1241_p11), [#allocation6], 4294966896 }
  0x99   : > { %875 = dma.done.wait (%p1242_p4), [#allocation9], 32   ;;  %p1243_p8 = pmov %p1242_p4 }
  0x9a   : > { %v907_v0 = vmov 0.0   ;;  %vm908_vm0 = vmmov 0   ;;  %v677_v1 = vld [vmem:[#allocation5] sm:$0xff]   ;;  %v678_v2 = vld [vmem:[#allocation5 + $0x8] sm:$0xff]   ;;  %v679_v3 = vld [vmem:[#allocation5 + $0x10] sm:$0xff]   ;;  %vm332_vm1 = vcmask 392192  }
  0x9b   : > { %877 = vsyncadd (%p1243_p8), [#allocation9], 4294967264  ;;  %572 = vmatprep.subr.bf16.mxu0 %v907_v0  ;;  %578 = vmatprep.mubr.msk.bf16.mxu0 %vm908_vm0, %v907_v0  ;;  %v298_v4 = vld [vmem:[%s252_s23] sm:$0xff]  ;;  %v299_v5 = vld [vmem:[%s252_s23 + $0x8] sm:$0xff]  ;;  %s549_s24 = sshll.u32 %s1154_s16, 3  ;;  %s567_s26 = sshll.u32 %s963_s22, 7 }
  0x9c   : > { %573 = vmatpush3.bf16.msra.mxu0 %v677_v1  ;;  %v300_v6 = vpack.c.bf16 %v299_v5, %v298_v4  ;;  %v550_v7 = vld [vmem:[#allocation7] ss:$0 sm:$0xff]  ;;  %v555_v11 = vld [vmem:[#allocation8] ss:$0 sm:$0xff]  ;;  %v556_v16 = vld [vmem:[#allocation10] ss:$0 sm:$0xff]  ;;  %s1175_s27 = scalar_lea.hbm %s1226_s5, %s567_s26 }
  0x9d   : > { %574 = vmatprep.subr.bf16.mxu0 %v907_v0  ;;  %s294_s10 = scalar_lea.vmem [#allocation11], %s549_s24  ;;  %vm405_vm2 = vcmask 257024   ;;  %s409_s7 = scalar_lea.sflag [#allocation4], %s1154_s16 }
  0x9e   : > { %s422_s12 = sshll.u32 %s294_s10, 4  ;;  %s909_s9 = smov [#allocation11]   ;;  %s1177_s12 = int_to_ptr.vmem [resolvable:$true] %s422_s12 }
  0x9f   : > { %s822_s22 = scalar_lea.vmem %s1177_s12, 128  ;;  %s826_s11 = sshll.u32 %s909_s9, 4  ;;  %s827_s11 = int_to_ptr.vmem [resolvable:$false] %s826_s11 }
  0xa0   : > { %575 = vmatpush3.bf16.msra.mxu0 %v678_v2  ;;  %p823_p3 = scmp.ne.s32.totalorder %s1177_s12, %s822_s22  ;;  %s828_s15 = scalar_lea.vmem %s827_s11, 256 }
  0xa1   : > { %576 = vmatprep.subr.bf16.mxu0 %v907_v0  ;;  %p829_p12 = scmp.lt.s32.totalorder %s1177_s12, %s827_s11  ;;  %p830_p2 = scmp.lt.s32.totalorder %s828_s15, %s822_s22 }
  0xa2   : > { %p824_p5 = pnand %p823_p3, %p1102_p10 }
  0xa3   : > { %p831_p1 = por %p830_p2, %p829_p12 }
  0xa4   : > { %577 = vmatpush3.bf16.msra.mxu0 %v679_v3  ;;  %p825_p7 = pneg %p824_p5 }
  0xa6   : > { %p832_p13 = pnand %p831_p1, %p825_p7 }
  0xa7   : > { %579 = vmatmul.mubr.msk.bf16.vlgmr.msra.gmra.mrb[0].mxu0 %vm332_vm1, %v300_v6 }
 0x17a   : > { %v370_v8 = vpop.f32.mrb[0].mxu0 }
 0x17b   : > { %v371_v9 = vadd.f32 %v550_v7, %v370_v8  ;;  %v580_v10 = vpop.f32.mrb[1].mxu0 }
 0x17c   : > { %v373_v12 = vpop.f32.mrb[2].mxu0 }
 0x17d   : > { %v377_v13 = vmax.f32 %v371_v9, 0.0  ;;  %v374_v14 = vadd.f32 %v550_v7, %v373_v12  ;;  %v581_v15 = vpop.f32.mrb[3].mxu0 }
 0x17f   : > { %v386_v17 = vmul.f32 %v555_v11, %v377_v13  ;;  %v378_v18 = vmax.f32 %v374_v14, 0.0 }
 0x181   : > { %v395_v19 = vadd.f32 %v556_v16, %v386_v17  ;;  %v387_v20 = vmul.f32 %v555_v11, %v378_v18 }
 0x183   : > { %v565_v21 = vpack.c.bf16 %v395_v19, %v395_v19  ;;  %v396_v22 = vadd.f32 %v556_v16, %v387_v20 }
 0x185   : > { %406 = vst.msk [vmem:[%s294_s10] sm:$0xf] %vm405_vm2, %v565_v21  ;;  %v566_v23 = vpack.c.bf16 %v396_v22, %v396_v22 }
 0x187   : > { %407 = vst.msk [vmem:[%s294_s10 + $0x4] sm:$0xf] %vm405_vm2, %v566_v23 }
 0x188   : > { %835 = shalt.err (!%p832_p13)
}
 0x189   : > { %s836_s6 = scalar_lea.hbm %s1175_s27, 128  ;;  %s840_s23 = scalar_lea.hbm %s1226_s5, 256 }
 0x18a   : > { %p837_p9 = scmp.ne.s32.totalorder %s1175_s27, %s836_s6  ;;  %p841_p11 = scmp.lt.u32.totalorder %s1175_s27, %s1226_s5 }
 0x18b   : > { %p842_p4 = scmp.lt.u32.totalorder %s840_s23, %s836_s6  ;;  %p844_p3 = scmp.lt.u32.totalorder %s836_s6, %s1175_s27 }
 0x18c   : > { %p838_p0 = pnand %p837_p9, %p1102_p10 }
 0x18d   : > { %p843_p8 = por %p842_p4, %p841_p11 }
 0x18e   : > { %p839_p6 = pneg %p838_p0 }
 0x18f   : > { %p845_p5 = por %p844_p3, %p843_p8 }
 0x191   : > { %p846_p7 = pnand %p845_p5, %p839_p6 }
 0x193   : > { %849 = shalt.err (!%p846_p7)
}
 0x194   : > { %s910_s10 = smov 64   ;;  %s911_s8 = smov 4  }
 0x195   : > { %600 = dma.vmem_to_hbm [thread:$0]  (%p1102_p10), %s1177_s12, 128, %s1175_s27, %s409_s7, %s910_s10, %s910_s10, %s911_s8  }
 0x196 PF: > { %s437_s13 = sand.u32 1, %s884_s18   ;;  %p1244_p12 = scmp.ne.s32.totalorder %s1231_s25, 0 }
 0x197   : > { %p1245_p2 = scmp.ge.s32.totalorder %s896_s21, 2  ;;  %s438_s22 = scalar_lea.sflag [#allocation4], %s437_s13 }
 0x199   : > { %p620_p1 = pnand %p1245_p2, %p1244_p12 }
 0x19b   : > { %879 = dma.done.wait (!%p620_p1), %s438_s22, 128  }
 0x19c   : > { %881 = vsyncadd (!%p620_p1), %s438_s22, 4294967168  ;;  %p20_p13 = scmp.ge.s32.totalorder %s1092_s14, 4   ;;  %s1246_s18 = smov %s888_s19 }
 0x19d   : > { %s1247_s19 = smov %s892_s20  ;;  %s1248_s20 = smov %s1108_s17 }
 0x19e   : > { %s1249_s21 = smov %s1092_s14  ;;  %22 = sbr.rel (!%p20_p13) target bundleno = 7 (0x7), region = 101 }
 0x1a5   :  { %443 = vsyncpa [#allocation3], 1 }
 0x1a6   :  { %445 = vsyncpa [#allocation3 + $0x1], 1 }
 0x1a7   :  { %446 = vsyncpa [#allocation6], 1 }
 0x1a8   :  { %447 = vsyncpa [#allocation9], 1 }
 0x1a9   :  { %448 = vsyncpa [#allocation4], 1 }
 0x1aa   :  { %450 = vsyncpa [#allocation4 + $0x1], 1 }

// kernel: transformer_forward.7
= control target key start
LH: loop header
LB: loop body
LE: loop exit
PB: predicated region body
PF: predicated region fallthrough
CT: control target
= control target key end

     0   :  { %8 = vsyncpa [#allocation3], 0  ;;  %s393_s0 = inlined_call_operand.hbm [shape: bf16[32,32], index: 0, kind: input, shape index: {}]   ;;  %s394_s1 = inlined_call_operand.hbm [shape: bf16[32,128], index: 1, kind: input, shape index: {}]   ;;  %s395_s2 = inlined_call_operand.hbm [shape: f32[1,128], index: 2, kind: input, shape index: {}]   ;;  %s396_s3 = inlined_call_operand.hbm [shape: f32[2,128], index: 3, kind: output, shape index: {}]  }
   0x1   :  { %9 = vsyncpa [#allocation6], 0 }
   0x2   :  { %10 = vsyncpa [#allocation4], 0  ;;  %s305_s12 = smov [#allocation5]   ;;  %s306_s14 = smov [#allocation2]  }
   0x3   :  { %s28_s13 = sshll.u32 %s305_s12, 4  ;;  %s16_s15 = sshll.u32 %s306_s14, 4  ;;  %s29_s13 = int_to_ptr.vmem [resolvable:$true] %s28_s13  ;;  %s333_s15 = int_to_ptr.vmem [resolvable:$true] %s16_s15 }
   0x4   :  { %s211_s18 = scalar_lea.hbm %s394_s1, 256 }
   0x5   :  { %p212_p0 = scmp.ne.s32.totalorder %s394_s1, %s211_s18  ;;  %p215_p1 = scmp.lt.u32.totalorder %s211_s18, %s394_s1 }
   0x7   :  { %p217_p2 = pnand %p215_p1, %p212_p0 }
   0x9   :  { %220 = shalt.err (!%p217_p2)
}
   0xa   :  { %s221_s23 = scalar_lea.vmem %s29_s13, 256  ;;  %p226_p4 = scmp.lt.s32.totalorder %s29_s13, %s29_s13 }
   0xb   :  { %p222_p3 = scmp.ne.s32.totalorder %s29_s13, %s221_s23  ;;  %p227_p5 = scmp.lt.s32.totalorder %s221_s23, %s221_s23 }
   0xd   :  { %p228_p6 = por %p227_p5, %p226_p4 }
   0xf   :  { %p229_p7 = pnand %p228_p6, %p222_p3 }
  0x11   :  { %232 = shalt.err (!%p229_p7)
}
  0x12   :  { %s307_s24 = smov 64   ;;  %s308_s25 = smov 4  }
  0x13   :  { %34 = dma.hbm_to_vmem [thread:$0]  %s394_s1, 256, %s29_s13, [#allocation6], %s307_s24, %s307_s24, %s308_s25  }
  0x14   :  { %s233_s30 = scalar_lea.hbm %s393_s0, 256 }
  0x15   :  { %p234_p8 = scmp.ne.s32.totalorder %s393_s0, %s233_s30  ;;  %p237_p9 = scmp.lt.u32.totalorder %s233_s30, %s393_s0 }
  0x17   :  { %p239_p10 = pnand %p237_p9, %p234_p8 }
  0x19   :  { %242 = shalt.err (!%p239_p10)
}
  0x1a   :  { %s243_s8 = scalar_lea.vmem %s333_s15, 256  ;;  %p248_p12 = scmp.lt.s32.totalorder %s333_s15, %s333_s15 }
  0x1b   :  { %p244_p11 = scmp.ne.s32.totalorder %s333_s15, %s243_s8  ;;  %p249_p13 = scmp.lt.s32.totalorder %s243_s8, %s243_s8 }
  0x1d   :  { %p250_p0 = por %p249_p13, %p248_p12 }
  0x1f   :  { %p251_p1 = pnand %p250_p0, %p244_p11 }
  0x21   :  { %254 = shalt.err (!%p251_p1)
}
  0x22   :  { %22 = dma.hbm_to_vmem [thread:$0]  %s393_s0, 256, %s333_s15, [#allocation3], %s307_s24, %s307_s24, %s308_s25  }
  0x23   :  { %s309_s10 = smov [#allocation7]   ;;  %s255_s14 = scalar_lea.hbm %s395_s2, 16 }
  0x24   :  { %s41_s11 = sshll.u32 %s309_s10, 4  ;;  %p256_p2 = scmp.ne.s32.totalorder %s395_s2, %s255_s14  ;;  %s42_s11 = int_to_ptr.vmem [resolvable:$true] %s41_s11 }
  0x25   :  { %p259_p3 = scmp.lt.u32.totalorder %s255_s14, %s395_s2 }
  0x27   :  { %p261_p4 = pnand %p259_p3, %p256_p2 }
  0x29   :  { %264 = shalt.err (!%p261_p4)
}
  0x2a   :  { %s265_s20 = scalar_lea.vmem %s42_s11, 16  ;;  %s269_s0 = scalar_lea.vmem %s42_s11, 32 }
  0x2b   :  { %p266_p5 = scmp.ne.s32.totalorder %s42_s11, %s265_s20  ;;  %p270_p6 = scmp.lt.s32.totalorder %s42_s11, %s42_s11 }
  0x2c   :  { %p271_p7 = scmp.lt.s32.totalorder %s269_s0, %s265_s20 }
  0x2e   :  { %p272_p8 = por %p271_p7, %p270_p6 }
  0x30   :  { %p273_p9 = pnand %p272_p8, %p266_p5 }
  0x32   :  { %276 = shalt.err (!%p273_p9)
}
  0x33   :  { %44 = dma.hbm_to_vmem [thread:$0]  %s395_s2, 16, %s42_s11, [#allocation6]  }
  0x34   :  { %299 = dma.done.wait [#allocation3], 256  }
  0x35   :  { %300 = vsyncadd [#allocation3], 4294967040 }
  0x36   :  { %301 = dma.done.wait [#allocation6], 272  }
  0x37   :  { %302 = vsyncadd [#allocation6], 4294967024  ;;  %v310_v0 = vmov 0.0   ;;  %vm311_vm0 = vmmov 0   ;;  %v209_v1 = vld [vmem:[#allocation5] sm:$0xff]   ;;  %v210_v2 = vld [vmem:[#allocation5 + $0x8] sm:$0xff]  }
  0x38   :  { %193 = vmatprep.subr.bf16.mxu0 %v310_v0  ;;  %197 = vmatprep.mubr.msk.bf16.mxu0 %vm311_vm0, %v310_v0  ;;  %v182_v3 = vld [vmem:[#allocation2] sm:$0xff]   ;;  %v189_v4 = vld [vmem:[#allocation2 + $0x8] sm:$0xff]   ;;  %vm63_vm1 = vcmask 261120   ;;  %vm102_vm2 = vcmask 1041409   ;;  %s312_s2 = smov [#allocation8]  }
  0x39   :  { %194 = vmatpush3.bf16.msra.mxu0 %v209_v1  ;;  %v183_v5 = vunpack.c.l.bf16 %v182_v3  ;;  %v184_v6 = vunpack.c.h.bf16 %v182_v3  ;;  %v187_v7 = vunpack.c.l.bf16 %v189_v4  ;;  %v188_v8 = vunpack.c.h.bf16 %v189_v4  ;;  %v177_v35 = vld [vmem:[#allocation7] ss:$0 sm:$0xff]  ;;  %s167_s22 = sshll.u32 %s312_s2, 4  ;;  %s168_s22 = int_to_ptr.vmem [resolvable:$true] %s167_s22 }
  0x3a   :  { %195 = vmatprep.subr.bf16.mxu0 %v310_v0  ;;  %s277_s23 = scalar_lea.vmem %s168_s22, 32  ;;  %p282_p11 = scmp.lt.s32.totalorder %s168_s22, %s168_s22 }
  0x3b   :  { %v64_v9 = vsel %vm63_vm1, %v183_v5, 0.0  ;;  %v65_v10 = vsel %vm63_vm1, %v184_v6, 0.0  ;;  %v73_v11 = vsel %vm63_vm1, %v187_v7, 0.0  ;;  %v74_v12 = vsel %vm63_vm1, %v188_v8, 0.0  ;;  %p278_p10 = scmp.ne.s32.totalorder %s168_s22, %s277_s23  ;;  %p283_p12 = scmp.lt.s32.totalorder %s277_s23, %s277_s23 }
  0x3c   :  { %v66_v13 = vadd.f32 %v65_v10, %v64_v9  ;;  %v75_v14 = vadd.f32 %v74_v12, %v73_v11 }
  0x3d   :  { %196 = vmatpush3.bf16.msra.mxu0 %v210_v2  ;;  %p284_p13 = por %p283_p12, %p282_p11 }
  0x3e   :  { %v67_v15 = vrot.slane %v66_v13, 4  ;;  %v76_v16 = vrot.slane %v75_v14, 4 }
  0x3f   :  { %p285_p0 = pnand %p284_p13, %p278_p10 }
  0x40   :  { %v68_v17 = vadd.f32 %v67_v15, %v66_v13  ;;  %v77_v18 = vadd.f32 %v76_v16, %v75_v14 }
  0x42   :  { %v69_v19 = vrot.slane %v68_v17, 2  ;;  %v78_v20 = vrot.slane %v77_v18, 2 }
  0x44   :  { %v70_v21 = vadd.f32 %v69_v19, %v68_v17  ;;  %v79_v22 = vadd.f32 %v78_v20, %v77_v18 }
  0x46   :  { %v71_v23 = vrot.slane %v70_v21, 1  ;;  %v80_v24 = vrot.slane %v79_v22, 1 }
  0x48   :  { %v72_v25 = vadd.f32 %v71_v23, %v70_v21  ;;  %v81_v26 = vadd.f32 %v80_v24, %v79_v22 }
  0x4a   :  { %v83_v27 = vmul.f32 0.0625, %v72_v25  ;;  %v84_v28 = vmul.f32 0.0625, %v81_v26 }
  0x4c   :  { %v85_v29 = vpack.c.bf16 %v83_v27, %v83_v27  ;;  %v86_v30 = vpack.c.bf16 %v84_v28, %v84_v28 }
  0x4e   :  { %v100_v31 = vunpack.c.l.b16 %v85_v29  ;;  %v101_v32 = vunpack.c.l.b16 %v86_v30 }
  0x50   :  { %v103_v33 = vsel %vm102_vm2, %v101_v32, %v100_v31 }
  0x51   :  { %v104_v34 = vpack.c.b16 %v103_v33, %v103_v33 }
  0x53   :  { %198 = vmatmul.mubr.msk.bf16.vlgmr.msra.gmra.mrb[0].mxu0 %vm63_vm1, %v104_v34 }
 0x126   :  { %v154_v36 = vpop.f32.mrb[0].mxu0 }
 0x127   :  { %v155_v37 = vadd.f32 %v177_v35, %v154_v36  ;;  %v199_v38 = vpop.f32.mrb[1].mxu0 }
 0x128   :  { %v157_v39 = vpop.f32.mrb[2].mxu0 }
 0x129   :  { %160 = vst [vmem:[#allocation8] sm:$0x3] %v155_v37  ;;  %v200_v40 = vpop.f32.mrb[3].mxu0 }
 0x12a   :  { %288 = shalt.err (!%p285_p0)
}
 0x12b   :  { %s289_s26 = scalar_lea.hbm %s396_s3, 32 }
 0x12c   :  { %p290_p1 = scmp.ne.s32.totalorder %s396_s3, %s289_s26  ;;  %p293_p2 = scmp.lt.u32.totalorder %s289_s26, %s396_s3 }
 0x12e   :  { %p295_p3 = pnand %p293_p2, %p290_p1 }
 0x130   :  { %298 = shalt.err (!%p295_p3)
}
 0x131   :  { %170 = dma.vmem_to_hbm [thread:$0]  %s168_s22, 32, %s396_s3, [#allocation4]  }
 0x132   :  { %303 = dma.done.wait [#allocation4], 32  }
 0x133   :  { %304 = vsyncadd [#allocation4], 4294967264 }
 0x134   :  { %174 = vsyncpa [#allocation3], 1 }
 0x135   :  { %175 = vsyncpa [#allocation6], 1 }
 0x136   :  { %176 = vsyncpa [#allocation4], 1 }

// kernel: transformer_forward.5
= control target key start
LH: loop header
LB: loop body
LE: loop exit
PB: predicated region body
PF: predicated region fallthrough
CT: control target
= control target key end

     0   :  { %18 = vsyncpa [#allocation3], 0  ;;  %s6121_s0 = inlined_call_operand.hbm [shape: bf16[32,32], index: 0, kind: input, shape index: {}, may-alias: {0,13}]   ;;  %s6122_s1 = inlined_call_operand.hbm [shape: bf16[32,96], index: 1, kind: input, shape index: {}]   ;;  %s6123_s2 = inlined_call_operand.hbm [shape: f32[1,96], index: 2, kind: input, shape index: {}]   ;;  %s6124_s3 = inlined_call_operand.hbm [shape: bf16[32,32], index: 3, kind: input, shape index: {}]   ;;  %s6125_s4 = inlined_call_operand.hbm [shape: f32[1,32], index: 4, kind: input, shape index: {}]   ;;  %s6126_s5 = inlined_call_operand.hbm [shape: f32[1,32], index: 5, kind: input, shape index: {}]   ;;  %s6127_s6 = inlined_call_operand.hbm [shape: f32[1,32], index: 6, kind: input, shape index: {}]   ;;  %s6128_s7 = inlined_call_operand.hbm [shape: bf16[32,2048], index: 7, kind: input, shape index: {}]   ;;  %s6129_s8 = inlined_call_operand.hbm [shape: f32[1,2048], index: 8, kind: input, shape index: {}]   ;;  %s6130_s9 = inlined_call_operand.hbm [shape: bf16[2048,32], index: 9, kind: input, shape index: {}]   ;;  %s6131_s10 = inlined_call_operand.hbm [shape: f32[1,32], index: 10, kind: input, shape index: {}]   ;;  %s6132_s11 = inlined_call_operand.hbm [shape: f32[1,32], index: 11, kind: input, shape index: {}]   ;;  %s6133_s12 = inlined_call_operand.hbm [shape: f32[1,32], index: 12, kind: input, shape index: {}]   ;;  %s6134_s13 = inlined_call_operand.hbm [shape: bf16[32,32], index: 13, kind: output, shape index: {}, may-alias: {0,13}]  }
   0x1   :  { %19 = vsyncpa [#allocation6], 0 }
   0x2   :  { %20 = vsyncpa [#allocation9], 0 }
   0x3   :  { %21 = vsyncpa [#allocation12], 0 }
   0x4   :  { %22 = vsyncpa [#allocation15], 0 }
   0x5   :  { %23 = vsyncpa [#allocation18], 0 }
   0x6   :  { %24 = vsyncpa [#allocation21], 0 }
   0x7   :  { %25 = vsyncpa [#allocation4], 0  ;;  %s5359_s25 = smov [#allocation5]   ;;  %s5360_s27 = smov [#allocation8]  }
   0x8   :  { %s43_s26 = sshll.u32 %s5359_s25, 4  ;;  %s65_s28 = sshll.u32 %s5360_s27, 4  ;;  %s44_s26 = int_to_ptr.vmem [resolvable:$true] %s43_s26  ;;  %s5449_s28 = int_to_ptr.vmem [resolvable:$true] %s65_s28 }
   0x9   :  { %s5035_s14 = scalar_lea.hbm %s6122_s1, 256 }
   0xa   :  { %p5036_p0 = scmp.ne.s32.totalorder %s6122_s1, %s5035_s14  ;;  %p5039_p1 = scmp.lt.u32.totalorder %s5035_s14, %s6122_s1 }
   0xc   :  { %p5041_p2 = pnand %p5039_p1, %p5036_p0 }
   0xe   :  { %5044 = shalt.err (!%p5041_p2)
}
   0xf   :  { %s5045_s19 = scalar_lea.vmem %s44_s26, 256  ;;  %p5050_p4 = scmp.lt.s32.totalorder %s44_s26, %s44_s26 }
  0x10   :  { %p5046_p3 = scmp.ne.s32.totalorder %s44_s26, %s5045_s19  ;;  %p5051_p5 = scmp.lt.s32.totalorder %s5045_s19, %s5045_s19 }
  0x12   :  { %p5052_p6 = por %p5051_p5, %p5050_p4 }
  0x14   :  { %p5053_p7 = pnand %p5052_p6, %p5046_p3 }
  0x16   :  { %5056 = shalt.err (!%p5053_p7)
}
  0x17   :  { %s5361_s20 = smov 64   ;;  %s5362_s21 = smov 4  }
  0x18   :  { %49 = dma.hbm_to_vmem [thread:$0]  %s6122_s1, 256, %s44_s26, [#allocation6], %s5361_s20, %s5361_s20, %s5362_s21  }
  0x19   :  { %s5057_s27 = scalar_lea.hbm %s6124_s3, 256 }
  0x1a   :  { %p5058_p8 = scmp.ne.s32.totalorder %s6124_s3, %s5057_s27  ;;  %p5061_p9 = scmp.lt.u32.totalorder %s5057_s27, %s6124_s3 }
  0x1c   :  { %p5063_p10 = pnand %p5061_p9, %p5058_p8 }
  0x1e   :  { %5066 = shalt.err (!%p5063_p10)
}
  0x1f   :  { %s5067_s16 = scalar_lea.vmem %s5449_s28, 256  ;;  %p5072_p12 = scmp.lt.s32.totalorder %s5449_s28, %s5449_s28 }
  0x20   :  { %p5068_p11 = scmp.ne.s32.totalorder %s5449_s28, %s5067_s16  ;;  %p5073_p13 = scmp.lt.s32.totalorder %s5067_s16, %s5067_s16 }
  0x22   :  { %p5074_p0 = por %p5073_p13, %p5072_p12 }
  0x24   :  { %p5075_p1 = pnand %p5074_p0, %p5068_p11 }
  0x26   :  { %5078 = shalt.err (!%p5075_p1)
}
  0x27   :  { %71 = dma.hbm_to_vmem [thread:$0]  %s6124_s3, 256, %s5449_s28, [#allocation9], %s5361_s20, %s5361_s20, %s5362_s21  }
  0x28   :  { %s5363_s17 = smov [#allocation11]   ;;  %s5364_s19 = smov [#allocation14]  }
  0x29   :  { %s88_s18 = sshll.u32 %s5363_s17, 4  ;;  %s107_s22 = sshll.u32 %s5364_s19, 4  ;;  %s89_s18 = int_to_ptr.vmem [resolvable:$true] %s88_s18  ;;  %s5486_s22 = int_to_ptr.vmem [resolvable:$true] %s107_s22 }
  0x2a   :  { %s5079_s25 = scalar_lea.hbm %s6126_s5, 16 }
  0x2b   :  { %p5080_p2 = scmp.ne.s32.totalorder %s6126_s5, %s5079_s25  ;;  %p5083_p3 = scmp.lt.u32.totalorder %s5079_s25, %s6126_s5 }
  0x2d   :  { %p5085_p4 = pnand %p5083_p3, %p5080_p2 }
  0x2f   :  { %5088 = shalt.err (!%p5085_p4)
}
  0x30   :  { %s5089_s3 = scalar_lea.vmem %s89_s18, 16  ;;  %s5093_s28 = scalar_lea.vmem %s89_s18, 32 }
  0x31   :  { %p5090_p5 = scmp.ne.s32.totalorder %s89_s18, %s5089_s3  ;;  %p5094_p6 = scmp.lt.s32.totalorder %s89_s18, %s89_s18 }
  0x32   :  { %p5095_p7 = scmp.lt.s32.totalorder %s5093_s28, %s5089_s3 }
  0x34   :  { %p5096_p8 = por %p5095_p7, %p5094_p6 }
  0x36   :  { %p5097_p9 = pnand %p5096_p8, %p5090_p5 }
  0x38   :  { %5100 = shalt.err (!%p5097_p9)
}
  0x39   :  { %91 = dma.hbm_to_vmem [thread:$0]  %s6126_s5, 16, %s89_s18, [#allocation12]  }
  0x3a   :  { %s5101_s17 = scalar_lea.hbm %s6128_s7, 4096 }
  0x3b   :  { %p5102_p10 = scmp.ne.s32.totalorder %s6128_s7, %s5101_s17  ;;  %p5105_p11 = scmp.lt.u32.totalorder %s5101_s17, %s6128_s7 }
  0x3d   :  { %p5107_p12 = pnand %p5105_p11, %p5102_p10 }
  0x3f   :  { %5110 = shalt.err (!%p5107_p12)
}
  0x40   :  { %s5111_s27 = scalar_lea.vmem %s5486_s22, 4096  ;;  %p5116_p0 = scmp.lt.s32.totalorder %s5486_s22, %s5486_s22 }
  0x41   :  { %p5112_p13 = scmp.ne.s32.totalorder %s5486_s22, %s5111_s27  ;;  %p5117_p1 = scmp.lt.s32.totalorder %s5111_s27, %s5111_s27 }
  0x43   :  { %p5118_p2 = por %p5117_p1, %p5116_p0 }
  0x45   :  { %p5119_p3 = pnand %p5118_p2, %p5112_p13 }
  0x47   :  { %5122 = shalt.err (!%p5119_p3)
}
  0x48   :  { %s5365_s5 = smov 1024   ;;  %s5366_s30 = smov [#allocation17]  }
  0x49   :  { %113 = dma.hbm_to_vmem [thread:$0]  %s6128_s7, 4096, %s5486_s22, [#allocation15], %s5365_s5, %s5365_s5, %s5361_s20  }
  0x4a   :  { %s129_s14 = sshll.u32 %s5366_s30, 4  ;;  %s5367_s3 = smov [#allocation20]   ;;  %s130_s14 = int_to_ptr.vmem [resolvable:$true] %s129_s14 }
  0x4b   :  { %s152_s28 = sshll.u32 %s5367_s3, 4  ;;  %s5123_s1 = scalar_lea.hbm %s6130_s9, 16384  ;;  %s153_s28 = int_to_ptr.vmem [resolvable:$true] %s152_s28 }
  0x4c   :  { %p5124_p4 = scmp.ne.s32.totalorder %s6130_s9, %s5123_s1  ;;  %p5127_p5 = scmp.lt.u32.totalorder %s5123_s1, %s6130_s9 }
  0x4e   :  { %p5129_p6 = pnand %p5127_p5, %p5124_p4 }
  0x50   :  { %5132 = shalt.err (!%p5129_p6)
}
  0x51   :  { %s5133_s7 = scalar_lea.vmem %s130_s14, 16384  ;;  %p5138_p8 = scmp.lt.s32.totalorder %s130_s14, %s130_s14 }
  0x52   :  { %p5134_p7 = scmp.ne.s32.totalorder %s130_s14, %s5133_s7  ;;  %p5139_p9 = scmp.lt.s32.totalorder %s5133_s7, %s5133_s7 }
  0x54   :  { %p5140_p10 = por %p5139_p9, %p5138_p8 }
  0x56   :  { %p5141_p11 = pnand %p5140_p10, %p5134_p7 }
  0x58   :  { %5144 = shalt.err (!%p5141_p11)
}
  0x59   :  { %135 = dma.hbm_to_vmem [thread:$0]  %s6130_s9, 16384, %s130_s14, [#allocation18], %s5361_s20, %s5361_s20, %s5362_s21  }
  0x5a   :  { %s5145_s5 = scalar_lea.hbm %s6132_s11, 16 }
  0x5b   :  { %p5146_p12 = scmp.ne.s32.totalorder %s6132_s11, %s5145_s5  ;;  %p5149_p13 = scmp.lt.u32.totalorder %s5145_s5, %s6132_s11 }
  0x5d   :  { %p5151_p0 = pnand %p5149_p13, %p5146_p12 }
  0x5f   :  { %5154 = shalt.err (!%p5151_p0)
}
  0x60   :  { %s5155_s15 = scalar_lea.vmem %s153_s28, 16  ;;  %s5159_s16 = scalar_lea.vmem %s153_s28, 32 }
  0x61   :  { %p5156_p1 = scmp.ne.s32.totalorder %s153_s28, %s5155_s15  ;;  %p5160_p2 = scmp.lt.s32.totalorder %s153_s28, %s153_s28 }
  0x62   :  { %p5161_p3 = scmp.lt.s32.totalorder %s5159_s16, %s5155_s15 }
  0x64   :  { %p5162_p4 = por %p5161_p3, %p5160_p2 }
  0x66   :  { %p5163_p5 = pnand %p5162_p4, %p5156_p1 }
  0x68   :  { %5166 = shalt.err (!%p5163_p5)
}
  0x69   :  { %155 = dma.hbm_to_vmem [thread:$0]  %s6132_s11, 16, %s153_s28, [#allocation21]  }
  0x6a   :  { %s5368_s1 = smov [#allocation2]   ;;  %s5369_s17 = smov [#allocation7]  }
  0x6b   :  { %s31_s26 = sshll.u32 %s5368_s1, 4  ;;  %s56_s19 = sshll.u32 %s5369_s17, 4  ;;  %s32_s26 = int_to_ptr.vmem [resolvable:$true] %s31_s26  ;;  %s57_s19 = int_to_ptr.vmem [resolvable:$true] %s56_s19 }
  0x6c   :  { %s5167_s22 = scalar_lea.hbm %s6121_s0, 256 }
  0x6d   :  { %p5168_p6 = scmp.ne.s32.totalorder %s6121_s0, %s5167_s22  ;;  %p5171_p7 = scmp.lt.u32.totalorder %s5167_s22, %s6121_s0 }
  0x6f   :  { %p5173_p8 = pnand %p5171_p7, %p5168_p6 }
  0x71   :  { %5176 = shalt.err (!%p5173_p8)
}
  0x72   :  { %s5177_s11 = scalar_lea.vmem %s32_s26, 256  ;;  %p5182_p10 = scmp.lt.s32.totalorder %s32_s26, %s32_s26 }
  0x73   :  { %p5178_p9 = scmp.ne.s32.totalorder %s32_s26, %s5177_s11  ;;  %p5183_p11 = scmp.lt.s32.totalorder %s5177_s11, %s5177_s11 }
  0x75   :  { %p5184_p12 = por %p5183_p11, %p5182_p10 }
  0x77   :  { %p5185_p13 = pnand %p5184_p12, %p5178_p9 }
  0x79   :  { %5188 = shalt.err (!%p5185_p13)
}
  0x7a   :  { %37 = dma.hbm_to_vmem [thread:$0]  %s6121_s0, 256, %s32_s26, [#allocation3], %s5361_s20, %s5361_s20, %s5362_s21  }
  0x7b   :  { %s5189_s3 = scalar_lea.hbm %s6123_s2, 16 }
  0x7c   :  { %p5190_p0 = scmp.ne.s32.totalorder %s6123_s2, %s5189_s3  ;;  %p5193_p1 = scmp.lt.u32.totalorder %s5189_s3, %s6123_s2 }
  0x7e   :  { %p5195_p2 = pnand %p5193_p1, %p5190_p0 }
  0x80   :  { %5198 = shalt.err (!%p5195_p2)
}
  0x81   :  { %s5199_s1 = scalar_lea.vmem %s57_s19, 16  ;;  %s5203_s17 = scalar_lea.vmem %s57_s19, 32 }
  0x82   :  { %p5200_p3 = scmp.ne.s32.totalorder %s57_s19, %s5199_s1  ;;  %p5204_p4 = scmp.lt.s32.totalorder %s57_s19, %s57_s19 }
  0x83   :  { %p5205_p5 = scmp.lt.s32.totalorder %s5203_s17, %s5199_s1 }
  0x85   :  { %p5206_p6 = por %p5205_p5, %p5204_p4 }
  0x87   :  { %p5207_p7 = pnand %p5206_p6, %p5200_p3 }
  0x89   :  { %5210 = shalt.err (!%p5207_p7)
}
  0x8a   :  { %59 = dma.hbm_to_vmem [thread:$0]  %s6123_s2, 16, %s57_s19, [#allocation6]  }
  0x8b   :  { %s5370_s23 = smov [#allocation10]   ;;  %s5371_s22 = smov [#allocation13]  }
  0x8c   :  { %s78_s7 = sshll.u32 %s5370_s23, 4  ;;  %s98_s24 = sshll.u32 %s5371_s22, 4  ;;  %s79_s7 = int_to_ptr.vmem [resolvable:$true] %s78_s7  ;;  %s99_s24 = int_to_ptr.vmem [resolvable:$true] %s98_s24 }
  0x8d   :  { %s5211_s5 = scalar_lea.hbm %s6125_s4, 16 }
  0x8e   :  { %p5212_p8 = scmp.ne.s32.totalorder %s6125_s4, %s5211_s5  ;;  %p5215_p9 = scmp.lt.u32.totalorder %s5211_s5, %s6125_s4 }
  0x90   :  { %p5217_p10 = pnand %p5215_p9, %p5212_p8 }
  0x92   :  { %5220 = shalt.err (!%p5217_p10)
}
  0x93   :  { %s5221_s2 = scalar_lea.vmem %s79_s7, 16  ;;  %s5225_s19 = scalar_lea.vmem %s79_s7, 32 }
  0x94   :  { %p5222_p11 = scmp.ne.s32.totalorder %s79_s7, %s5221_s2  ;;  %p5226_p12 = scmp.lt.s32.totalorder %s79_s7, %s79_s7 }
  0x95   :  { %p5227_p13 = scmp.lt.s32.totalorder %s5225_s19, %s5221_s2 }
  0x97   :  { %p5228_p0 = por %p5227_p13, %p5226_p12 }
  0x99   :  { %p5229_p1 = pnand %p5228_p0, %p5222_p11 }
  0x9b   :  { %5232 = shalt.err (!%p5229_p1)
}
  0x9c   :  { %81 = dma.hbm_to_vmem [thread:$0]  %s6125_s4, 16, %s79_s7, [#allocation9]  }
  0x9d   :  { %s5233_s9 = scalar_lea.hbm %s6127_s6, 16 }
  0x9e   :  { %p5234_p2 = scmp.ne.s32.totalorder %s6127_s6, %s5233_s9  ;;  %p5237_p3 = scmp.lt.u32.totalorder %s5233_s9, %s6127_s6 }
  0xa0   :  { %p5239_p4 = pnand %p5237_p3, %p5234_p2 }
  0xa2   :  { %5242 = shalt.err (!%p5239_p4)
}
  0xa3   :  { %s5243_s26 = scalar_lea.vmem %s99_s24, 16  ;;  %s5247_s23 = scalar_lea.vmem %s99_s24, 32 }
  0xa4   :  { %p5244_p5 = scmp.ne.s32.totalorder %s99_s24, %s5243_s26  ;;  %p5248_p6 = scmp.lt.s32.totalorder %s99_s24, %s99_s24 }
  0xa5   :  { %p5249_p7 = scmp.lt.s32.totalorder %s5247_s23, %s5243_s26 }
  0xa7   :  { %p5250_p8 = por %p5249_p7, %p5248_p6 }
  0xa9   :  { %p5251_p9 = pnand %p5250_p8, %p5244_p5 }
  0xab   :  { %5254 = shalt.err (!%p5251_p9)
}
  0xac   :  { %101 = dma.hbm_to_vmem [thread:$0]  %s6127_s6, 16, %s99_s24, [#allocation12]  }
  0xad   :  { %s5372_s22 = smov [#allocation16]   ;;  %s5373_s27 = smov [#allocation19]  }
  0xae   :  { %s120_s25 = sshll.u32 %s5372_s22, 4  ;;  %s142_s5 = sshll.u32 %s5373_s27, 4  ;;  %s121_s25 = int_to_ptr.vmem [resolvable:$true] %s120_s25  ;;  %s143_s5 = int_to_ptr.vmem [resolvable:$true] %s142_s5 }
  0xaf   :  { %s5255_s18 = scalar_lea.hbm %s6129_s8, 256 }
  0xb0   :  { %p5256_p10 = scmp.ne.s32.totalorder %s6129_s8, %s5255_s18  ;;  %p5259_p11 = scmp.lt.u32.totalorder %s5255_s18, %s6129_s8 }
  0xb2   :  { %p5261_p12 = pnand %p5259_p11, %p5256_p10 }
  0xb4   :  { %5264 = shalt.err (!%p5261_p12)
}
  0xb5   :  { %s5265_s6 = scalar_lea.vmem %s121_s25, 256  ;;  %p5270_p0 = scmp.lt.s32.totalorder %s121_s25, %s121_s25 }
  0xb6   :  { %p5266_p13 = scmp.ne.s32.totalorder %s121_s25, %s5265_s6  ;;  %p5271_p1 = scmp.lt.s32.totalorder %s5265_s6, %s5265_s6 }
  0xb8   :  { %p5272_p2 = por %p5271_p1, %p5270_p0 }
  0xba   :  { %p5273_p3 = pnand %p5272_p2, %p5266_p13 }
  0xbc   :  { %5276 = shalt.err (!%p5273_p3)
}
  0xbd   :  { %123 = dma.hbm_to_vmem [thread:$0]  %s6129_s8, 256, %s121_s25, [#allocation15]  }
  0xbe   :  { %s5277_s9 = scalar_lea.hbm %s6131_s10, 16 }
  0xbf   :  { %p5278_p4 = scmp.ne.s32.totalorder %s6131_s10, %s5277_s9  ;;  %p5281_p5 = scmp.lt.u32.totalorder %s5277_s9, %s6131_s10 }
  0xc1   :  { %p5283_p6 = pnand %p5281_p5, %p5278_p4 }
  0xc3   :  { %5286 = shalt.err (!%p5283_p6)
}
  0xc4   :  { %s5287_s26 = scalar_lea.vmem %s143_s5, 16  ;;  %s5291_s23 = scalar_lea.vmem %s143_s5, 32 }
  0xc5   :  { %p5288_p7 = scmp.ne.s32.totalorder %s143_s5, %s5287_s26  ;;  %p5292_p8 = scmp.lt.s32.totalorder %s143_s5, %s143_s5 }
  0xc6   :  { %p5293_p9 = scmp.lt.s32.totalorder %s5291_s23, %s5287_s26 }
  0xc8   :  { %p5294_p10 = por %p5293_p9, %p5292_p8 }
  0xca   :  { %p5295_p11 = pnand %p5294_p10, %p5288_p7 }
  0xcc   :  { %5298 = shalt.err (!%p5295_p11)
}
  0xcd   :  { %145 = dma.hbm_to_vmem [thread:$0]  %s6131_s10, 16, %s143_s5, [#allocation18]  }
  0xce   :  { %s5374_s7 = smov [#allocation22]   ;;  %s5299_s11 = scalar_lea.hbm %s6133_s12, 16 }
  0xcf   :  { %s162_s22 = sshll.u32 %s5374_s7, 4  ;;  %p5300_p12 = scmp.ne.s32.totalorder %s6133_s12, %s5299_s11  ;;  %s163_s22 = int_to_ptr.vmem [resolvable:$true] %s162_s22 }
  0xd0   :  { %p5303_p13 = scmp.lt.u32.totalorder %s5299_s11, %s6133_s12 }
  0xd2   :  { %p5305_p0 = pnand %p5303_p13, %p5300_p12 }
  0xd4   :  { %5308 = shalt.err (!%p5305_p0)
}
  0xd5   :  { %s5309_s19 = scalar_lea.vmem %s163_s22, 16  ;;  %s5313_s10 = scalar_lea.vmem %s163_s22, 32 }
  0xd6   :  { %p5310_p1 = scmp.ne.s32.totalorder %s163_s22, %s5309_s19  ;;  %p5314_p2 = scmp.lt.s32.totalorder %s163_s22, %s163_s22 }
  0xd7   :  { %p5315_p3 = scmp.lt.s32.totalorder %s5313_s10, %s5309_s19 }
  0xd9   :  { %p5316_p4 = por %p5315_p3, %p5314_p2 }
  0xdb   :  { %p5317_p5 = pnand %p5316_p4, %p5310_p1 }
  0xdd   :  { %5320 = shalt.err (!%p5317_p5)
}
  0xde   :  { %165 = dma.hbm_to_vmem [thread:$0]  %s6133_s12, 16, %s163_s22, [#allocation21]  }
  0xdf   :  { %5343 = dma.done.wait [#allocation3], 256  }
  0xe0   :  { %5344 = vsyncadd [#allocation3], 4294967040 }
  0xe1   :  { %5345 = dma.done.wait [#allocation6], 272  }
  0xe2   :  { %5346 = vsyncadd [#allocation6], 4294967024 }
  0xe3   :  { %5347 = dma.done.wait [#allocation9], 272  }
  0xe4   :  { %5348 = vsyncadd [#allocation9], 4294967024 }
  0xe5   :  { %5349 = dma.done.wait [#allocation12], 32  }
  0xe6   :  { %5350 = vsyncadd [#allocation12], 4294967264 }
  0xe7   :  { %5351 = dma.done.wait [#allocation15], 4352  }
  0xe8   :  { %5352 = vsyncadd [#allocation15], 4294962944 }
  0xe9   :  { %5353 = dma.done.wait [#allocation18], 16400  }
  0xea   :  { %5354 = vsyncadd [#allocation18], 4294950896 }
  0xeb   :  { %5355 = dma.done.wait [#allocation21], 32  }
  0xec   :  { %5356 = vsyncadd [#allocation21], 4294967264  ;;  %v4817_v0 = vld [vmem:[#allocation5] sm:$0xff]   ;;  %v4818_v1 = vld [vmem:[#allocation5 + $0x8] sm:$0xff]   ;;  %vm247_vm0 = vcmask 261120   ;;  %v5375_v13 = vmov 0.0  }
  0xed   :  { %4631 = vmatprep.subr.bf16.mxu0 %v4817_v0  ;;  %v206_v2 = vld [vmem:[#allocation2] sm:$0xff]   ;;  %v208_v3 = vld [vmem:[#allocation2 + $0x8] sm:$0xff]   ;;  %4639 = vmatprep.subr.bf16.mxu1 %v5375_v13  ;;  %vm5376_vm1 = vmmov 0   ;;  %vm479_vm2 = vcmask 1043456   ;;  %vm475_vm3 = vcmask 64512   ;;  %vm665_vm4 = vcmask 130048  }
  0xee   :  { %4632 = vmatpush3.bf16.msra.mxu0 %v4817_v0  ;;  %4635 = vmatprep.mubr.msk.bf16.mxu0 %vm247_vm0, %v206_v2  ;;  %v4150_v4 = vld [vmem:[#allocation7] ss:$0 sm:$0xff]  ;;  %vm4122_vm5 = vcmask 257024   ;;  %s5378_s12 = smov [#allocation23]  }
  0xef   :  { %4633 = vmatprep.subr.bf16.mxu0 %v4818_v1  ;;  %4641 = vmatprep.mubr.msk.bf16.mxu1 %vm5376_vm1, %v5375_v13  ;;  %s4132_s6 = sshll.u32 %s5378_s12, 4  ;;  %s4133_s6 = int_to_ptr.vmem [resolvable:$true] %s4132_s6 }
  0xf0   :  { %s5321_s24 = scalar_lea.vmem %s4133_s6, 256  ;;  %p5326_p7 = scmp.lt.s32.totalorder %s4133_s6, %s4133_s6 }
  0xf1   :  { %p5322_p6 = scmp.ne.s32.totalorder %s4133_s6, %s5321_s24  ;;  %p5327_p8 = scmp.lt.s32.totalorder %s5321_s24, %s5321_s24 }
  0xf2   :  { %4634 = vmatpush3.bf16.msra.mxu0 %v4818_v1 }
  0xf3   :  { %4651 = vmatprep.subr.bf16.mxu0 %v5375_v13  ;;  %p5328_p9 = por %p5327_p8, %p5326_p7 }
  0xf5   :  { %4636 = vmatmul.mubr.msk.bf16.vlgmr.msra.gmra.mrb[0].mxu0 %vm247_vm0, %v208_v3  ;;  %p5329_p10 = pnand %p5328_p9, %p5322_p6 }
  0xf6   :  { %4653 = vmatprep.mubr.msk.bf16.mxu0 %vm5376_vm1, %v5375_v13 }
 0x1c8   :  { %v4637_v5 = vpop.f32.mrb[0].mxu0 }
 0x1c9   :  { %v5634_v6 = vadd.f32 %v4637_v5, %v4150_v4  ;;  %v288_v7 = vpop.f32.mrb[1].mxu0 }
 0x1ca   :  { %v4638_v8 = vpop.f32.mrb[2].mxu0  ;;  %v289_v9 = vadd.f32 %v4150_v4, %v288_v7 }
 0x1cb   :  { %v5636_v10 = vadd.f32 %v4638_v8, %v4150_v4  ;;  %v291_v11 = vpop.f32.mrb[3].mxu0 }
 0x1cc   :  { %303 = vxpose.xlu0.b32.start [1/2] (short) (narrow) %v289_v9, 96  ;;  %v292_v12 = vadd.f32 %v4150_v4, %v291_v11 }
 0x1d0   :  { %304 = vxpose.xlu0.b32.end [2/2] (short) (narrow) %v292_v12, 96 }
 0x24c   :  { %v319_v14 = vpop.trf.xlu0 }
 0x24d   :  { %335 = vxpose.xlu1.b32.start.end [1/1] (short) (narrow) %v319_v14, 16 }
 0x250   :  { %v320_v15 = vpop.trf.xlu0 }
 0x252   :  { %367 = vxpose.xlu1.b32.start.end [1/1] (short) (narrow) %v320_v15, 16 }
 0x254   :  { %v321_v16 = vpop.trf.xlu0 }
 0x258   :  { %v322_v17 = vpop.trf.xlu0 }
 0x259   :  { %v4763_v18 = vpack.i.bf16 %v322_v17, %v321_v16 }
 0x25b   :  { %4764 = vxpose.xlu0.b32.start.end [1/1] (short) (narrow) %v4763_v18, 16 }
 0x25c   :  { %v323_v19 = vpop.trf.xlu0 }
 0x25d   :  { %v467_v20 = vpack.c.bf16 %v323_v19, %v323_v19 }
 0x25f   :  { %v481_v21 = vsel %vm479_vm2, %v467_v20, 0 }
 0x260   :  { %4640 = vmatpush3.bf16.msra.mxu1 %v481_v21  ;;  %v324_v22 = vpop.trf.xlu0 }
 0x261   :  { %4645 = vmatprep.subr.bf16.mxu1 %v5375_v13  ;;  %v468_v31 = vpack.c.bf16 %v324_v22, %v324_v22 }
 0x263   :  { %v528_v34 = vsel %vm479_vm2, %v468_v31, 0 }
 0x264   :  { %v325_v23 = vpop.trf.xlu0 }
 0x265   :  { %v469_v24 = vpack.c.bf16 %v325_v23, %v325_v23 }
 0x267   :  { %v575_v25 = vsel %vm479_vm2, %v469_v24, 0 }
 0x268   :  { %4652 = vmatpush3.bf16.msra.mxu0 %v575_v25  ;;  %v326_v26 = vpop.trf.xlu0 }
 0x269   :  { %4663 = vmatprep.subr.bf16.mxu0 %v5375_v13  ;;  %v470_v37 = vpack.c.bf16 %v326_v26, %v326_v26 }
 0x26b   :  { %v622_v41 = vsel %vm479_vm2, %v470_v37, 0 }
 0x26c   :  { %v5648_v27 = vpop.trf.xlu0 }
 0x270   :  { %v5650_v28 = vpop.trf.xlu0 }
 0x274   :  { %v5652_v30 = vpop.trf.xlu0 }
 0x278   :  { %v5656_v36 = vpop.trf.xlu0 }
 0x2cd   :  { %v351_v29 = vpop.trf.xlu1 }
 0x2d1   :  { %v352_v32 = vpop.trf.xlu1 }
 0x2d2   :  { %v463_v33 = vpack.c.bf16 %v352_v32, %v351_v29 }
 0x2d4   :  { %4642 = vmatmul.mubr.msk.bf16.vlgmr.msra.gmra.mrb[0].mxu1 %vm475_vm3, %v463_v33 }
 0x2d5   :  { %4646 = vmatpush3.bf16.msra.mxu1 %v528_v34  ;;  %v383_v35 = vpop.trf.xlu1  ;;  %4647 = vmatprep.mubr.msk.bf16.mxu1 %vm5376_vm1, %v5375_v13 }
 0x2d6   :  { %4657 = vmatprep.subr.bf16.mxu1 %v5375_v13 }
 0x2d9   :  { %v384_v38 = vpop.trf.xlu1 }
 0x2da   :  { %v464_v39 = vpack.c.bf16 %v384_v38, %v383_v35 }
 0x2db   :  { %v4765_v40 = vpop.trf.xlu0 }
 0x2dc   :  { %4648 = vmatmul.mubr.msk.bf16.vlgmr.msra.gmra.mrb[4].mxu1 %vm475_vm3, %v464_v39  ;;  %v4769_v42 = vunpack.i.h.bf16 %v4765_v40  ;;  %v4766_v43 = vunpack.i.l.bf16 %v4765_v40 }
 0x2dd   :  { %4658 = vmatpush3.bf16.msra.mxu1 %v622_v41  ;;  %4659 = vmatprep.mubr.msk.bf16.mxu1 %vm5376_vm1, %v5375_v13 }
 0x2de   :  { %4669 = vmatprep.subr.bf16.mxu1 %v5375_v13 }
 0x2df   :  { %v4770_v44 = vpop.trf.xlu0 }
 0x2e0   :  { %v4774_v45 = vunpack.i.h.bf16 %v4770_v44  ;;  %v4771_v46 = vunpack.i.l.bf16 %v4770_v44 }
 0x2e2   :  { %v465_v47 = vpack.c.bf16 %v4771_v46, %v4766_v43  ;;  %v466_v48 = vpack.c.bf16 %v4774_v45, %v4769_v42 }
 0x2e4   :  { %4654 = vmatmul.mubr.msk.bf16.vlgmr.msra.gmra.mrb[4].mxu0 %vm475_vm3, %v465_v47  ;;  %4660 = vmatmul.mubr.msk.bf16.vlgmr.msra.gmra.mrb[8].mxu1 %vm475_vm3, %v466_v48 }
 0x2e5   :  { %4665 = vmatprep.mubr.msk.bf16.mxu0 %vm5376_vm1, %v5375_v13  ;;  %4671 = vmatprep.mubr.msk.bf16.mxu1 %vm5376_vm1, %v5375_v13 }
 0x3a7   :  { %v517_v49 = vpop.f32.mrb[0].mxu1 }
 0x3a8   :  { %v4643_v50 = vpop.f32.mrb[1].mxu1  ;;  %v666_v51 = vsel %vm665_vm4, %v517_v49, -inf }
 0x3a9   :  { %667 = vmax.xlane.f32.xlu1 %v666_v51  ;;  %v520_v52 = vpop.f32.mrb[2].mxu1 }
 0x3aa   :  { %v4644_v53 = vpop.f32.mrb[3].mxu1  ;;  %v669_v54 = vsel %vm665_vm4, %v520_v52, -inf }
 0x3ab   :  { %670 = vmax.xlane.f32.xlu0 %v669_v54 }
 0x3af   :  { %v564_v55 = vpop.f32.mrb[4].mxu1 }
 0x3b0   :  { %v4649_v56 = vpop.f32.mrb[5].mxu1  ;;  %v672_v57 = vsel %vm665_vm4, %v564_v55, -inf }
 0x3b1   :  { %673 = vmax.xlane.f32.xlu1 %v672_v57  ;;  %v567_v58 = vpop.f32.mrb[6].mxu1 }
 0x3b2   :  { %v4650_v59 = vpop.f32.mrb[7].mxu1  ;;  %v675_v5 = vsel %vm665_vm4, %v567_v58, -inf }
 0x3b7   :  { %v611_v60 = vpop.f32.mrb[4].mxu0  ;;  %v658_v61 = vpop.f32.mrb[8].mxu1 }
 0x3b8   :  { %v4655_v62 = vpop.f32.mrb[5].mxu0  ;;  %v4661_v63 = vpop.f32.mrb[9].mxu1  ;;  %v678_v0 = vsel %vm665_vm4, %v611_v60, -inf  ;;  %v684_v8 = vsel %vm665_vm4, %v658_v61, -inf }
 0x3b9   :  { %v661_v1 = vpop.f32.mrb[10].mxu1  ;;  %679 = vmax.xlane.f32.xlu1 %v678_v0  ;;  %v614_v2 = vpop.f32.mrb[6].mxu0 }
 0x3ba   :  { %v4656_v3 = vpop.f32.mrb[7].mxu0  ;;  %v4662_v4 = vpop.f32.mrb[11].mxu1  ;;  %v681_v7 = vsel %vm665_vm4, %v614_v2, -inf  ;;  %v687_v9 = vsel %vm665_vm4, %v661_v1, -inf }
 0x3bd   :  { %676 = vmax.xlane.f32.xlu1 %v675_v5 }
 0x3c1   :  { %682 = vmax.xlane.f32.xlu1 %v681_v7 }
 0x3c5   :  { %685 = vmax.xlane.f32.xlu1 %v684_v8 }
 0x3c9   :  { %688 = vmax.xlane.f32.xlu1 %v687_v9 }
 0x436   :  { %v668_v11 = vpop.xlane.xlu1 %667 }
 0x437   :  { %v690_v12 = vsub.f32 %v517_v49, %v668_v11 }
 0x438   :  { %v671_v14 = vpop.xlane.xlu0 %670 }
 0x439   :  { %v698_v15 = vmul.f32 1.442695, %v690_v12  ;;  %v691_v16 = vsub.f32 %v520_v52, %v671_v14 }
 0x43b   :  { %4953 = vpow2.f32 %v698_v15  ;;  %v700_v17 = vmul.f32 1.442695, %v691_v16 }
 0x43d   :  { %4955 = vpow2.f32 %v700_v17 }
 0x43e   :  { %v674_v18 = vpop.xlane.xlu1 %673 }
 0x43f   :  { %v692_v19 = vsub.f32 %v564_v55, %v674_v18 }
 0x441   :  { %v702_v20 = vmul.f32 1.442695, %v692_v19 }
 0x443   :  { %4957 = vpow2.f32 %v702_v20  ;;  %v472_v20 = vpack.c.bf16 %v5650_v28, %v5650_v28  ;;  %v474_v28 = vpack.c.bf16 %v5656_v36, %v5656_v36 }
 0x445   :  { %v4954_v21 = vpop.eup %4953 }
 0x446   :  { %v680_v22 = vpop.xlane.xlu1 %679  ;;  %v714_v23 = vsel %vm665_vm4, %v4954_v21, 0.0 }
 0x447   :  { %v4956_v24 = vpop.eup %4955  ;;  %v694_v25 = vsub.f32 %v611_v60, %v680_v22  ;;  %715 = vadd.xlane.f32.xlu1 %v714_v23 }
 0x448   :  { %v717_v31 = vsel %vm665_vm4, %v4956_v24, 0.0 }
 0x449   :  { %v706_v26 = vmul.f32 1.442695, %v694_v25 }
 0x44a   :  { %v677_v29 = vpop.xlane.xlu1 %676 }
 0x44b   :  { %4959 = vpow2.f32 %v706_v26  ;;  %v693_v32 = vsub.f32 %v567_v58, %v677_v29  ;;  %718 = vadd.xlane.f32.xlu1 %v717_v31 }
 0x44d   :  { %v4958_v33 = vpop.eup %4957  ;;  %v704_v34 = vmul.f32 1.442695, %v693_v32 }
 0x44e   :  { %v683_v35 = vpop.xlane.xlu1 %682  ;;  %v720_v37 = vsel %vm665_vm4, %v4958_v33, 0.0 }
 0x44f   :  { %4961 = vpow2.f32 %v704_v34  ;;  %v695_v38 = vsub.f32 %v614_v2, %v683_v35  ;;  %721 = vadd.xlane.f32.xlu1 %v720_v37 }
 0x451   :  { %v708_v39 = vmul.f32 1.442695, %v695_v38 }
 0x452   :  { %v686_v40 = vpop.xlane.xlu1 %685 }
 0x453   :  { %4963 = vpow2.f32 %v708_v39  ;;  %v696_v41 = vsub.f32 %v658_v61, %v686_v40 }
 0x455   :  { %v4960_v42 = vpop.eup %4959  ;;  %v710_v43 = vmul.f32 1.442695, %v696_v41 }
 0x456   :  { %v689_v44 = vpop.xlane.xlu1 %688  ;;  %v726_v45 = vsel %vm665_vm4, %v4960_v42, 0.0 }
 0x457   :  { %4965 = vpow2.f32 %v710_v43  ;;  %v697_v46 = vsub.f32 %v661_v1, %v689_v44  ;;  %727 = vadd.xlane.f32.xlu1 %v726_v45 }
 0x459   :  { %v4962_v47 = vpop.eup %4961  ;;  %v712_v48 = vmul.f32 1.442695, %v697_v46 }
 0x45a   :  { %v723_v49 = vsel %vm665_vm4, %v4962_v47, 0.0 }
 0x45b   :  { %4967 = vpow2.f32 %v712_v48  ;;  %724 = vadd.xlane.f32.xlu1 %v723_v49 }
 0x45d   :  { %v4964_v50 = vpop.eup %4963 }
 0x45e   :  { %v729_v51 = vsel %vm665_vm4, %v4964_v50, 0.0 }
 0x45f   :  { %730 = vadd.xlane.f32.xlu1 %v729_v51 }
 0x461   :  { %v4966_v52 = vpop.eup %4965 }
 0x462   :  { %v732_v53 = vsel %vm665_vm4, %v4966_v52, 0.0 }
 0x463   :  { %733 = vadd.xlane.f32.xlu0 %v732_v53 }
 0x465   :  { %v4968_v54 = vpop.eup %4967 }
 0x466   :  { %v735_v55 = vsel %vm665_vm4, %v4968_v54, 0.0 }
 0x467   :  { %736 = vadd.xlane.f32.xlu1 %v735_v55 }
 0x490   :  { %974 = vxpose.xlu0.b32.start [1/2] (short) (narrow) %v5634_v6, 96 }
 0x494   :  { %975 = vxpose.xlu0.b32.end [2/2] (short) (narrow) %v5636_v10, 96  ;;  %v471_v10 = vpack.c.bf16 %v5648_v27, %v5648_v27 }
 0x4d4   :  { %v716_v56 = vpop.xlane.xlu1 %715 }
 0x4d5   :  { %4969 = vrcp.f32 %v716_v56 }
 0x4d8   :  { %v719_v57 = vpop.xlane.xlu1 %718 }
 0x4d9   :  { %4971 = vrcp.f32 %v719_v57 }
 0x4dc   :  { %v722_v58 = vpop.xlane.xlu1 %721 }
 0x4dd   :  { %4973 = vrcp.f32 %v722_v58 }
 0x4df   :  { %v4970_v59 = vpop.eup %4969 }
 0x4e0   :  { %v746_v62 = vmul.f32 %v4970_v59, %v4954_v21 }
 0x4e3   :  { %v4972_v60 = vpop.eup %4971 }
 0x4e4   :  { %v728_v61 = vpop.xlane.xlu1 %727  ;;  %v747_v63 = vmul.f32 %v4972_v60, %v4956_v24  ;;  %v473_v24 = vpack.c.bf16 %v5652_v30, %v5652_v30 }
 0x4e6   :  { %v754_v0 = vpack.c.bf16 %v747_v63, %v746_v62 }
 0x4e7   :  { %v4974_v4 = vpop.eup %4973 }
 0x4e8   :  { %v725_v1 = vpop.xlane.xlu1 %724  ;;  %v762_v2 = vsel %vm665_vm4, %v754_v0, 0  ;;  %v748_v8 = vmul.f32 %v4974_v4, %v4958_v33 }
 0x4e9   :  { %4975 = vrcp.f32 %v725_v1  ;;  %4664 = vmatpush3.bf16.xpose.msra.mxu0 %v762_v2 }
 0x4ea   :  { %4675 = vmatprep.subr.bf16.mxu0 %v5375_v13  ;;  %4977 = vrcp.f32 %v728_v61 }
 0x4ec   :  { %v731_v6 = vpop.xlane.xlu1 %730 }
 0x4ed   :  { %4979 = vrcp.f32 %v731_v6 }
 0x4f0   :  { %v734_v3 = vpop.xlane.xlu0 %733  ;;  %4666 = vmatmul.mubr.msk.bf16.vlgmr.msra.gmra.mrb[8].mxu0 %vm665_vm4, %v471_v10 }
 0x4f1   :  { %4677 = vmatprep.mubr.msk.bf16.mxu0 %vm5376_vm1, %v5375_v13  ;;  %4981 = vrcp.f32 %v734_v3 }
 0x4f3   :  { %v4976_v5 = vpop.eup %4975 }
 0x4f4   :  { %v737_v7 = vpop.xlane.xlu1 %736  ;;  %v749_v9 = vmul.f32 %v4976_v5, %v4962_v47  ;;  %v4978_v11 = vpop.eup %4977 }
 0x4f5   :  { %4983 = vrcp.f32 %v737_v7  ;;  %v750_v16 = vmul.f32 %v4978_v11, %v4960_v42 }
 0x4f6   :  { %v755_v12 = vpack.c.bf16 %v749_v9, %v748_v8 }
 0x4f7   :  { %v4980_v14 = vpop.eup %4979 }
 0x4f8   :  { %v808_v15 = vsel %vm665_vm4, %v755_v12, 0  ;;  %v751_v27 = vmul.f32 %v4980_v14, %v4964_v50 }
 0x4f9   :  { %4670 = vmatpush3.bf16.xpose.msra.mxu1 %v808_v15 }
 0x4fa   :  { %v756_v17 = vpack.c.bf16 %v751_v27, %v750_v16  ;;  %4681 = vmatprep.subr.bf16.mxu1 %v5375_v13 }
 0x4fb   :  { %v4982_v19 = vpop.eup %4981 }
 0x4fc   :  { %v854_v18 = vsel %vm665_vm4, %v756_v17, 0  ;;  %v752_v22 = vmul.f32 %v4982_v19, %v4966_v52 }
 0x4fd   :  { %4676 = vmatpush3.bf16.xpose.msra.mxu0 %v854_v18 }
 0x4fe   :  { %4687 = vmatprep.subr.bf16.mxu0 %v5375_v13 }
 0x4ff   :  { %v4984_v21 = vpop.eup %4983 }
 0x500   :  { %4672 = vmatmul.mubr.msk.bf16.vlgmr.msra.gmra.mrb[12].mxu1 %vm665_vm4, %v472_v20  ;;  %v753_v23 = vmul.f32 %v4984_v21, %v4968_v54 }
 0x501   :  { %4683 = vmatprep.mubr.msk.bf16.mxu1 %vm5376_vm1, %v5375_v13 }
 0x502   :  { %v757_v25 = vpack.c.bf16 %v753_v23, %v752_v22 }
 0x504   :  { %4678 = vmatmul.mubr.msk.bf16.vlgmr.msra.gmra.mrb[12].mxu0 %vm665_vm4, %v473_v24  ;;  %v900_v26 = vsel %vm665_vm4, %v757_v25, 0 }
 0x505   :  { %4682 = vmatpush3.bf16.xpose.msra.mxu1 %v900_v26  ;;  %4689 = vmatprep.mubr.msk.bf16.mxu0 %vm5376_vm1, %v5375_v13 }
 0x506   :  { %4693 = vmatprep.subr.bf16.mxu1 %v5375_v13 }
 0x50c   :  { %4684 = vmatmul.mubr.msk.bf16.vlgmr.msra.gmra.mrb[16].mxu1 %vm665_vm4, %v474_v28 }
 0x50d   :  { %4695 = vmatprep.mubr.msk.bf16.mxu1 %vm5376_vm1, %v5375_v13 }
 0x510   :  { %v990_v30 = vpop.trf.xlu0 }
 0x514   :  { %v991_v29 = vpop.trf.xlu0 }
 0x515   :  { %v4775_v31 = vpack.i.bf16 %v991_v29, %v990_v30 }
 0x517   :  { %4776 = vxpose.xlu1.b32.start.end [1/1] (short) (narrow) %v4775_v31, 16 }
 0x518   :  { %v992_v32 = vpop.trf.xlu0 }
 0x51c   :  { %v993_v33 = vpop.trf.xlu0 }
 0x51d   :  { %v4787_v34 = vpack.i.bf16 %v993_v33, %v992_v32 }
 0x51f   :  { %4788 = vxpose.xlu0.b32.start.end [1/1] (short) (narrow) %v4787_v34, 16 }
 0x520   :  { %v994_v35 = vpop.trf.xlu0 }
 0x521   :  { %v1138_v37 = vpack.c.bf16 %v994_v35, %v994_v35 }
 0x523   :  { %v1150_v38 = vsel %vm479_vm2, %v1138_v37, 0 }
 0x524   :  { %v995_v39 = vpop.trf.xlu0  ;;  %4688 = vmatpush3.bf16.msra.mxu0 %v1150_v38 }
 0x525   :  { %v1139_v36 = vpack.c.bf16 %v995_v39, %v995_v39  ;;  %4699 = vmatprep.subr.bf16.mxu0 %v5375_v13 }
 0x527   :  { %v1197_v40 = vsel %vm479_vm2, %v1139_v36, 0 }
 0x528   :  { %4694 = vmatpush3.bf16.msra.mxu1 %v1197_v40  ;;  %v996_v41 = vpop.trf.xlu0 }
 0x529   :  { %4705 = vmatprep.subr.bf16.mxu1 %v5375_v13  ;;  %v1140_v48 = vpack.c.bf16 %v996_v41, %v996_v41 }
 0x52b   :  { %v1244_v58 = vsel %vm479_vm2, %v1140_v48, 0 }
 0x52c   :  { %v997_v42 = vpop.trf.xlu0 }
 0x52d   :  { %v1141_v49 = vpack.c.bf16 %v997_v42, %v997_v42 }
 0x52f   :  { %v1291_v59 = vsel %vm479_vm2, %v1141_v49, 0 }
 0x530   :  { %v5722_v43 = vpop.trf.xlu0 }
 0x534   :  { %v5724_v44 = vpop.trf.xlu0 }
 0x538   :  { %v5726_v45 = vpop.trf.xlu0 }
 0x53c   :  { %v5728_v47 = vpop.trf.xlu0 }
 0x597   :  { %v4777_v46 = vpop.trf.xlu1 }
 0x598   :  { %v4781_v50 = vunpack.i.h.bf16 %v4777_v46  ;;  %v4778_v51 = vunpack.i.l.bf16 %v4777_v46 }
 0x59b   :  { %v4782_v52 = vpop.trf.xlu1 }
 0x59c   :  { %v4786_v53 = vunpack.i.h.bf16 %v4782_v52  ;;  %v4783_v54 = vunpack.i.l.bf16 %v4782_v52 }
 0x59e   :  { %v1134_v55 = vpack.c.bf16 %v4783_v54, %v4778_v51  ;;  %v1135_v56 = vpack.c.bf16 %v4786_v53, %v4781_v50 }
 0x59f   :  { %v4789_v57 = vpop.trf.xlu0 }
 0x5a0   :  { %4690 = vmatmul.mubr.msk.bf16.vlgmr.msra.gmra.mrb[16].mxu0 %vm475_vm3, %v1134_v55  ;;  %4696 = vmatmul.mubr.msk.bf16.vlgmr.msra.gmra.mrb[20].mxu1 %vm475_vm3, %v1135_v56  ;;  %v4793_v60 = vunpack.i.h.bf16 %v4789_v57  ;;  %v4790_v61 = vunpack.i.l.bf16 %v4789_v57 }
 0x5a1   :  { %4700 = vmatpush3.bf16.msra.mxu0 %v1244_v58  ;;  %4706 = vmatpush3.bf16.msra.mxu1 %v1291_v59 }
 0x5a2   :  { %4701 = vmatprep.mubr.msk.bf16.mxu0 %vm5376_vm1, %v5375_v13  ;;  %4707 = vmatprep.mubr.msk.bf16.mxu1 %vm5376_vm1, %v5375_v13 }
 0x5a3   :  { %v4794_v62 = vpop.trf.xlu0  ;;  %4711 = vmatprep.subr.bf16.mxu0 %v5375_v13  ;;  %4717 = vmatprep.subr.bf16.mxu1 %v5375_v13 }
 0x5a4   :  { %v4798_v63 = vunpack.i.h.bf16 %v4794_v62  ;;  %v4795_v0 = vunpack.i.l.bf16 %v4794_v62 }
 0x5a6   :  { %v1136_v1 = vpack.c.bf16 %v4795_v0, %v4790_v61  ;;  %v1137_v2 = vpack.c.bf16 %v4798_v63, %v4793_v60 }
 0x5a8   :  { %4702 = vmatmul.mubr.msk.bf16.vlgmr.msra.gmra.mrb[20].mxu0 %vm475_vm3, %v1136_v1  ;;  %4708 = vmatmul.mubr.msk.bf16.vlgmr.msra.gmra.mrb[24].mxu1 %vm475_vm3, %v1137_v2 }
 0x5a9   :  { %4713 = vmatprep.mubr.msk.bf16.mxu0 %vm5376_vm1, %v5375_v13  ;;  %4719 = vmatprep.mubr.msk.bf16.mxu1 %vm5376_vm1, %v5375_v13 }
 0x5c3   :  { %v5746_v6 = vpop.f32.mrb[8].mxu0 }
 0x5c4   :  { %v4667_v10 = vpop.f32.mrb[9].mxu0 }
 0x5c5   :  { %v801_v3 = vpop.f32.mrb[10].mxu0 }
 0x5c6   :  { %v4668_v4 = vpop.f32.mrb[11].mxu0 }
 0x5d3   :  { %v5748_v5 = vpop.f32.mrb[12].mxu1 }
 0x5d4   :  { %v4673_v7 = vpop.f32.mrb[13].mxu1 }
 0x5d5   :  { %v847_v8 = vpop.f32.mrb[14].mxu1 }
 0x5d6   :  { %v4674_v9 = vpop.f32.mrb[15].mxu1 }
 0x5d7   :  { %v5750_v11 = vpop.f32.mrb[12].mxu0 }
 0x5d8   :  { %v4679_v12 = vpop.f32.mrb[13].mxu0 }
 0x5d9   :  { %v893_v14 = vpop.f32.mrb[14].mxu0 }
 0x5da   :  { %v4680_v15 = vpop.f32.mrb[15].mxu0 }
 0x5df   :  { %v5752_v16 = vpop.f32.mrb[16].mxu1 }
 0x5e0   :  { %v4685_v27 = vpop.f32.mrb[17].mxu1 }
 0x5e1   :  { %v939_v17 = vpop.f32.mrb[18].mxu1 }
 0x5e2   :  { %v4686_v18 = vpop.f32.mrb[19].mxu1 }
 0x673   :  { %v1186_v19 = vpop.f32.mrb[16].mxu0  ;;  %v1233_v20 = vpop.f32.mrb[20].mxu1 }
 0x674   :  { %v4691_v21 = vpop.f32.mrb[17].mxu0  ;;  %v4697_v22 = vpop.f32.mrb[21].mxu1  ;;  %v1334_v23 = vsel %vm665_vm4, %v1186_v19, -inf  ;;  %v1340_v29 = vsel %vm665_vm4, %v1233_v20, -inf }
 0x675   :  { %v1236_v24 = vpop.f32.mrb[22].mxu1  ;;  %1335 = vmax.xlane.f32.xlu1 %v1334_v23  ;;  %v1189_v25 = vpop.f32.mrb[18].mxu0 }
 0x676   :  { %v4692_v26 = vpop.f32.mrb[19].mxu0  ;;  %v4698_v28 = vpop.f32.mrb[23].mxu1  ;;  %v1337_v30 = vsel %vm665_vm4, %v1189_v25, -inf  ;;  %v1343_v40 = vsel %vm665_vm4, %v1236_v24, -inf }
 0x677   :  { %1338 = vmax.xlane.f32.xlu0 %v1337_v30 }
 0x679   :  { %1341 = vmax.xlane.f32.xlu1 %v1340_v29 }
 0x67b   :  { %v1280_v31 = vpop.f32.mrb[20].mxu0  ;;  %v1327_v32 = vpop.f32.mrb[24].mxu1 }
 0x67c   :  { %v4703_v33 = vpop.f32.mrb[21].mxu0  ;;  %v4709_v34 = vpop.f32.mrb[25].mxu1  ;;  %v1346_v35 = vsel %vm665_vm4, %v1280_v31, -inf  ;;  %v1352_v42 = vsel %vm665_vm4, %v1327_v32, -inf }
 0x67d   :  { %v1330_v37 = vpop.f32.mrb[26].mxu1  ;;  %1347 = vmax.xlane.f32.xlu1 %v1346_v35  ;;  %v1283_v38 = vpop.f32.mrb[22].mxu0 }
 0x67e   :  { %v4704_v39 = vpop.f32.mrb[23].mxu0  ;;  %v4710_v36 = vpop.f32.mrb[27].mxu1  ;;  %v1349_v41 = vsel %vm665_vm4, %v1283_v38, -inf  ;;  %v1355_v46 = vsel %vm665_vm4, %v1330_v37, -inf }
 0x681   :  { %1344 = vmax.xlane.f32.xlu1 %v1343_v40 }
 0x685   :  { %1350 = vmax.xlane.f32.xlu1 %v1349_v41 }
 0x689   :  { %1353 = vmax.xlane.f32.xlu1 %v1352_v42 }
 0x68d   :  { %1356 = vmax.xlane.f32.xlu1 %v1355_v46 }
 0x702   :  { %v1336_v48 = vpop.xlane.xlu1 %1335 }
 0x703   :  { %v1358_v49 = vsub.f32 %v1186_v19, %v1336_v48 }
 0x704   :  { %v1339_v50 = vpop.xlane.xlu0 %1338 }
 0x705   :  { %v1366_v51 = vmul.f32 1.442695, %v1358_v49  ;;  %v1359_v52 = vsub.f32 %v1189_v25, %v1339_v50 }
 0x706   :  { %v1342_v53 = vpop.xlane.xlu1 %1341 }
 0x707   :  { %4985 = vpow2.f32 %v1366_v51  ;;  %v1368_v54 = vmul.f32 1.442695, %v1359_v52  ;;  %v1360_v55 = vsub.f32 %v1233_v20, %v1342_v53  ;;  %v1142_v51 = vpack.c.bf16 %v5722_v43, %v5722_v43 }
 0x708   :  { %v1143_v43 = vpack.c.bf16 %v5724_v44, %v5724_v44  ;;  %v1145_v44 = vpack.c.bf16 %v5728_v47, %v5728_v47 }
 0x709   :  { %4987 = vpow2.f32 %v1368_v54  ;;  %v1370_v56 = vmul.f32 1.442695, %v1360_v55 }
 0x70a   :  { %v1348_v57 = vpop.xlane.xlu1 %1347 }
 0x70b   :  { %4989 = vpow2.f32 %v1370_v56  ;;  %v1362_v58 = vsub.f32 %v1280_v31, %v1348_v57 }
 0x70d   :  { %v1374_v62 = vmul.f32 1.442695, %v1362_v58 }
 0x70e   :  { %v1345_v59 = vpop.xlane.xlu1 %1344 }
 0x70f   :  { %v1361_v60 = vsub.f32 %v1236_v24, %v1345_v59 }
 0x711   :  { %v4986_v61 = vpop.eup %4985  ;;  %v1372_v63 = vmul.f32 1.442695, %v1361_v60 }
 0x712   :  { %v1351_v0 = vpop.xlane.xlu1 %1350  ;;  %v1382_v1 = vsel %vm665_vm4, %v4986_v61, 0.0 }
 0x713   :  { %v4988_v2 = vpop.eup %4987  ;;  %4991 = vpow2.f32 %v1372_v63  ;;  %v1363_v10 = vsub.f32 %v1283_v38, %v1351_v0  ;;  %1383 = vadd.xlane.f32.xlu1 %v1382_v1  ;;  %v1144_v1 = vpack.c.bf16 %v5726_v45, %v5726_v45 }
 0x714   :  { %4993 = vpow2.f32 %v1374_v62  ;;  %v1385_v7 = vsel %vm665_vm4, %v4988_v2, 0.0 }
 0x715   :  { %v1376_v3 = vmul.f32 1.442695, %v1363_v10  ;;  %v4990_v8 = vpop.eup %4989 }
 0x716   :  { %v1354_v4 = vpop.xlane.xlu1 %1353  ;;  %v1388_v15 = vsel %vm665_vm4, %v4990_v8, 0.0 }
 0x717   :  { %4995 = vpow2.f32 %v1376_v3  ;;  %v1364_v9 = vsub.f32 %v1327_v32, %v1354_v4  ;;  %1386 = vadd.xlane.f32.xlu1 %v1385_v7 }
 0x719   :  { %v1378_v12 = vmul.f32 1.442695, %v1364_v9 }
 0x71a   :  { %v1357_v14 = vpop.xlane.xlu1 %1356 }
 0x71b   :  { %4997 = vpow2.f32 %v1378_v12  ;;  %v1365_v27 = vsub.f32 %v1330_v37, %v1357_v14  ;;  %1389 = vadd.xlane.f32.xlu1 %v1388_v15  ;;  %v4821_v15 = vld [vmem:[#allocation8] sm:$0xff]  }
 0x71d   :  { %v4992_v17 = vpop.eup %4991  ;;  %v1380_v18 = vmul.f32 1.442695, %v1365_v27 }
 0x71e   :  { %v1391_v19 = vsel %vm665_vm4, %v4992_v17, 0.0  ;;  %v4994_v20 = vpop.eup %4993 }
 0x71f   :  { %4999 = vpow2.f32 %v1380_v18  ;;  %1392 = vadd.xlane.f32.xlu1 %v1391_v19  ;;  %v1394_v22 = vsel %vm665_vm4, %v4994_v20, 0.0  ;;  %v4822_v19 = vld [vmem:[#allocation8 + $0x8] sm:$0xff]  }
 0x721   :  { %v4996_v21 = vpop.eup %4995 }
 0x722   :  { %v1397_v23 = vsel %vm665_vm4, %v4996_v21, 0.0 }
 0x723   :  { %1395 = vadd.xlane.f32.xlu1 %v1394_v22  ;;  %1398 = vadd.xlane.f32.xlu0 %v1397_v23 }
 0x725   :  { %v4998_v24 = vpop.eup %4997 }
 0x726   :  { %v1400_v25 = vsel %vm665_vm4, %v4998_v24, 0.0 }
 0x727   :  { %1401 = vadd.xlane.f32.xlu1 %v1400_v25 }
 0x729   :  { %v5000_v26 = vpop.eup %4999 }
 0x72a   :  { %v1403_v28 = vsel %vm665_vm4, %v5000_v26, 0.0 }
 0x72b   :  { %1404 = vadd.xlane.f32.xlu0 %v1403_v28 }
 0x7a0   :  { %v1384_v30 = vpop.xlane.xlu1 %1383 }
 0x7a1   :  { %5001 = vrcp.f32 %v1384_v30 }
 0x7a4   :  { %v1387_v29 = vpop.xlane.xlu1 %1386 }
 0x7a5   :  { %5003 = vrcp.f32 %v1387_v29 }
 0x7a8   :  { %v1390_v31 = vpop.xlane.xlu1 %1389 }
 0x7a9   :  { %5005 = vrcp.f32 %v1390_v31 }
 0x7ab   :  { %v5002_v33 = vpop.eup %5001 }
 0x7ac   :  { %v1393_v32 = vpop.xlane.xlu1 %1392  ;;  %v1414_v38 = vmul.f32 %v5002_v33, %v4986_v61  ;;  %v5033_v33 = vld [vmem:[#allocation2] sm:$0xff]  }
 0x7ad   :  { %5007 = vrcp.f32 %v1393_v32  ;;  %v4173_v32 = vld [vmem:[#allocation10] ss:$0 sm:$0xff] }
 0x7af   :  { %v5004_v34 = vpop.eup %5003 }
 0x7b0   :  { %v1399_v35 = vpop.xlane.xlu0 %1398  ;;  %v1396_v37 = vpop.xlane.xlu1 %1395  ;;  %v1415_v39 = vmul.f32 %v5004_v34, %v4988_v2  ;;  %v210_v34 = vunpack.c.l.bf16 %v5033_v33 }
 0x7b1   :  { %5009 = vrcp.f32 %v1399_v35 }
 0x7b2   :  { %5011 = vrcp.f32 %v1396_v37  ;;  %v1422_v36 = vpack.c.bf16 %v1415_v39, %v1414_v38  ;;  %v211_v37 = vunpack.c.h.bf16 %v5033_v33 }
 0x7b3   :  { %v5006_v42 = vpop.eup %5005 }
 0x7b4   :  { %v1402_v40 = vpop.xlane.xlu1 %1401  ;;  %v1430_v41 = vsel %vm665_vm4, %v1422_v36, 0  ;;  %v1416_v49 = vmul.f32 %v5006_v42, %v4990_v8 }
 0x7b5   :  { %4712 = vmatpush3.bf16.xpose.msra.mxu0 %v1430_v41  ;;  %5013 = vrcp.f32 %v1402_v40 }
 0x7b6   :  { %4723 = vmatprep.subr.bf16.mxu0 %v5375_v13 }
 0x7b7   :  { %v5008_v46 = vpop.eup %5007 }
 0x7b8   :  { %v1405_v48 = vpop.xlane.xlu0 %1404  ;;  %v1417_v50 = vmul.f32 %v5008_v46, %v4992_v17 }
 0x7b9   :  { %5015 = vrcp.f32 %v1405_v48 }
 0x7ba   :  { %v1423_v52 = vpack.c.bf16 %v1417_v50, %v1416_v49  ;;  %v5034_v49 = vld [vmem:[#allocation2 + $0x8] sm:$0xff]  }
 0x7bb   :  { %v5010_v53 = vpop.eup %5009  ;;  %v212_v50 = vunpack.c.l.bf16 %v5034_v49 }
 0x7bc   :  { %v5012_v54 = vpop.eup %5011  ;;  %4714 = vmatmul.mubr.msk.bf16.vlgmr.msra.gmra.mrb[24].mxu0 %vm665_vm4, %v1142_v51  ;;  %v1476_v55 = vsel %vm665_vm4, %v1423_v52, 0  ;;  %v1419_v56 = vmul.f32 %v5010_v53, %v4996_v21 }
 0x7bd   :  { %4718 = vmatpush3.bf16.xpose.msra.mxu1 %v1476_v55  ;;  %v1418_v57 = vmul.f32 %v5012_v54, %v4994_v20  ;;  %4725 = vmatprep.mubr.msk.bf16.mxu0 %vm5376_vm1, %v5375_v13  ;;  %v213_v54 = vunpack.c.h.bf16 %v5034_v49 }
 0x7be   :  { %4729 = vmatprep.subr.bf16.mxu1 %v5375_v13 }
 0x7bf   :  { %v1424_v58 = vpack.c.bf16 %v1419_v56, %v1418_v57  ;;  %v5014_v59 = vpop.eup %5013 }
 0x7c0   :  { %v1420_v62 = vmul.f32 %v5014_v59, %v4998_v24 }
 0x7c1   :  { %v1522_v60 = vsel %vm665_vm4, %v1424_v58, 0 }
 0x7c2   :  { %4724 = vmatpush3.bf16.xpose.msra.mxu0 %v1522_v60 }
 0x7c3   :  { %v5016_v61 = vpop.eup %5015  ;;  %4735 = vmatprep.subr.bf16.mxu0 %v4821_v15 }
 0x7c4   :  { %4720 = vmatmul.mubr.msk.bf16.vlgmr.msra.gmra.mrb[28].mxu1 %vm665_vm4, %v1143_v43  ;;  %v1421_v63 = vmul.f32 %v5016_v61, %v5000_v26 }
 0x7c5   :  { %4731 = vmatprep.mubr.msk.bf16.mxu1 %vm5376_vm1, %v5375_v13 }
 0x7c6   :  { %v1425_v0 = vpack.c.bf16 %v1421_v63, %v1420_v62 }
 0x7c8   :  { %v1568_v2 = vsel %vm665_vm4, %v1425_v0, 0 }
 0x7c9   :  { %4726 = vmatmul.mubr.msk.bf16.vlgmr.msra.gmra.mrb[28].mxu0 %vm665_vm4, %v1144_v1  ;;  %4730 = vmatpush3.bf16.xpose.msra.mxu1 %v1568_v2 }
 0x7ca   :  { %4736 = vmatpush3.bf16.msra.mxu0 %v4821_v15  ;;  %v1811_v15 = vld [vmem:[#allocation14 + $0x40] sm:$0xff] }
 0x7cb   :  { %4737 = vmatprep.subr.bf16.mxu0 %v4822_v19 }
 0x7ce   :  { %4738 = vmatpush3.bf16.msra.mxu0 %v4822_v19 }
 0x7d0   :  { %4732 = vmatmul.mubr.msk.bf16.vlgmr.msra.gmra.mrb[32].mxu1 %vm665_vm4, %v1145_v44 }
 0x88f   :  { %v1466_v10 = vpop.f32.mrb[24].mxu0 }
 0x890   :  { %v4799_v3 = vpack.i.bf16 %v1466_v10, %v5746_v6  ;;  %v4715_v4 = vpop.f32.mrb[25].mxu0 }
 0x891   :  { %v1469_v7 = vpop.f32.mrb[26].mxu0 }
 0x892   :  { %4800 = vxpose.xlu1.b32.start [1/4] (short) (narrow) %v4799_v3, 16  ;;  %v4716_v13 = vpop.f32.mrb[27].mxu0 }
 0x897   :  { %v1512_v8 = vpop.f32.mrb[28].mxu1 }
 0x898   :  { %v4801_v45 = vpack.i.bf16 %v1512_v8, %v5748_v5  ;;  %v4721_v9 = vpop.f32.mrb[29].mxu1 }
 0x899   :  { %v1515_v12 = vpop.f32.mrb[30].mxu1 }
 0x89a   :  { %v4722_v14 = vpop.f32.mrb[31].mxu1  ;;  %4802 = vxpose.xlu1.b32.cont [2/4] (short) (narrow) %v4801_v45, 16 }
 0x89b   :  { %v1803_v14 = vld [vmem:[#allocation14] sm:$0xff] }
 0x89c   :  { %v1558_v27 = vpop.f32.mrb[28].mxu0 }
 0x89d   :  { %v4803_v47 = vpack.i.bf16 %v1558_v27, %v5750_v11  ;;  %v4727_v17 = vpop.f32.mrb[29].mxu0  ;;  %v1804_v27 = vld [vmem:[#allocation14 + $0x8] sm:$0xff] }
 0x89e   :  { %v1561_v18 = vpop.f32.mrb[30].mxu0  ;;  %v1812_v17 = vld [vmem:[#allocation14 + $0x48] sm:$0xff] }
 0x89f   :  { %4804 = vxpose.xlu1.b32.cont [3/4] (short) (narrow) %v4803_v47, 16  ;;  %v4728_v6 = vpop.f32.mrb[31].mxu0  ;;  %v4181_v47 = vcombine.high %v1803_v14, %v1811_v15  ;;  %v4180_v18 = vcombine.low %v1803_v14, %v1811_v15  ;;  %v4183_v19 = vcombine.high %v1804_v27, %v1812_v17 }
 0x8a0   :  { %v4182_v6 = vcombine.low %v1804_v27, %v1812_v17 }
 0x8a1   :  { %2085 = vmatprep.subr.bf16.mxu1 %v4181_v47  ;;  %2138 = vmatprep.subr.bf16.mxu0 %v4183_v19  ;;  %v1823_v19 = vld [vmem:[#allocation14 + $0xa0] sm:$0xff] }
 0x8a2   :  { %2086 = vmatpush1.bf16.msra.mxu1 %v4180_v18 }
 0x8a3   :  { %v1604_v20 = vpop.f32.mrb[32].mxu1 }
 0x8a4   :  { %v4805_v5 = vpack.i.bf16 %v1604_v20, %v5752_v16  ;;  %v4733_v21 = vpop.f32.mrb[33].mxu1  ;;  %v1819_v20 = vld [vmem:[#allocation14 + $0x80] sm:$0xff] }
 0x8a5   :  { %v1607_v22 = vpop.f32.mrb[34].mxu1  ;;  %v1820_v21 = vld [vmem:[#allocation14 + $0x88] sm:$0xff] }
 0x8a6   :  { %v4734_v23 = vpop.f32.mrb[35].mxu1  ;;  %4806 = vxpose.xlu1.b32.end [4/4] (short) (narrow) %v4805_v5, 16  ;;  %v1827_v5 = vld [vmem:[#allocation14 + $0xc0] sm:$0xff] }
 0x8a7   :  { %v4197_v22 = vcombine.high %v1819_v20, %v1827_v5  ;;  %v1828_v23 = vld [vmem:[#allocation14 + $0xc8] sm:$0xff] }
 0x8a9   :  { %2087 = vmatprep.subr.bf16.mxu1 %v4197_v22 }
 0x91a   :  { %v4807_v24 = vpop.trf.xlu1 }
 0x91b   :  { %v4811_v25 = vunpack.i.h.bf16 %v4807_v24  ;;  %v4808_v26 = vunpack.i.l.bf16 %v4807_v24  ;;  %v4196_v24 = vcombine.low %v1819_v20, %v1827_v5  ;;  %v1831_v20 = vld [vmem:[#allocation14 + $0xe0] sm:$0xff]  ;;  %v1824_v5 = vld [vmem:[#allocation14 + $0xa8] sm:$0xff] }
 0x91d   :  { %2088 = vmatpush1.bf16.msra.mxu1 %v4196_v24  ;;  %v4205_v24 = vcombine.high %v1823_v19, %v1831_v20 }
 0x91e   :  { %v4812_v11 = vpop.trf.xlu1 }
 0x91f   :  { %v4816_v28 = vunpack.i.h.bf16 %v4812_v11  ;;  %v4813_v30 = vunpack.i.l.bf16 %v4812_v11  ;;  %v5377_v11 = vmov 0  }
 0x920   :  { %2117 = vmatprep.mubr.bf16.mxu1 %v5377_v11 }
 0x921   :  { %v1642_v29 = vpack.c.bf16 %v4813_v30, %v4808_v26  ;;  %v1643_v31 = vpack.c.bf16 %v4816_v28, %v4811_v25  ;;  %v4198_v25 = vcombine.low %v1820_v21, %v1828_v23  ;;  %v4199_v26 = vcombine.high %v1820_v21, %v1828_v23  ;;  %v1805_v28 = vld [vmem:[#allocation14 + $0x10] sm:$0xff]  ;;  %v1832_v21 = vld [vmem:[#allocation14 + $0xe8] sm:$0xff] }
 0x922   :  { %v1813_v30 = vld [vmem:[#allocation14 + $0x50] sm:$0xff] }
 0x923   :  { %4739 = vmatprep.mubr.msk.bf16.mxu0 %vm247_vm0, %v1642_v29  ;;  %v1806_v29 = vld [vmem:[#allocation14 + $0x18] sm:$0xff]  ;;  %v4184_v33 = vcombine.low %v1805_v28, %v1813_v30 }
 0x924   :  { %4740 = vmatmul.mubr.msk.bf16.vlgmr.msra.gmra.mrb[32].mxu0 %vm247_vm0, %v1643_v31  ;;  %v4185_v31 = vcombine.high %v1805_v28, %v1813_v30  ;;  %v1817_v28 = vld [vmem:[#allocation14 + $0x70] sm:$0xff]  ;;  %v1810_v30 = vld [vmem:[#allocation14 + $0x38] sm:$0xff] }
 0x925   :  { %2139 = vmatpush1.bf16.msra.mxu0 %v4182_v6  ;;  %2170 = vmatprep.mubr.bf16.mxu0 %v5377_v11 }
 0x926   :  { %2140 = vmatprep.subr.bf16.mxu0 %v4199_v26  ;;  %2191 = vmatprep.subr.bf16.mxu1 %v4185_v31  ;;  %v1809_v26 = vld [vmem:[#allocation14 + $0x30] sm:$0xff]  ;;  %v4204_v31 = vcombine.low %v1823_v19, %v1831_v20  ;;  %v1839_v19 = vlaneseq }
 0x928   :  { %v5890_v20 = vshrl.u32 %v1839_v19, 7 }
 0x929   :  { %2141 = vmatpush1.bf16.msra.mxu0 %v4198_v25  ;;  %v4207_v25 = vcombine.high %v1824_v5, %v1832_v21 }
 0x9f7   :  { %v4741_v16 = vpop.f32.mrb[32].mxu0 }
 0x9f8   :  { %v1707_v35 = vpop.f32.mrb[33].mxu0  ;;  %v1716_v42 = vadd.f32 %v4741_v16, %v4173_v32 }
 0x9f9   :  { %v1708_v38 = vadd.f32 %v4173_v32, %v1707_v35  ;;  %v4742_v39 = vpop.f32.mrb[34].mxu0 }
 0x9fa   :  { %v1710_v36 = vpop.f32.mrb[35].mxu0  ;;  %v1719_v51 = vadd.f32 %v4742_v39, %v4173_v32  ;;  %v1724_v53 = vadd.f32 %v1716_v42, %v212_v50 }
 0x9fb   :  { %v1711_v40 = vadd.f32 %v4173_v32, %v1710_v36  ;;  %v1722_v41 = vadd.f32 %v1708_v38, %v210_v34  ;;  %v1814_v32 = vld [vmem:[#allocation14 + $0x58] sm:$0xff] }
 0x9fc   :  { %v1734_v55 = vsel %vm247_vm0, %v1724_v53, 0.0  ;;  %v1725_v56 = vadd.f32 %v1719_v51, %v213_v54  ;;  %v4186_v34 = vcombine.low %v1806_v29, %v1814_v32  ;;  %v4187_v16 = vcombine.high %v1806_v29, %v1814_v32  ;;  %v1818_v29 = vld [vmem:[#allocation14 + $0x78] sm:$0xff] }
 0x9fd   :  { %v1728_v46 = vsel %vm247_vm0, %v1722_v41, 0.0  ;;  %v1723_v48 = vadd.f32 %v1711_v40, %v211_v37  ;;  %v4206_v32 = vcombine.low %v1824_v5, %v1832_v21  ;;  %v1841_v5 = vsub.s32 0, %v5890_v20 }
 0x9fe   :  { %1729 = vadd.xlane.f32.xlu0 %v1728_v46  ;;  %v1737_v57 = vsel %vm247_vm0, %v1725_v56, 0.0  ;;  %2244 = vmatprep.subr.bf16.mxu0 %v4187_v16  ;;  %v1825_v16 = vld [vmem:[#allocation14 + $0xb0] sm:$0xff]  ;;  %v1849_v21 = vsub.s32 2, %v5890_v20 }
 0x9ff   :  { %v1731_v52 = vsel %vm247_vm0, %v1723_v48, 0.0 }
 0xa02   :  { %1732 = vadd.xlane.f32.xlu0 %v1731_v52 }
 0xa06   :  { %1735 = vadd.xlane.f32.xlu0 %v1734_v55 }
 0xa0a   :  { %1738 = vadd.xlane.f32.xlu0 %v1737_v57  ;;  %v4179_v57 = vld [vmem:[#allocation13] ss:$0 sm:$0xff] }
 0xa8b   :  { %v1730_v58 = vpop.xlane.xlu0 %1729 }
 0xa8c   :  { %v1741_v59 = vmul.f32 0.03125, %v1730_v58 }
 0xa8e   :  { %v5802_v60 = vsub.f32 %v1722_v41, %v1741_v59 }
 0xa8f   :  { %v1733_v43 = vpop.xlane.xlu0 %1732 }
 0xa90   :  { %v1742_v61 = vmul.f32 0.03125, %v1733_v43  ;;  %v1749_v62 = vmul.f32 %v5802_v60, %v5802_v60  ;;  %v1821_v43 = vld [vmem:[#allocation14 + $0x90] sm:$0xff] }
 0xa92   :  { %v5806_v63 = vsub.f32 %v1723_v48, %v1742_v61  ;;  %v1753_v0 = vsel %vm247_vm0, %v1749_v62, 0.0 }
 0xa93   :  { %1754 = vadd.xlane.f32.xlu0 %v1753_v0  ;;  %v1736_v1 = vpop.xlane.xlu0 %1735 }
 0xa94   :  { %v1743_v2 = vmul.f32 0.03125, %v1736_v1  ;;  %v1750_v44 = vmul.f32 %v5806_v63, %v5806_v63  ;;  %v1829_v1 = vld [vmem:[#allocation14 + $0xd0] sm:$0xff] }
 0xa95   :  { %v4200_v15 = vcombine.low %v1821_v43, %v1829_v1 }
 0xa96   :  { %v5811_v10 = vsub.f32 %v1724_v53, %v1743_v2  ;;  %v1756_v3 = vsel %vm247_vm0, %v1750_v44, 0.0  ;;  %v4178_v53 = vld [vmem:[#allocation11] ss:$0 sm:$0xff] }
 0xa97   :  { %1757 = vadd.xlane.f32.xlu0 %v1756_v3  ;;  %v1739_v4 = vpop.xlane.xlu0 %1738  ;;  %v1822_v2 = vld [vmem:[#allocation14 + $0x98] sm:$0xff] }
 0xa98   :  { %v1744_v7 = vmul.f32 0.03125, %v1739_v4  ;;  %v1751_v13 = vmul.f32 %v5811_v10, %v5811_v10  ;;  %v1830_v44 = vld [vmem:[#allocation14 + $0xd8] sm:$0xff]  ;;  %v4201_v4 = vcombine.high %v1821_v43, %v1829_v1  ;;  %v4835_v43 = vld [vmem:[#allocation17 + $0x58] sm:$0xff]  }
 0xa99   :  { %v4202_v27 = vcombine.low %v1822_v2, %v1830_v44  ;;  %v4838_v1 = vld [vmem:[#allocation17 + $0x98] sm:$0xff]  }
 0xa9a   :  { %v5816_v8 = vsub.f32 %v1725_v56, %v1744_v7  ;;  %v1759_v45 = vsel %vm247_vm0, %v1751_v13, 0.0  ;;  %v1807_v7 = vld [vmem:[#allocation14 + $0x20] sm:$0xff] }
 0xa9b   :  { %1760 = vadd.xlane.f32.xlu0 %v1759_v45 }
 0xa9c   :  { %v1752_v9 = vmul.f32 %v5816_v8, %v5816_v8 }
 0xa9e   :  { %v1762_v12 = vsel %vm247_vm0, %v1752_v9, 0.0  ;;  %v1808_v9 = vld [vmem:[#allocation14 + $0x28] sm:$0xff] }
 0xa9f   :  { %1763 = vadd.xlane.f32.xlu0 %v1762_v12  ;;  %v1816_v12 = vld [vmem:[#allocation14 + $0x68] sm:$0xff] }
 0xaa0   :  { %v4191_v47 = vcombine.high %v1808_v9, %v1816_v12  ;;  %v4190_v23 = vcombine.low %v1808_v9, %v1816_v12  ;;  %v4849_v9 = vld [vmem:[#allocation17 + $0x30] sm:$0xff]  }
 0xaa1   :  { %v4850_v12 = vld [vmem:[#allocation17 + $0xb0] sm:$0xff]  }
 0xb20   :  { %v1755_v35 = vpop.xlane.xlu0 %1754 }
 0xb21   :  { %v1765_v37 = vmul.f32 0.03125, %v1755_v35  ;;  %v1833_v35 = vld [vmem:[#allocation14 + $0xf0] sm:$0xff] }
 0xb23   :  { %v1769_v38 = vadd.f32 1e-05, %v1765_v37  ;;  %v1826_v37 = vld [vmem:[#allocation14 + $0xb8] sm:$0xff] }
 0xb24   :  { %v1758_v39 = vpop.xlane.xlu0 %1757 }
 0xb25   :  { %5017 = vrsqrt.f32 %v1769_v38  ;;  %v1766_v36 = vmul.f32 0.03125, %v1758_v39  ;;  %v1834_v38 = vld [vmem:[#allocation14 + $0xf8] sm:$0xff]  ;;  %v4192_v39 = vcombine.low %v1809_v26, %v1817_v28 }
 0xb27   :  { %v1770_v40 = vadd.f32 1e-05, %v1766_v36  ;;  %v4194_v36 = vcombine.low %v1810_v30, %v1818_v29 }
 0xb28   :  { %v1761_v41 = vpop.xlane.xlu0 %1760 }
 0xb29   :  { %5019 = vrsqrt.f32 %v1770_v40  ;;  %v1767_v42 = vmul.f32 0.03125, %v1761_v41  ;;  %v4209_v40 = vcombine.high %v1825_v16, %v1833_v35  ;;  %v4211_v41 = vcombine.high %v1826_v37, %v1834_v38 }
 0xb2b   :  { %v1771_v46 = vadd.f32 1e-05, %v1767_v42  ;;  %v4208_v42 = vcombine.low %v1825_v16, %v1833_v35 }
 0xb2c   :  { %v1764_v48 = vpop.xlane.xlu0 %1763 }
 0xb2d   :  { %5021 = vrsqrt.f32 %v1771_v46  ;;  %v1768_v49 = vmul.f32 0.03125, %v1764_v48  ;;  %v4210_v46 = vcombine.low %v1826_v37, %v1834_v38  ;;  %v4823_v48 = vld [vmem:[#allocation17 + $0x40] sm:$0xff]  }
 0xb2f   :  { %v5018_v50 = vpop.eup %5017  ;;  %v1772_v51 = vadd.f32 1e-05, %v1768_v49  ;;  %v4824_v49 = vld [vmem:[#allocation17 + $0xc0] sm:$0xff]  }
 0xb30   :  { %v1777_v52 = vmul.f32 %v5018_v50, %v5802_v60  ;;  %v4825_v50 = vld [vmem:[#allocation17] sm:$0xff]  }
 0xb31   :  { %5023 = vrsqrt.f32 %v1772_v51  ;;  %v4826_v51 = vld [vmem:[#allocation17 + $0x80] sm:$0xff]  }
 0xb32   :  { %v1787_v55 = vmul.f32 %v4178_v53, %v1777_v52  ;;  %v4827_v52 = vld [vmem:[#allocation17 + $0x48] sm:$0xff]  }
 0xb33   :  { %v5020_v54 = vpop.eup %5019 }
 0xb34   :  { %v1778_v56 = vmul.f32 %v5020_v54, %v5806_v63  ;;  %v5826_v61 = vadd.f32 %v4179_v57, %v1787_v55  ;;  %v4203_v63 = vcombine.high %v1822_v2, %v1830_v44  ;;  %v4829_v54 = vld [vmem:[#allocation17 + $0x8] sm:$0xff]   ;;  %v4839_v2 = vld [vmem:[#allocation17 + $0x60] sm:$0xff]  }
 0xb35   :  { %v4830_v55 = vld [vmem:[#allocation17 + $0x88] sm:$0xff]   ;;  %v4840_v44 = vld [vmem:[#allocation17 + $0xe0] sm:$0xff]  }
 0xb36   :  { %v1788_v58 = vmul.f32 %v4178_v53, %v1778_v56  ;;  %v4831_v56 = vld [vmem:[#allocation17 + $0x50] sm:$0xff]  }
 0xb37   :  { %v5022_v59 = vpop.eup %5021 }
 0xb38   :  { %v5828_v62 = vadd.f32 %v4179_v57, %v1788_v58  ;;  %v1779_v0 = vmul.f32 %v5022_v59, %v5811_v10  ;;  %v1815_v10 = vld [vmem:[#allocation14 + $0x60] sm:$0xff] }
 0xb39   :  { %v4188_v22 = vcombine.low %v1807_v7, %v1815_v10  ;;  %v4833_v58 = vld [vmem:[#allocation17 + $0x10] sm:$0xff]  }
 0xb3a   :  { %v5833_v60 = vpack.c.bf16 %v5828_v62, %v5826_v61  ;;  %v1789_v13 = vmul.f32 %v4178_v53, %v1779_v0  ;;  %v4834_v59 = vld [vmem:[#allocation17 + $0x90] sm:$0xff]   ;;  %v4836_v0 = vld [vmem:[#allocation17 + $0xd8] sm:$0xff]  }
 0xb3b   :  { %v5024_v3 = vpop.eup %5023 }
 0xb3c   :  { %v1780_v45 = vmul.f32 %v5024_v3, %v5816_v8  ;;  %4212 = vmatmul.mubr.msk.bf16.vlgmr.msra.gmra.mrb[36].mxu1 %vm247_vm0, %v5833_v60  ;;  %4214 = vmatmul.mubr.msk.bf16.vlgmr.msra.gmra.mrb[36].mxu0 %vm247_vm0, %v5833_v60  ;;  %v4189_v8 = vcombine.high %v1807_v7, %v1815_v10  ;;  %v5842_v17 = vadd.f32 %v4179_v57, %v1789_v13  ;;  %v4842_v3 = vld [vmem:[#allocation17 + $0xa0] sm:$0xff]   ;;  %v4845_v7 = vld [vmem:[#allocation17 + $0x28] sm:$0xff]   ;;  %v4848_v10 = vld [vmem:[#allocation17 + $0xf0] sm:$0xff]  }
 0xb3d   :  { %2127 = vmatprep.mubr.bf16.mxu1 %v5377_v11  ;;  %2180 = vmatprep.mubr.bf16.mxu0 %v5377_v11  ;;  %v4846_v13 = vld [vmem:[#allocation17 + $0xa8] sm:$0xff]  }
 0xb3e   :  { %v1790_v14 = vmul.f32 %v4178_v53, %v1780_v45  ;;  %2192 = vmatpush1.bf16.msra.mxu1 %v4184_v33  ;;  %2245 = vmatpush1.bf16.msra.mxu0 %v4186_v34  ;;  %v4193_v33 = vcombine.high %v1809_v26, %v1817_v28  ;;  %v4195_v34 = vcombine.high %v1810_v30, %v1818_v29  ;;  %v4828_v53 = vld [vmem:[#allocation17 + $0xc8] sm:$0xff]   ;;  %v4847_v45 = vld [vmem:[#allocation17 + $0x70] sm:$0xff]  }
 0xb3f   :  { %2193 = vmatprep.subr.bf16.mxu1 %v4201_v4  ;;  %2246 = vmatprep.subr.bf16.mxu0 %v4203_v63  ;;  %v4843_v4 = vld [vmem:[#allocation17 + $0x68] sm:$0xff]  }
 0xb40   :  { %v5844_v18 = vadd.f32 %v4179_v57, %v1790_v14  ;;  %v4832_v57 = vld [vmem:[#allocation17 + $0xd0] sm:$0xff]   ;;  %v4844_v63 = vld [vmem:[#allocation17 + $0xe8] sm:$0xff]   ;;  %v4851_v14 = vld [vmem:[#allocation17 + $0x78] sm:$0xff]  }
 0xb42   :  { %v5848_v6 = vpack.c.bf16 %v5844_v18, %v5842_v17  ;;  %2194 = vmatpush1.bf16.msra.mxu1 %v4200_v15  ;;  %2247 = vmatpush1.bf16.msra.mxu0 %v4202_v27  ;;  %v4852_v15 = vld [vmem:[#allocation17 + $0xf8] sm:$0xff]  }
 0xb43   :  { %2297 = vmatprep.subr.bf16.mxu1 %v4189_v8  ;;  %2350 = vmatprep.subr.bf16.mxu0 %v4191_v47  ;;  %v4853_v27 = vld [vmem:[#allocation17 + $0x38] sm:$0xff]   ;;  %v4855_v47 = vld [vmem:[#allocation17 + $0x140] sm:$0xff]  }
 0xb44   :  { %4213 = vmatmul.mubr.msk.bf16.gmra.mrb[40].mxu1 %vm247_vm0, %v5848_v6  ;;  %4215 = vmatmul.mubr.msk.bf16.gmra.mrb[40].mxu0 %vm247_vm0, %v5848_v6  ;;  %v4854_v8 = vld [vmem:[#allocation17 + $0xb8] sm:$0xff]  }
 0xb45   :  { %2223 = vmatprep.mubr.bf16.mxu1 %v5377_v11  ;;  %2276 = vmatprep.mubr.bf16.mxu0 %v5377_v11 }
 0xb4c   :  { %4216 = vmatmul.mubr.msk.bf16.vlgmr.msra.gmra.mrb[44].mxu1 %vm247_vm0, %v5833_v60  ;;  %4218 = vmatmul.mubr.msk.bf16.vlgmr.msra.gmra.mrb[44].mxu0 %vm247_vm0, %v5833_v60 }
 0xb4d   :  { %2233 = vmatprep.mubr.bf16.mxu1 %v5377_v11  ;;  %2286 = vmatprep.mubr.bf16.mxu0 %v5377_v11 }
 0xb4e   :  { %2298 = vmatpush1.bf16.msra.mxu1 %v4188_v22  ;;  %2351 = vmatpush1.bf16.msra.mxu0 %v4190_v23  ;;  %v5894_v22 = vld [vmem:[#allocation16] sm:$0xff]  ;;  %v1845_v23 = vsub.s32 1, %v5890_v20 }
 0xb4f   :  { %2299 = vmatprep.subr.bf16.mxu1 %v4205_v24  ;;  %2352 = vmatprep.subr.bf16.mxu0 %v4207_v25  ;;  %v1853_v24 = vsub.s32 3, %v5890_v20  ;;  %v1842_v25 = vrot.slane %v5894_v22, %v1841_v5  ;;  %v1850_v26 = vrot.slane %v5894_v22, %v1849_v21 }
 0xb50   :  { %v1846_v28 = vrot.slane %v5894_v22, %v1845_v23 }
 0xb51   :  { %v1854_v30 = vrot.slane %v5894_v22, %v1853_v24 }
 0xb52   :  { %2300 = vmatpush1.bf16.msra.mxu1 %v4204_v31  ;;  %2353 = vmatpush1.bf16.msra.mxu0 %v4206_v32 }
 0xb53   :  { %2403 = vmatprep.subr.bf16.mxu1 %v4193_v33  ;;  %2456 = vmatprep.subr.bf16.mxu0 %v4195_v34 }
 0xb54   :  { %4217 = vmatmul.mubr.msk.bf16.gmra.mrb[48].mxu1 %vm247_vm0, %v5848_v6  ;;  %4219 = vmatmul.mubr.msk.bf16.gmra.mrb[48].mxu0 %vm247_vm0, %v5848_v6 }
 0xb55   :  { %2329 = vmatprep.mubr.bf16.mxu1 %v5377_v11  ;;  %2382 = vmatprep.mubr.bf16.mxu0 %v5377_v11 }
 0xb5c   :  { %4220 = vmatmul.mubr.msk.bf16.vlgmr.msra.gmra.mrb[52].mxu1 %vm247_vm0, %v5833_v60  ;;  %4222 = vmatmul.mubr.msk.bf16.vlgmr.msra.gmra.mrb[52].mxu0 %vm247_vm0, %v5833_v60 }
 0xb5d   :  { %2339 = vmatprep.mubr.bf16.mxu1 %v5377_v11  ;;  %2392 = vmatprep.mubr.bf16.mxu0 %v5377_v11 }
 0xb5e   :  { %2404 = vmatpush1.bf16.msra.mxu1 %v4192_v39  ;;  %2457 = vmatpush1.bf16.msra.mxu0 %v4194_v36 }
 0xb5f   :  { %2405 = vmatprep.subr.bf16.mxu1 %v4209_v40  ;;  %2458 = vmatprep.subr.bf16.mxu0 %v4211_v41 }
 0xb62   :  { %2406 = vmatpush1.bf16.msra.mxu1 %v4208_v42  ;;  %2459 = vmatpush1.bf16.msra.mxu0 %v4210_v46 }
 0xb63   :  { %4407 = vmatprep.subr.bf16.mxu1 %v4823_v48  ;;  %4435 = vmatprep.subr.bf16.mxu0 %v4824_v49  ;;  %v1857_v49 = vsub.s32 4, %v5890_v20 }
 0xb64   :  { %4221 = vmatmul.mubr.msk.bf16.gmra.mrb[56].mxu1 %vm247_vm0, %v5848_v6  ;;  %4223 = vmatmul.mubr.msk.bf16.gmra.mrb[56].mxu0 %vm247_vm0, %v5848_v6 }
 0xb65   :  { %2435 = vmatprep.mubr.bf16.mxu1 %v5377_v11  ;;  %2488 = vmatprep.mubr.bf16.mxu0 %v5377_v11 }
 0xb6c   :  { %4224 = vmatmul.mubr.msk.bf16.vlgmr.msra.gmra.mrb[60].mxu1 %vm247_vm0, %v5833_v60  ;;  %4226 = vmatmul.mubr.msk.bf16.vlgmr.msra.gmra.mrb[60].mxu0 %vm247_vm0, %v5833_v60  ;;  %v4841_v60 = vld [vmem:[#allocation17 + $0x20] sm:$0xff]  }
 0xb6d   :  { %2445 = vmatprep.mubr.bf16.mxu1 %v5377_v11  ;;  %2498 = vmatprep.mubr.bf16.mxu0 %v5377_v11  ;;  %v4837_v11 = vld [vmem:[#allocation17 + $0x18] sm:$0xff]  }
 0xb6e   :  { %4408 = vmatpush3.bf16.msra.mxu1 %v4825_v50  ;;  %4436 = vmatpush3.bf16.msra.mxu0 %v4826_v51  ;;  %v1865_v50 = vsub.s32 6, %v5890_v20 }
 0xb6f   :  { %4409 = vmatprep.subr.bf16.mxu1 %v4827_v52  ;;  %4437 = vmatprep.subr.bf16.mxu0 %v4828_v53 }
 0xb72   :  { %4410 = vmatpush3.bf16.msra.mxu1 %v4829_v54  ;;  %4438 = vmatpush3.bf16.msra.mxu0 %v4830_v55 }
 0xb73   :  { %4411 = vmatprep.subr.bf16.mxu1 %v4831_v56  ;;  %4439 = vmatprep.subr.bf16.mxu0 %v4832_v57 }
 0xb74   :  { %4225 = vmatmul.mubr.msk.bf16.gmra.mrb[64].mxu1 %vm247_vm0, %v5848_v6  ;;  %4227 = vmatmul.mubr.msk.bf16.gmra.mrb[64].mxu0 %vm247_vm0, %v5848_v6  ;;  %v4856_v6 = vld [vmem:[#allocation17 + $0x1c0] sm:$0xff]  }
 0xb76   :  { %4412 = vmatpush3.bf16.msra.mxu1 %v4833_v58  ;;  %4440 = vmatpush3.bf16.msra.mxu0 %v4834_v59 }
 0xb77   :  { %4413 = vmatprep.subr.bf16.mxu1 %v4835_v43  ;;  %4441 = vmatprep.subr.bf16.mxu0 %v4836_v0  ;;  %v1861_v0 = vsub.s32 5, %v5890_v20 }
 0xb7a   :  { %4414 = vmatpush3.bf16.msra.mxu1 %v4837_v11  ;;  %4442 = vmatpush3.bf16.msra.mxu0 %v4838_v1 }
 0xb7b   :  { %4415 = vmatprep.subr.bf16.mxu1 %v4839_v2  ;;  %4443 = vmatprep.subr.bf16.mxu0 %v4840_v44 }
 0xb7e   :  { %4416 = vmatpush3.bf16.msra.mxu1 %v4841_v60  ;;  %4444 = vmatpush3.bf16.msra.mxu0 %v4842_v3  ;;  %v4857_v60 = vld [vmem:[#allocation17 + $0x100] sm:$0xff]  }
 0xb7f   :  { %4417 = vmatprep.subr.bf16.mxu1 %v4843_v4  ;;  %4445 = vmatprep.subr.bf16.mxu0 %v4844_v63  ;;  %v4858_v3 = vld [vmem:[#allocation17 + $0x180] sm:$0xff]   ;;  %v1869_v4 = vsub.s32 7, %v5890_v20 }
 0xb82   :  { %4418 = vmatpush3.bf16.msra.mxu1 %v4845_v7  ;;  %4446 = vmatpush3.bf16.msra.mxu0 %v4846_v13 }
 0xb83   :  { %4419 = vmatprep.subr.bf16.mxu1 %v4847_v45  ;;  %4447 = vmatprep.subr.bf16.mxu0 %v4848_v10  ;;  %v4859_v10 = vld [vmem:[#allocation17 + $0x148] sm:$0xff]  }
 0xb86   :  { %4420 = vmatpush3.bf16.msra.mxu1 %v4849_v9  ;;  %4448 = vmatpush3.bf16.msra.mxu0 %v4850_v12  ;;  %v4860_v9 = vld [vmem:[#allocation17 + $0x1c8] sm:$0xff]   ;;  %v5917_v12 = vrot.slane %v5894_v22, %v1857_v49 }
 0xb87   :  { %4421 = vmatprep.subr.bf16.mxu1 %v4851_v14  ;;  %4449 = vmatprep.subr.bf16.mxu0 %v4852_v15 }
 0xb8a   :  { %4422 = vmatpush3.bf16.msra.mxu1 %v4853_v27  ;;  %4450 = vmatpush3.bf16.msra.mxu0 %v4854_v8 }
 0xb8b   :  { %4463 = vmatprep.subr.bf16.mxu1 %v4855_v47  ;;  %4491 = vmatprep.subr.bf16.mxu0 %v4856_v6  ;;  %v5922_v47 = vrot.slane %v5894_v22, %v1865_v50 }
 0xc0f   :  { %v2119_v29 = vpop.f32.mrb[36].mxu1  ;;  %v2172_v31 = vpop.f32.mrb[36].mxu0 }
 0xc10   :  { %v2120_v32 = vadd.f32 %v2119_v29, %v1842_v25  ;;  %v2173_v33 = vadd.f32 %v2172_v31, %v1850_v26  ;;  %v2121_v34 = vpop.f32.mrb[37].mxu1  ;;  %v2174_v16 = vpop.f32.mrb[37].mxu0 }
 0xc11   :  { %v2122_v35 = vadd.f32 %v2121_v34, %v1846_v28  ;;  %v2175_v37 = vadd.f32 %v2174_v16, %v1854_v30  ;;  %v2123_v38 = vpop.f32.mrb[38].mxu1  ;;  %v2176_v39 = vpop.f32.mrb[38].mxu0  ;;  %v4861_v16 = vld [vmem:[#allocation17 + $0x108] sm:$0xff]  }
 0xc12   :  { %v2124_v36 = vadd.f32 %v2123_v38, %v1842_v25  ;;  %v2177_v40 = vadd.f32 %v2176_v39, %v1850_v26  ;;  %v2125_v41 = vpop.f32.mrb[39].mxu1  ;;  %v2178_v42 = vpop.f32.mrb[39].mxu0  ;;  %v2509_v51 = vmax.f32 %v2120_v32, 0.0  ;;  %v2511_v52 = vmax.f32 %v2173_v33, 0.0 }
 0xc13   :  { %v2126_v46 = vadd.f32 %v2125_v41, %v1846_v28  ;;  %v2179_v48 = vadd.f32 %v2178_v42, %v1854_v30  ;;  %v2510_v55 = vmax.f32 %v2122_v35, 0.0  ;;  %v2512_v56 = vmax.f32 %v2175_v37, 0.0  ;;  %v4862_v35 = vld [vmem:[#allocation17 + $0x188] sm:$0xff]  }
 0xc14   :  { %v2525_v53 = vmax.f32 %v2124_v36, 0.0  ;;  %v2527_v54 = vmax.f32 %v2177_v40, 0.0  ;;  %v5927_v32 = vrot.slane %v5894_v22, %v1861_v0  ;;  %v4863_v36 = vld [vmem:[#allocation17 + $0x150] sm:$0xff]  }
 0xc15   :  { %v2526_v57 = vmax.f32 %v2126_v46, 0.0  ;;  %v2528_v58 = vmax.f32 %v2179_v48, 0.0  ;;  %v4864_v40 = vld [vmem:[#allocation17 + $0x1d0] sm:$0xff]  }
 0xc16   :  { %v2573_v59 = vpack.c.bf16 %v2525_v53, %v2509_v51  ;;  %v2575_v43 = vpack.c.bf16 %v2527_v54, %v2511_v52  ;;  %v4865_v54 = vld [vmem:[#allocation17 + $0x110] sm:$0xff]  }
 0xc17   :  { %v2574_v11 = vpack.c.bf16 %v2526_v57, %v2510_v55  ;;  %v2576_v1 = vpack.c.bf16 %v2528_v58, %v2512_v56  ;;  %v2129_v2 = vpop.f32.mrb[40].mxu1  ;;  %v2182_v44 = vpop.f32.mrb[40].mxu0  ;;  %v4866_v55 = vld [vmem:[#allocation17 + $0x190] sm:$0xff]  }
 0xc18   :  { %v2130_v63 = vadd.f32 %v2129_v2, %v1842_v25  ;;  %v2183_v7 = vadd.f32 %v2182_v44, %v1850_v26  ;;  %v2131_v13 = vpop.f32.mrb[41].mxu1  ;;  %v2184_v45 = vpop.f32.mrb[41].mxu0 }
 0xc19   :  { %v2132_v14 = vadd.f32 %v2131_v13, %v1846_v28  ;;  %v2185_v15 = vadd.f32 %v2184_v45, %v1854_v30  ;;  %v2133_v27 = vpop.f32.mrb[42].mxu1  ;;  %v2186_v8 = vpop.f32.mrb[42].mxu0  ;;  %3668 = vmatprep.mubr.bf16.mxu1 %v2574_v11  ;;  %3717 = vmatprep.mubr.bf16.mxu0 %v2576_v1  ;;  %v4868_v11 = vld [vmem:[#allocation17 + $0x1d8] sm:$0xff]  }
 0xc1a   :  { %v2134_v6 = vadd.f32 %v2133_v27, %v1842_v25  ;;  %v2187_v19 = vadd.f32 %v2186_v8, %v1850_v26  ;;  %v2135_v29 = vpop.f32.mrb[43].mxu1  ;;  %v2188_v31 = vpop.f32.mrb[43].mxu0  ;;  %3669 = vmatmul.mubr.bf16.vlgmr.msra.gmra.mrb[68].mxu1 %v2573_v59  ;;  %3718 = vmatmul.mubr.bf16.vlgmr.msra.gmra.mrb[68].mxu0 %v2575_v43  ;;  %v5932_v25 = vrot.slane %v5894_v22, %v1869_v4  ;;  %v2541_v26 = vmax.f32 %v2130_v63, 0.0  ;;  %v4867_v43 = vld [vmem:[#allocation17 + $0x158] sm:$0xff]  }
 0xc1b   :  { %v2136_v33 = vadd.f32 %v2135_v29, %v1846_v28  ;;  %v2189_v34 = vadd.f32 %v2188_v31, %v1854_v30  ;;  %4464 = vmatpush3.bf16.msra.mxu1 %v4857_v60  ;;  %4492 = vmatpush3.bf16.msra.mxu0 %v4858_v3  ;;  %v2543_v37 = vmax.f32 %v2183_v7, 0.0  ;;  %v2542_v41 = vmax.f32 %v2132_v14, 0.0  ;;  %v4870_v14 = vld [vmem:[#allocation17 + $0x198] sm:$0xff]   ;;  %v4872_v29 = vld [vmem:[#allocation17 + $0x1e0] sm:$0xff]  }
 0xc1c   :  { %v2557_v38 = vmax.f32 %v2134_v6, 0.0  ;;  %v2559_v39 = vmax.f32 %v2187_v19, 0.0  ;;  %4465 = vmatprep.subr.bf16.mxu1 %v4859_v10  ;;  %4493 = vmatprep.subr.bf16.mxu0 %v4860_v9  ;;  %v2544_v28 = vmax.f32 %v2185_v15, 0.0  ;;  %v4869_v9 = vld [vmem:[#allocation17 + $0x118] sm:$0xff]   ;;  %v4871_v19 = vld [vmem:[#allocation17 + $0x160] sm:$0xff]  }
 0xc1d   :  { %v2558_v30 = vmax.f32 %v2136_v33, 0.0  ;;  %v2560_v42 = vmax.f32 %v2189_v34, 0.0 }
 0xc1e   :  { %v2589_v46 = vpack.c.bf16 %v2557_v38, %v2541_v26  ;;  %v2591_v48 = vpack.c.bf16 %v2559_v39, %v2543_v37  ;;  %v5946_v37 = vld [vmem:[#allocation16 + $0x8] sm:$0xff] }
 0xc1f   :  { %v2590_v51 = vpack.c.bf16 %v2558_v30, %v2542_v41  ;;  %v2592_v52 = vpack.c.bf16 %v2560_v42, %v2544_v28  ;;  %4466 = vmatpush3.bf16.msra.mxu1 %v4861_v16  ;;  %4494 = vmatpush3.bf16.msra.mxu0 %v4862_v35  ;;  %v2225_v22 = vpop.f32.mrb[44].mxu1  ;;  %v2278_v53 = vpop.f32.mrb[44].mxu0  ;;  %v4873_v41 = vld [vmem:[#allocation17 + $0x120] sm:$0xff]  }
 0xc20   :  { %v2226_v56 = vadd.f32 %v2225_v22, %v5917_v12  ;;  %v2279_v57 = vadd.f32 %v2278_v53, %v5922_v47  ;;  %v2227_v58 = vpop.f32.mrb[45].mxu1  ;;  %v2280_v59 = vpop.f32.mrb[45].mxu0  ;;  %4467 = vmatprep.subr.bf16.mxu1 %v4863_v36  ;;  %4495 = vmatprep.subr.bf16.mxu0 %v4864_v40  ;;  %v4874_v28 = vld [vmem:[#allocation17 + $0x1a0] sm:$0xff]  }
 0xc21   :  { %v2228_v1 = vadd.f32 %v2227_v58, %v5927_v32  ;;  %v2281_v2 = vadd.f32 %v2280_v59, %v5932_v25  ;;  %v2229_v44 = vpop.f32.mrb[46].mxu1  ;;  %v2282_v60 = vpop.f32.mrb[46].mxu0  ;;  %3676 = vmatprep.mubr.bf16.mxu1 %v2590_v51  ;;  %3725 = vmatprep.mubr.bf16.mxu0 %v2592_v52  ;;  %v4875_v51 = vld [vmem:[#allocation17 + $0x168] sm:$0xff]  }
 0xc22   :  { %v2230_v3 = vadd.f32 %v2229_v44, %v5917_v12  ;;  %v2283_v63 = vadd.f32 %v2282_v60, %v5922_v47  ;;  %v2231_v7 = vpop.f32.mrb[47].mxu1  ;;  %v2284_v13 = vpop.f32.mrb[47].mxu0  ;;  %3677 = vmatmul.mubr.bf16.gmra.mrb[72].mxu1 %v2589_v46  ;;  %3726 = vmatmul.mubr.bf16.gmra.mrb[72].mxu0 %v2591_v48  ;;  %v2513_v15 = vmax.f32 %v2226_v56, 0.0  ;;  %v2515_v27 = vmax.f32 %v2279_v57, 0.0  ;;  %v4876_v52 = vld [vmem:[#allocation17 + $0x1e8] sm:$0xff]  }
 0xc23   :  { %v2232_v45 = vadd.f32 %v2231_v7, %v5927_v32  ;;  %v2285_v10 = vadd.f32 %v2284_v13, %v5932_v25  ;;  %4468 = vmatpush3.bf16.msra.mxu1 %v4865_v54  ;;  %4496 = vmatpush3.bf16.msra.mxu0 %v4866_v55  ;;  %v2514_v31 = vmax.f32 %v2228_v1, 0.0  ;;  %v2516_v33 = vmax.f32 %v2281_v2, 0.0  ;;  %v4880_v7 = vld [vmem:[#allocation17 + $0x1f0] sm:$0xff]  }
 0xc24   :  { %v2529_v8 = vmax.f32 %v2230_v3, 0.0  ;;  %v2531_v6 = vmax.f32 %v2283_v63, 0.0  ;;  %4469 = vmatprep.subr.bf16.mxu1 %v4867_v43  ;;  %4497 = vmatprep.subr.bf16.mxu0 %v4868_v11  ;;  %v5955_v56 = vrot.slane %v5946_v37, %v1841_v5  ;;  %v5962_v11 = vrot.slane %v5946_v37, %v1849_v21 }
 0xc25   :  { %v2530_v34 = vmax.f32 %v2232_v45, 0.0  ;;  %v2532_v16 = vmax.f32 %v2285_v10, 0.0  ;;  %v5967_v1 = vrot.slane %v5946_v37, %v1845_v23  ;;  %v5974_v44 = vrot.slane %v5946_v37, %v1853_v24  ;;  %v4879_v23 = vld [vmem:[#allocation17 + $0x170] sm:$0xff]  }
 0xc26   :  { %v5942_v35 = vpack.c.bf16 %v2529_v8, %v2513_v15  ;;  %v5944_v26 = vpack.c.bf16 %v2531_v6, %v2515_v27  ;;  %v4881_v8 = vld [vmem:[#allocation17 + $0x130] sm:$0xff]  }
 0xc27   :  { %v2578_v38 = vpack.c.bf16 %v2530_v34, %v2514_v31  ;;  %v2580_v39 = vpack.c.bf16 %v2532_v16, %v2516_v33  ;;  %4470 = vmatpush3.bf16.msra.mxu1 %v4869_v9  ;;  %4498 = vmatpush3.bf16.msra.mxu0 %v4870_v14  ;;  %v2235_v36 = vpop.f32.mrb[48].mxu1  ;;  %v2288_v40 = vpop.f32.mrb[48].mxu0  ;;  %v4882_v6 = vld [vmem:[#allocation17 + $0x1b0] sm:$0xff]   ;;  %v4883_v34 = vld [vmem:[#allocation17 + $0x178] sm:$0xff]  }
 0xc28   :  { %v2236_v30 = vadd.f32 %v2235_v36, %v5917_v12  ;;  %v2289_v42 = vadd.f32 %v2288_v40, %v5922_v47  ;;  %v2237_v46 = vpop.f32.mrb[49].mxu1  ;;  %v2290_v48 = vpop.f32.mrb[49].mxu0  ;;  %4471 = vmatprep.subr.bf16.mxu1 %v4871_v19  ;;  %4499 = vmatprep.subr.bf16.mxu0 %v4872_v29  ;;  %v4884_v16 = vld [vmem:[#allocation17 + $0x1f8] sm:$0xff]  }
 0xc29   :  { %v2238_v22 = vadd.f32 %v2237_v46, %v5927_v32  ;;  %v2291_v53 = vadd.f32 %v2290_v48, %v5932_v25  ;;  %v2239_v54 = vpop.f32.mrb[50].mxu1  ;;  %v2292_v55 = vpop.f32.mrb[50].mxu0  ;;  %3766 = vmatprep.mubr.bf16.mxu1 %v2578_v38  ;;  %3815 = vmatprep.mubr.bf16.mxu0 %v2580_v39 }
 0xc2a   :  { %v2240_v57 = vadd.f32 %v2239_v54, %v5917_v12  ;;  %v2293_v58 = vadd.f32 %v2292_v55, %v5922_v47  ;;  %v2241_v59 = vpop.f32.mrb[51].mxu1  ;;  %v2294_v43 = vpop.f32.mrb[51].mxu0  ;;  %v4877_v12 = vld [vmem:[#allocation17 + $0x128] sm:$0xff]   ;;  %v2545_v21 = vmax.f32 %v2236_v30, 0.0  ;;  %v2547_v60 = vmax.f32 %v2289_v42, 0.0 }
 0xc2b   :  { %v2242_v2 = vadd.f32 %v2241_v59, %v5927_v32  ;;  %v2295_v5 = vadd.f32 %v2294_v43, %v5932_v25  ;;  %4472 = vmatpush3.bf16.msra.mxu1 %v4873_v41  ;;  %4500 = vmatpush3.bf16.msra.mxu0 %v4874_v28  ;;  %v4878_v47 = vld [vmem:[#allocation17 + $0x1a8] sm:$0xff]   ;;  %v2546_v32 = vmax.f32 %v2238_v22, 0.0  ;;  %v2548_v13 = vmax.f32 %v2291_v53, 0.0 }
 0xc2c   :  { %v2561_v3 = vmax.f32 %v2240_v57, 0.0  ;;  %v2563_v63 = vmax.f32 %v2293_v58, 0.0  ;;  %4473 = vmatprep.subr.bf16.mxu1 %v4875_v51  ;;  %4501 = vmatprep.subr.bf16.mxu0 %v4876_v52  ;;  %v4885_v51 = vld [vmem:[#allocation17 + $0x138] sm:$0xff]   ;;  %v4887_v57 = vld [vmem:[#allocation17 + $0x240] sm:$0xff]  }
 0xc2d   :  { %v2562_v25 = vmax.f32 %v2242_v2, 0.0  ;;  %v2564_v45 = vmax.f32 %v2295_v5, 0.0  ;;  %v4886_v52 = vld [vmem:[#allocation17 + $0x1b8] sm:$0xff]   ;;  %v4888_v58 = vld [vmem:[#allocation17 + $0x2c0] sm:$0xff]  }
 0xc2e   :  { %v5976_v10 = vpack.c.bf16 %v2561_v3, %v2545_v21  ;;  %v5978_v9 = vpack.c.bf16 %v2563_v63, %v2547_v60 }
 0xc2f   :  { %v5980_v14 = vpack.c.bf16 %v2562_v25, %v2546_v32  ;;  %v5982_v24 = vpack.c.bf16 %v2564_v45, %v2548_v13  ;;  %4474 = vmatpush3.bf16.msra.mxu1 %v4877_v12  ;;  %4502 = vmatpush3.bf16.msra.mxu0 %v4878_v47  ;;  %v2331_v15 = vpop.f32.mrb[52].mxu1  ;;  %v2384_v27 = vpop.f32.mrb[52].mxu0  ;;  %v4889_v25 = vld [vmem:[#allocation17 + $0x200] sm:$0xff]  }
 0xc30   :  { %v2332_v19 = vadd.f32 %v2331_v15, %v5955_v56  ;;  %v2385_v29 = vadd.f32 %v2384_v27, %v5962_v11  ;;  %v2333_v31 = vpop.f32.mrb[53].mxu1  ;;  %v2386_v33 = vpop.f32.mrb[53].mxu0  ;;  %4475 = vmatprep.subr.bf16.mxu1 %v4879_v23  ;;  %4503 = vmatprep.subr.bf16.mxu0 %v4880_v7  ;;  %v4890_v45 = vld [vmem:[#allocation17 + $0x280] sm:$0xff]  }
 0xc31   :  { %v2334_v38 = vadd.f32 %v2333_v31, %v5967_v1  ;;  %v2387_v39 = vadd.f32 %v2386_v33, %v5974_v44  ;;  %v2335_v36 = vpop.f32.mrb[54].mxu1  ;;  %v2388_v40 = vpop.f32.mrb[54].mxu0  ;;  %v6007_v31 = vrot.slane %v5946_v37, %v1857_v49  ;;  %v6012_v33 = vrot.slane %v5946_v37, %v1865_v50 }
 0xc32   :  { %v2336_v41 = vadd.f32 %v2335_v36, %v5955_v56  ;;  %v2389_v28 = vadd.f32 %v2388_v40, %v5962_v11  ;;  %v2337_v30 = vpop.f32.mrb[55].mxu1  ;;  %v2390_v42 = vpop.f32.mrb[55].mxu0  ;;  %v2517_v22 = vmax.f32 %v2332_v19, 0.0  ;;  %v2519_v53 = vmax.f32 %v2385_v29, 0.0  ;;  %v4891_v19 = vld [vmem:[#allocation17 + $0x248] sm:$0xff]  }
 0xc33   :  { %v2338_v46 = vadd.f32 %v2337_v30, %v5967_v1  ;;  %v2391_v48 = vadd.f32 %v2390_v42, %v5974_v44  ;;  %4476 = vmatpush3.bf16.msra.mxu1 %v4881_v8  ;;  %4504 = vmatpush3.bf16.msra.mxu0 %v4882_v6  ;;  %v2518_v59 = vmax.f32 %v2334_v38, 0.0  ;;  %v2520_v43 = vmax.f32 %v2387_v39, 0.0  ;;  %v4892_v29 = vld [vmem:[#allocation17 + $0x2c8] sm:$0xff]  }
 0xc34   :  { %v2533_v54 = vmax.f32 %v2336_v41, 0.0  ;;  %v2535_v55 = vmax.f32 %v2389_v28, 0.0  ;;  %4477 = vmatprep.subr.bf16.mxu1 %v4883_v34  ;;  %4505 = vmatprep.subr.bf16.mxu0 %v4884_v16  ;;  %v6021_v49 = vrot.slane %v5946_v37, %v1861_v0  ;;  %v4893_v0 = vld [vmem:[#allocation17 + $0x208] sm:$0xff]  }
 0xc35   :  { %v2534_v2 = vmax.f32 %v2338_v46, 0.0  ;;  %v2536_v5 = vmax.f32 %v2391_v48, 0.0  ;;  %v4894_v41 = vld [vmem:[#allocation17 + $0x288] sm:$0xff]  }
 0xc36   :  { %v5992_v12 = vpack.c.bf16 %v2533_v54, %v2517_v22  ;;  %v5994_v47 = vpack.c.bf16 %v2535_v55, %v2519_v53  ;;  %v4897_v54 = vld [vmem:[#allocation17 + $0x210] sm:$0xff]  }
 0xc37   :  { %v5996_v21 = vpack.c.bf16 %v2534_v2, %v2518_v59  ;;  %v5998_v60 = vpack.c.bf16 %v2536_v5, %v2520_v43  ;;  %4478 = vmatpush3.bf16.msra.mxu1 %v4885_v51  ;;  %4506 = vmatpush3.bf16.msra.mxu0 %v4886_v52  ;;  %v2341_v3 = vpop.f32.mrb[56].mxu1  ;;  %v2394_v63 = vpop.f32.mrb[56].mxu0  ;;  %v4898_v55 = vld [vmem:[#allocation17 + $0x290] sm:$0xff]   ;;  %v4899_v2 = vld [vmem:[#allocation17 + $0x258] sm:$0xff]  }
 0xc38   :  { %v2342_v23 = vadd.f32 %v2341_v3, %v5955_v56  ;;  %v2395_v7 = vadd.f32 %v2394_v63, %v5962_v11  ;;  %v2343_v32 = vpop.f32.mrb[57].mxu1  ;;  %v2396_v13 = vpop.f32.mrb[57].mxu0  ;;  %4519 = vmatprep.subr.bf16.mxu1 %v4887_v57  ;;  %4547 = vmatprep.subr.bf16.mxu0 %v4888_v58  ;;  %v4900_v5 = vld [vmem:[#allocation17 + $0x2d8] sm:$0xff]  }
 0xc39   :  { %v2344_v15 = vadd.f32 %v2343_v32, %v5967_v1  ;;  %v2397_v27 = vadd.f32 %v2396_v13, %v5974_v44  ;;  %v2345_v8 = vpop.f32.mrb[58].mxu1  ;;  %v2398_v6 = vpop.f32.mrb[58].mxu0 }
 0xc3a   :  { %v2346_v34 = vadd.f32 %v2345_v8, %v5955_v56  ;;  %v2399_v16 = vadd.f32 %v2398_v6, %v5962_v11  ;;  %3767 = vmatmul.mubr.bf16.vlgmr.msra.gmra.mrb[76].mxu1 %v5942_v35  ;;  %3816 = vmatmul.mubr.bf16.vlgmr.msra.gmra.mrb[76].mxu0 %v5944_v26  ;;  %v2347_v38 = vpop.f32.mrb[59].mxu1  ;;  %v2400_v39 = vpop.f32.mrb[59].mxu0  ;;  %v6030_v35 = vrot.slane %v5946_v37, %v1869_v4  ;;  %v2549_v26 = vmax.f32 %v2342_v23, 0.0  ;;  %v4901_v8 = vld [vmem:[#allocation17 + $0x218] sm:$0xff]  }
 0xc3b   :  { %v2348_v36 = vadd.f32 %v2347_v38, %v5967_v1  ;;  %v2401_v50 = vadd.f32 %v2400_v39, %v5974_v44  ;;  %3774 = vmatprep.mubr.bf16.mxu1 %v5980_v14  ;;  %3823 = vmatprep.mubr.bf16.mxu0 %v5982_v24  ;;  %v2551_v56 = vmax.f32 %v2395_v7, 0.0  ;;  %v2550_v1 = vmax.f32 %v2344_v15, 0.0  ;;  %v4895_v14 = vld [vmem:[#allocation17 + $0x250] sm:$0xff]  }
 0xc3c   :  { %v2565_v11 = vmax.f32 %v2346_v34, 0.0  ;;  %v2567_v40 = vmax.f32 %v2399_v16, 0.0  ;;  %4520 = vmatpush3.bf16.msra.mxu1 %v4889_v25  ;;  %4548 = vmatpush3.bf16.msra.mxu0 %v4890_v45  ;;  %v2552_v28 = vmax.f32 %v2397_v27, 0.0  ;;  %v4896_v24 = vld [vmem:[#allocation17 + $0x2d0] sm:$0xff]   ;;  %v4903_v34 = vld [vmem:[#allocation17 + $0x260] sm:$0xff]  }
 0xc3d   :  { %v2566_v44 = vmax.f32 %v2348_v36, 0.0  ;;  %v2568_v30 = vmax.f32 %v2401_v50, 0.0  ;;  %4521 = vmatprep.subr.bf16.mxu1 %v4891_v19  ;;  %4549 = vmatprep.subr.bf16.mxu0 %v4892_v29  ;;  %v4904_v16 = vld [vmem:[#allocation17 + $0x2e0] sm:$0xff]  }
 0xc3e   :  { %v6032_v20 = vpack.c.bf16 %v2565_v11, %v2549_v26  ;;  %v6034_v4 = vpack.c.bf16 %v2567_v40, %v2551_v56 }
 0xc3f   :  { %v6036_v37 = vpack.c.bf16 %v2566_v44, %v2550_v1  ;;  %v6038_v42 = vpack.c.bf16 %v2568_v30, %v2552_v28  ;;  %v2437_v46 = vpop.f32.mrb[60].mxu1  ;;  %v2490_v48 = vpop.f32.mrb[60].mxu0 }
 0xc40   :  { %4522 = vmatpush3.bf16.msra.mxu1 %v4893_v0  ;;  %4550 = vmatpush3.bf16.msra.mxu0 %v4894_v41  ;;  %v2438_v51 = vadd.f32 %v2437_v46, %v6007_v31  ;;  %v2491_v52 = vadd.f32 %v2490_v48, %v6012_v33  ;;  %v2439_v22 = vpop.f32.mrb[61].mxu1  ;;  %v2492_v53 = vpop.f32.mrb[61].mxu0  ;;  %v4905_v0 = vld [vmem:[#allocation17 + $0x220] sm:$0xff]  }
 0xc41   :  { %v2440_v57 = vadd.f32 %v2439_v22, %v6021_v49  ;;  %v2493_v58 = vadd.f32 %v2492_v53, %v6030_v35  ;;  %v2441_v59 = vpop.f32.mrb[62].mxu1  ;;  %v2494_v43 = vpop.f32.mrb[62].mxu0  ;;  %4523 = vmatprep.subr.bf16.mxu1 %v4895_v14  ;;  %4551 = vmatprep.subr.bf16.mxu0 %v4896_v24  ;;  %v4906_v41 = vld [vmem:[#allocation17 + $0x2a0] sm:$0xff]   ;;  %v4907_v14 = vld [vmem:[#allocation17 + $0x268] sm:$0xff]  }
 0xc42   :  { %v2442_v3 = vadd.f32 %v2441_v59, %v6007_v31  ;;  %v2495_v63 = vadd.f32 %v2494_v43, %v6012_v33  ;;  %3775 = vmatmul.mubr.bf16.gmra.mrb[80].mxu1 %v5976_v10  ;;  %3824 = vmatmul.mubr.bf16.gmra.mrb[80].mxu0 %v5978_v9  ;;  %v2443_v23 = vpop.f32.mrb[63].mxu1  ;;  %v2496_v7 = vpop.f32.mrb[63].mxu0  ;;  %v2521_v25 = vmax.f32 %v2438_v51, 0.0  ;;  %v2523_v45 = vmax.f32 %v2491_v52, 0.0  ;;  %v4902_v10 = vld [vmem:[#allocation17 + $0x298] sm:$0xff]   ;;  %v4908_v24 = vld [vmem:[#allocation17 + $0x2e8] sm:$0xff]  }
 0xc43   :  { %v2444_v32 = vadd.f32 %v2443_v23, %v6021_v49  ;;  %v2497_v13 = vadd.f32 %v2496_v7, %v6030_v35  ;;  %3864 = vmatprep.mubr.bf16.mxu1 %v5996_v21  ;;  %3913 = vmatprep.mubr.bf16.mxu0 %v5998_v60  ;;  %v2522_v6 = vmax.f32 %v2440_v57, 0.0  ;;  %v2524_v9 = vmax.f32 %v2493_v58, 0.0  ;;  %v4909_v59 = vld [vmem:[#allocation17 + $0x228] sm:$0xff]  }
 0xc44   :  { %v2537_v15 = vmax.f32 %v2442_v3, 0.0  ;;  %v2539_v27 = vmax.f32 %v2495_v63, 0.0  ;;  %4524 = vmatpush3.bf16.msra.mxu1 %v4897_v54  ;;  %4552 = vmatpush3.bf16.msra.mxu0 %v4898_v55  ;;  %v4910_v43 = vld [vmem:[#allocation17 + $0x2a8] sm:$0xff]   ;;  %v4912_v63 = vld [vmem:[#allocation17 + $0x2f0] sm:$0xff]  }
 0xc45   :  { %v2538_v19 = vmax.f32 %v2444_v32, 0.0  ;;  %v2540_v29 = vmax.f32 %v2497_v13, 0.0  ;;  %4525 = vmatprep.subr.bf16.mxu1 %v4899_v2  ;;  %4553 = vmatprep.subr.bf16.mxu0 %v4900_v5  ;;  %v4913_v32 = vld [vmem:[#allocation17 + $0x230] sm:$0xff]  }
 0xc46   :  { %v6052_v38 = vpack.c.bf16 %v2537_v15, %v2521_v25  ;;  %v6054_v21 = vpack.c.bf16 %v2539_v27, %v2523_v45  ;;  %v4914_v13 = vld [vmem:[#allocation17 + $0x2b0] sm:$0xff]   ;;  %v4915_v25 = vld [vmem:[#allocation17 + $0x278] sm:$0xff]  }
 0xc47   :  { %v6056_v60 = vpack.c.bf16 %v2538_v19, %v2522_v6  ;;  %v6058_v39 = vpack.c.bf16 %v2540_v29, %v2524_v9  ;;  %v2447_v36 = vpop.f32.mrb[64].mxu1  ;;  %v2500_v50 = vpop.f32.mrb[64].mxu0  ;;  %v4916_v45 = vld [vmem:[#allocation17 + $0x2f8] sm:$0xff]   ;;  %v4921_v6 = vld [vmem:[#allocation17 + $0x300] sm:$0xff]   ;;  %v4923_v19 = vld [vmem:[#allocation17 + $0x348] sm:$0xff]  }
 0xc48   :  { %4526 = vmatpush3.bf16.msra.mxu1 %v4901_v8  ;;  %4554 = vmatpush3.bf16.msra.mxu0 %v4902_v10  ;;  %v2448_v26 = vadd.f32 %v2447_v36, %v6007_v31  ;;  %v2501_v56 = vadd.f32 %v2500_v50, %v6012_v33  ;;  %v2449_v11 = vpop.f32.mrb[65].mxu1  ;;  %v2502_v40 = vpop.f32.mrb[65].mxu0  ;;  %v4917_v15 = vld [vmem:[#allocation17 + $0x238] sm:$0xff]   ;;  %v4919_v8 = vld [vmem:[#allocation17 + $0x340] sm:$0xff]   ;;  %v4924_v29 = vld [vmem:[#allocation17 + $0x3c8] sm:$0xff]  }
 0xc49   :  { %v2450_v1 = vadd.f32 %v2449_v11, %v6021_v49  ;;  %v2503_v28 = vadd.f32 %v2502_v40, %v6030_v35  ;;  %v2451_v44 = vpop.f32.mrb[66].mxu1  ;;  %v2504_v30 = vpop.f32.mrb[66].mxu0  ;;  %4527 = vmatprep.subr.bf16.mxu1 %v4903_v34  ;;  %4555 = vmatprep.subr.bf16.mxu0 %v4904_v16  ;;  %v4918_v27 = vld [vmem:[#allocation17 + $0x2b8] sm:$0xff]   ;;  %v4920_v10 = vld [vmem:[#allocation17 + $0x3c0] sm:$0xff]   ;;  %v4925_v34 = vld [vmem:[#allocation17 + $0x308] sm:$0xff]  }
 0xc4a   :  { %v2452_v46 = vadd.f32 %v2451_v44, %v6007_v31  ;;  %v2505_v48 = vadd.f32 %v2504_v30, %v6012_v33  ;;  %v2453_v51 = vpop.f32.mrb[67].mxu1  ;;  %v2506_v52 = vpop.f32.mrb[67].mxu0  ;;  %v2553_v54 = vmax.f32 %v2448_v26, 0.0  ;;  %v2555_v55 = vmax.f32 %v2501_v56, 0.0  ;;  %v4911_v33 = vld [vmem:[#allocation17 + $0x270] sm:$0xff]   ;;  %v4922_v9 = vld [vmem:[#allocation17 + $0x380] sm:$0xff]  }
 0xc4b   :  { %v2454_v22 = vadd.f32 %v2453_v51, %v6021_v49  ;;  %v2507_v53 = vadd.f32 %v2506_v52, %v6030_v35  ;;  %v2554_v2 = vmax.f32 %v2450_v1, 0.0  ;;  %v2556_v5 = vmax.f32 %v2503_v28, 0.0  ;;  %v4926_v16 = vld [vmem:[#allocation17 + $0x388] sm:$0xff]   ;;  %v4927_v36 = vld [vmem:[#allocation17 + $0x350] sm:$0xff]   ;;  %v4935_v11 = vld [vmem:[#allocation17 + $0x360] sm:$0xff]  }
 0xc4c   :  { %v2569_v57 = vmax.f32 %v2452_v46, 0.0  ;;  %v2571_v58 = vmax.f32 %v2505_v48, 0.0  ;;  %4528 = vmatpush3.bf16.msra.mxu1 %v4905_v0  ;;  %4556 = vmatpush3.bf16.msra.mxu0 %v4906_v41  ;;  %v4928_v50 = vld [vmem:[#allocation17 + $0x3d0] sm:$0xff]   ;;  %v4936_v40 = vld [vmem:[#allocation17 + $0x3e0] sm:$0xff]   ;;  %v4949_v46 = vld [vmem:[#allocation17 + $0x338] sm:$0xff]  }
 0xc4d   :  { %v2570_v3 = vmax.f32 %v2454_v22, 0.0  ;;  %v2572_v31 = vmax.f32 %v2507_v53, 0.0  ;;  %4529 = vmatprep.subr.bf16.mxu1 %v4907_v14  ;;  %4557 = vmatprep.subr.bf16.mxu0 %v4908_v24  ;;  %v4929_v26 = vld [vmem:[#allocation17 + $0x310] sm:$0xff]   ;;  %v4937_v0 = vld [vmem:[#allocation17 + $0x320] sm:$0xff]   ;;  %v4947_v14 = vld [vmem:[#allocation17 + $0x378] sm:$0xff]  }
 0xc4e   :  { %v6068_v23 = vpack.c.bf16 %v2569_v57, %v2553_v54  ;;  %v6070_v49 = vpack.c.bf16 %v2571_v58, %v2555_v55  ;;  %v4930_v56 = vld [vmem:[#allocation17 + $0x390] sm:$0xff]   ;;  %v4938_v41 = vld [vmem:[#allocation17 + $0x3a0] sm:$0xff]   ;;  %v4948_v24 = vld [vmem:[#allocation17 + $0x3f8] sm:$0xff]  }
 0xc4f   :  { %v6072_v35 = vpack.c.bf16 %v2570_v3, %v2554_v2  ;;  %v6074_v7 = vpack.c.bf16 %v2572_v31, %v2556_v5  ;;  %v4943_v1 = vld [vmem:[#allocation17 + $0x370] sm:$0xff]   ;;  %v4950_v48 = vld [vmem:[#allocation17 + $0x3b8] sm:$0xff]   ;;  %v4228_v22 = vld [vmem:[#allocation19] ss:$0 sm:$0xff] }
 0xc50   :  { %4530 = vmatpush3.bf16.msra.mxu1 %v4909_v59  ;;  %4558 = vmatpush3.bf16.msra.mxu0 %v4910_v43  ;;  %v4944_v28 = vld [vmem:[#allocation17 + $0x3f0] sm:$0xff]  }
 0xc51   :  { %4531 = vmatprep.subr.bf16.mxu1 %v4911_v33  ;;  %4559 = vmatprep.subr.bf16.mxu0 %v4912_v63  ;;  %v4945_v44 = vld [vmem:[#allocation17 + $0x330] sm:$0xff]  }
 0xc52   :  { %v4946_v30 = vld [vmem:[#allocation17 + $0x3b0] sm:$0xff]  }
 0xc54   :  { %4532 = vmatpush3.bf16.msra.mxu1 %v4913_v32  ;;  %4560 = vmatpush3.bf16.msra.mxu0 %v4914_v13 }
 0xc55   :  { %4533 = vmatprep.subr.bf16.mxu1 %v4915_v25  ;;  %4561 = vmatprep.subr.bf16.mxu0 %v4916_v45 }
 0xc58   :  { %4534 = vmatpush3.bf16.msra.mxu1 %v4917_v15  ;;  %4562 = vmatpush3.bf16.msra.mxu0 %v4918_v27 }
 0xc59   :  { %4575 = vmatprep.subr.bf16.mxu1 %v4919_v8  ;;  %4603 = vmatprep.subr.bf16.mxu0 %v4920_v10 }
 0xc5b   :  { %3865 = vmatmul.mubr.bf16.vlgmr.msra.gmra.mrb[84].mxu1 %v5992_v12  ;;  %3914 = vmatmul.mubr.bf16.vlgmr.msra.gmra.mrb[84].mxu0 %v5994_v47  ;;  %v4931_v12 = vld [vmem:[#allocation17 + $0x358] sm:$0xff]  }
 0xc5c   :  { %3872 = vmatprep.mubr.bf16.mxu1 %v6036_v37  ;;  %3921 = vmatprep.mubr.bf16.mxu0 %v6038_v42  ;;  %v4932_v47 = vld [vmem:[#allocation17 + $0x3d8] sm:$0xff]  }
 0xc5d   :  { %4576 = vmatpush3.bf16.msra.mxu1 %v4921_v6  ;;  %4604 = vmatpush3.bf16.msra.mxu0 %v4922_v9  ;;  %v4933_v37 = vld [vmem:[#allocation17 + $0x318] sm:$0xff]  }
 0xc5e   :  { %4577 = vmatprep.subr.bf16.mxu1 %v4923_v19  ;;  %4605 = vmatprep.subr.bf16.mxu0 %v4924_v29  ;;  %v4934_v42 = vld [vmem:[#allocation17 + $0x398] sm:$0xff]  }
 0xc61   :  { %4578 = vmatpush3.bf16.msra.mxu1 %v4925_v34  ;;  %4606 = vmatpush3.bf16.msra.mxu0 %v4926_v16 }
 0xc62   :  { %4579 = vmatprep.subr.bf16.mxu1 %v4927_v36  ;;  %4607 = vmatprep.subr.bf16.mxu0 %v4928_v50 }
 0xc63   :  { %3873 = vmatmul.mubr.bf16.gmra.mrb[88].mxu1 %v6032_v20  ;;  %3922 = vmatmul.mubr.bf16.gmra.mrb[88].mxu0 %v6034_v4  ;;  %v4939_v20 = vld [vmem:[#allocation17 + $0x368] sm:$0xff]  }
 0xc64   :  { %3962 = vmatprep.mubr.bf16.mxu1 %v6056_v60  ;;  %4011 = vmatprep.mubr.bf16.mxu0 %v6058_v39  ;;  %v4940_v4 = vld [vmem:[#allocation17 + $0x3e8] sm:$0xff]  }
 0xc65   :  { %4580 = vmatpush3.bf16.msra.mxu1 %v4929_v26  ;;  %4608 = vmatpush3.bf16.msra.mxu0 %v4930_v56  ;;  %v4941_v60 = vld [vmem:[#allocation17 + $0x328] sm:$0xff]  }
 0xc66   :  { %4581 = vmatprep.subr.bf16.mxu1 %v4931_v12  ;;  %4609 = vmatprep.subr.bf16.mxu0 %v4932_v47  ;;  %v4942_v39 = vld [vmem:[#allocation17 + $0x3a8] sm:$0xff]  }
 0xc69   :  { %4582 = vmatpush3.bf16.msra.mxu1 %v4933_v37  ;;  %4610 = vmatpush3.bf16.msra.mxu0 %v4934_v42 }
 0xc6a   :  { %4583 = vmatprep.subr.bf16.mxu1 %v4935_v11  ;;  %4611 = vmatprep.subr.bf16.mxu0 %v4936_v40 }
 0xc6d   :  { %4584 = vmatpush3.bf16.msra.mxu1 %v4937_v0  ;;  %4612 = vmatpush3.bf16.msra.mxu0 %v4938_v41 }
 0xc6e   :  { %4585 = vmatprep.subr.bf16.mxu1 %v4939_v20  ;;  %4613 = vmatprep.subr.bf16.mxu0 %v4940_v4 }
 0xc71   :  { %4586 = vmatpush3.bf16.msra.mxu1 %v4941_v60  ;;  %4614 = vmatpush3.bf16.msra.mxu0 %v4942_v39 }
 0xc72   :  { %4587 = vmatprep.subr.bf16.mxu1 %v4943_v1  ;;  %4615 = vmatprep.subr.bf16.mxu0 %v4944_v28 }
 0xc75   :  { %4588 = vmatpush3.bf16.msra.mxu1 %v4945_v44  ;;  %4616 = vmatpush3.bf16.msra.mxu0 %v4946_v30 }
 0xc76   :  { %4589 = vmatprep.subr.bf16.mxu1 %v4947_v14  ;;  %4617 = vmatprep.subr.bf16.mxu0 %v4948_v24 }
 0xc79   :  { %4590 = vmatpush3.bf16.msra.mxu1 %v4949_v46  ;;  %4618 = vmatpush3.bf16.msra.mxu0 %v4950_v48 }
 0xc7c   :  { %3963 = vmatmul.mubr.bf16.vlgmr.msra.gmra.mrb[92].mxu1 %v6052_v38  ;;  %4012 = vmatmul.mubr.bf16.vlgmr.msra.gmra.mrb[92].mxu0 %v6054_v21 }
 0xc7d   :  { %3970 = vmatprep.mubr.bf16.mxu1 %v6072_v35  ;;  %4019 = vmatprep.mubr.bf16.mxu0 %v6074_v7 }
 0xc84   :  { %3971 = vmatmul.mubr.bf16.gmra.mrb[96].mxu1 %v6068_v23  ;;  %4020 = vmatmul.mubr.bf16.gmra.mrb[96].mxu0 %v6070_v49 }
 0xced   :  { %v4423_v51 = vpop.f32.mrb[68].mxu1  ;;  %v4451_v52 = vpop.f32.mrb[68].mxu0 }
 0xcee   :  { %v4424_v53 = vpop.f32.mrb[69].mxu1  ;;  %v4452_v54 = vpop.f32.mrb[69].mxu0 }
 0xcef   :  { %v4425_v55 = vadd.f32 %v4424_v53, %v4423_v51  ;;  %v4453_v57 = vadd.f32 %v4452_v54, %v4451_v52  ;;  %v4426_v58 = vpop.f32.mrb[70].mxu1  ;;  %v4454_v59 = vpop.f32.mrb[70].mxu0 }
 0xcf0   :  { %v4427_v38 = vpop.f32.mrb[71].mxu1  ;;  %v4455_v43 = vpop.f32.mrb[71].mxu0 }
 0xcf1   :  { %v3671_v21 = vadd.f32 %v4425_v55, %v4228_v22  ;;  %v4428_v2 = vadd.f32 %v4427_v38, %v4426_v58  ;;  %v4456_v5 = vadd.f32 %v4455_v43, %v4454_v59 }
 0xcf3   :  { %v3720_v3 = vadd.f32 %v4453_v57, %v3671_v21  ;;  %v3674_v31 = vadd.f32 %v4428_v2, %v4228_v22 }
 0xcf5   :  { %v3723_v33 = vadd.f32 %v4456_v5, %v3674_v31  ;;  %v4429_v63 = vpop.f32.mrb[72].mxu1  ;;  %v4457_v23 = vpop.f32.mrb[72].mxu0 }
 0xcf6   :  { %v4430_v49 = vpop.f32.mrb[73].mxu1  ;;  %v4458_v35 = vpop.f32.mrb[73].mxu0 }
 0xcf7   :  { %v4431_v7 = vadd.f32 %v4430_v49, %v4429_v63  ;;  %v4459_v32 = vadd.f32 %v4458_v35, %v4457_v23  ;;  %v4432_v13 = vpop.f32.mrb[74].mxu1  ;;  %v4460_v25 = vpop.f32.mrb[74].mxu0 }
 0xcf8   :  { %v4433_v45 = vpop.f32.mrb[75].mxu1  ;;  %v4461_v15 = vpop.f32.mrb[75].mxu0 }
 0xcf9   :  { %v3679_v27 = vadd.f32 %v4431_v7, %v4228_v22  ;;  %v4434_v8 = vadd.f32 %v4433_v45, %v4432_v13  ;;  %v4462_v10 = vadd.f32 %v4461_v15, %v4460_v25 }
 0xcfb   :  { %v3728_v6 = vadd.f32 %v4459_v32, %v3679_v27  ;;  %v3682_v9 = vadd.f32 %v4434_v8, %v4228_v22 }
 0xcfd   :  { %v3731_v19 = vadd.f32 %v4462_v10, %v3682_v9 }
 0xd0d   :  { %v4479_v29 = vpop.f32.mrb[76].mxu1  ;;  %v4507_v34 = vpop.f32.mrb[76].mxu0 }
 0xd0e   :  { %v4480_v16 = vpop.f32.mrb[77].mxu1  ;;  %v4508_v36 = vpop.f32.mrb[77].mxu0 }
 0xd0f   :  { %v4481_v50 = vadd.f32 %v4480_v16, %v4479_v29  ;;  %v4509_v26 = vadd.f32 %v4508_v36, %v4507_v34  ;;  %v4482_v56 = vpop.f32.mrb[78].mxu1  ;;  %v4510_v12 = vpop.f32.mrb[78].mxu0 }
 0xd10   :  { %v4483_v47 = vpop.f32.mrb[79].mxu1  ;;  %v4511_v37 = vpop.f32.mrb[79].mxu0 }
 0xd11   :  { %v3769_v42 = vadd.f32 %v4481_v50, %v3720_v3  ;;  %v4484_v11 = vadd.f32 %v4483_v47, %v4482_v56  ;;  %v4512_v40 = vadd.f32 %v4511_v37, %v4510_v12 }
 0xd13   :  { %v3818_v0 = vadd.f32 %v4509_v26, %v3769_v42  ;;  %v3772_v41 = vadd.f32 %v4484_v11, %v3723_v33 }
 0xd15   :  { %v3821_v20 = vadd.f32 %v4512_v40, %v3772_v41  ;;  %v4485_v4 = vpop.f32.mrb[80].mxu1  ;;  %v4513_v60 = vpop.f32.mrb[80].mxu0 }
 0xd16   :  { %v4486_v39 = vpop.f32.mrb[81].mxu1  ;;  %v4514_v1 = vpop.f32.mrb[81].mxu0 }
 0xd17   :  { %v4487_v28 = vadd.f32 %v4486_v39, %v4485_v4  ;;  %v4515_v44 = vadd.f32 %v4514_v1, %v4513_v60  ;;  %v4488_v30 = vpop.f32.mrb[82].mxu1  ;;  %v4516_v14 = vpop.f32.mrb[82].mxu0 }
 0xd18   :  { %v4489_v24 = vpop.f32.mrb[83].mxu1  ;;  %v4517_v46 = vpop.f32.mrb[83].mxu0 }
 0xd19   :  { %v3777_v48 = vadd.f32 %v4487_v28, %v3728_v6  ;;  %v4490_v51 = vadd.f32 %v4489_v24, %v4488_v30  ;;  %v4518_v52 = vadd.f32 %v4517_v46, %v4516_v14 }
 0xd1b   :  { %v3826_v22 = vadd.f32 %v4515_v44, %v3777_v48  ;;  %v3780_v53 = vadd.f32 %v4490_v51, %v3731_v19 }
 0xd1d   :  { %v3829_v54 = vadd.f32 %v4518_v52, %v3780_v53 }
 0xd2e   :  { %v4535_v55 = vpop.f32.mrb[84].mxu1  ;;  %v4563_v57 = vpop.f32.mrb[84].mxu0 }
 0xd2f   :  { %v4536_v58 = vpop.f32.mrb[85].mxu1  ;;  %v4564_v59 = vpop.f32.mrb[85].mxu0 }
 0xd30   :  { %v4537_v38 = vadd.f32 %v4536_v58, %v4535_v55  ;;  %v4565_v43 = vadd.f32 %v4564_v59, %v4563_v57  ;;  %v4538_v21 = vpop.f32.mrb[86].mxu1  ;;  %v4566_v2 = vpop.f32.mrb[86].mxu0 }
 0xd31   :  { %v4539_v5 = vpop.f32.mrb[87].mxu1  ;;  %v4567_v3 = vpop.f32.mrb[87].mxu0 }
 0xd32   :  { %v3867_v31 = vadd.f32 %v4537_v38, %v3818_v0  ;;  %v4540_v33 = vadd.f32 %v4539_v5, %v4538_v21  ;;  %v4568_v63 = vadd.f32 %v4567_v3, %v4566_v2 }
 0xd34   :  { %v3916_v23 = vadd.f32 %v4565_v43, %v3867_v31  ;;  %v3870_v49 = vadd.f32 %v4540_v33, %v3821_v20 }
 0xd36   :  { %v3919_v35 = vadd.f32 %v4568_v63, %v3870_v49  ;;  %v4541_v7 = vpop.f32.mrb[88].mxu1  ;;  %v4569_v32 = vpop.f32.mrb[88].mxu0 }
 0xd37   :  { %v4542_v13 = vpop.f32.mrb[89].mxu1  ;;  %v4570_v25 = vpop.f32.mrb[89].mxu0 }
 0xd38   :  { %v4543_v45 = vadd.f32 %v4542_v13, %v4541_v7  ;;  %v4571_v15 = vadd.f32 %v4570_v25, %v4569_v32  ;;  %v4544_v27 = vpop.f32.mrb[90].mxu1  ;;  %v4572_v8 = vpop.f32.mrb[90].mxu0 }
 0xd39   :  { %v4545_v10 = vpop.f32.mrb[91].mxu1  ;;  %v4573_v6 = vpop.f32.mrb[91].mxu0 }
 0xd3a   :  { %v3875_v9 = vadd.f32 %v4543_v45, %v3826_v22  ;;  %v4546_v19 = vadd.f32 %v4545_v10, %v4544_v27  ;;  %v4574_v29 = vadd.f32 %v4573_v6, %v4572_v8 }
 0xd3c   :  { %v3924_v34 = vadd.f32 %v4571_v15, %v3875_v9  ;;  %v3878_v16 = vadd.f32 %v4546_v19, %v3829_v54 }
 0xd3e   :  { %v3927_v36 = vadd.f32 %v4574_v29, %v3878_v16 }
 0xd4f   :  { %v4591_v50 = vpop.f32.mrb[92].mxu1  ;;  %v4619_v26 = vpop.f32.mrb[92].mxu0 }
 0xd50   :  { %v4592_v56 = vpop.f32.mrb[93].mxu1  ;;  %v4620_v12 = vpop.f32.mrb[93].mxu0 }
 0xd51   :  { %v4593_v47 = vadd.f32 %v4592_v56, %v4591_v50  ;;  %v4621_v37 = vadd.f32 %v4620_v12, %v4619_v26  ;;  %v4594_v42 = vpop.f32.mrb[94].mxu1  ;;  %v4622_v11 = vpop.f32.mrb[94].mxu0 }
 0xd52   :  { %v4595_v40 = vpop.f32.mrb[95].mxu1  ;;  %v4623_v0 = vpop.f32.mrb[95].mxu0 }
 0xd53   :  { %v3965_v41 = vadd.f32 %v4593_v47, %v3916_v23  ;;  %v4596_v20 = vadd.f32 %v4595_v40, %v4594_v42  ;;  %v4624_v4 = vadd.f32 %v4623_v0, %v4622_v11  ;;  %v4357_v40 = vld [vmem:[#allocation20] ss:$0 sm:$0xff] }
 0xd55   :  { %v4014_v60 = vadd.f32 %v4621_v37, %v3965_v41  ;;  %v3968_v39 = vadd.f32 %v4596_v20, %v3919_v35  ;;  %v4358_v20 = vld [vmem:[#allocation22] ss:$0 sm:$0xff] }
 0xd57   :  { %v4017_v1 = vadd.f32 %v4624_v4, %v3968_v39  ;;  %v4597_v28 = vpop.f32.mrb[96].mxu1  ;;  %v4625_v44 = vpop.f32.mrb[96].mxu0  ;;  %v4028_v30 = vadd.f32 %v4014_v60, %v5826_v61 }
 0xd58   :  { %v4598_v14 = vpop.f32.mrb[97].mxu1  ;;  %v4626_v24 = vpop.f32.mrb[97].mxu0 }
 0xd59   :  { %v4599_v46 = vadd.f32 %v4598_v14, %v4597_v28  ;;  %v4627_v48 = vadd.f32 %v4626_v24, %v4625_v44  ;;  %v4600_v51 = vpop.f32.mrb[98].mxu1  ;;  %v4628_v52 = vpop.f32.mrb[98].mxu0  ;;  %v4034_v22 = vsel %vm247_vm0, %v4028_v30, 0.0  ;;  %v4029_v53 = vadd.f32 %v4017_v1, %v5828_v62 }
 0xd5a   :  { %v4601_v54 = vpop.f32.mrb[99].mxu1  ;;  %v4629_v55 = vpop.f32.mrb[99].mxu0  ;;  %4035 = vadd.xlane.f32.xlu0 %v4034_v22 }
 0xd5b   :  { %v3973_v57 = vadd.f32 %v4599_v46, %v3924_v34  ;;  %v4602_v58 = vadd.f32 %v4601_v54, %v4600_v51  ;;  %v4630_v59 = vadd.f32 %v4629_v55, %v4628_v52  ;;  %v4037_v61 = vsel %vm247_vm0, %v4029_v53, 0.0 }
 0xd5d   :  { %v4022_v38 = vadd.f32 %v4627_v48, %v3973_v57  ;;  %v3976_v43 = vadd.f32 %v4602_v58, %v3927_v36 }
 0xd5e   :  { %4038 = vadd.xlane.f32.xlu0 %v4037_v61 }
 0xd5f   :  { %v4025_v21 = vadd.f32 %v4630_v59, %v3976_v43  ;;  %v4030_v2 = vadd.f32 %v4022_v38, %v5842_v17 }
 0xd61   :  { %v4040_v5 = vsel %vm247_vm0, %v4030_v2, 0.0  ;;  %v4031_v3 = vadd.f32 %v4025_v21, %v5844_v18 }
 0xd62   :  { %4041 = vadd.xlane.f32.xlu0 %v4040_v5 }
 0xd63   :  { %v4043_v62 = vsel %vm247_vm0, %v4031_v3, 0.0 }
 0xd66   :  { %4044 = vadd.xlane.f32.xlu0 %v4043_v62 }
 0xde7   :  { %v4036_v31 = vpop.xlane.xlu0 %4035 }
 0xde8   :  { %v4046_v33 = vmul.f32 0.03125, %v4036_v31 }
 0xdea   :  { %v4050_v63 = vsub.f32 %v4028_v30, %v4046_v33 }
 0xdeb   :  { %v4039_v23 = vpop.xlane.xlu0 %4038 }
 0xdec   :  { %v4047_v49 = vmul.f32 0.03125, %v4039_v23  ;;  %v4054_v35 = vmul.f32 %v4050_v63, %v4050_v63 }
 0xdee   :  { %v4051_v7 = vsub.f32 %v4029_v53, %v4047_v49  ;;  %v4058_v32 = vsel %vm247_vm0, %v4054_v35, 0.0 }
 0xdef   :  { %4059 = vadd.xlane.f32.xlu0 %v4058_v32  ;;  %v4042_v13 = vpop.xlane.xlu0 %4041 }
 0xdf0   :  { %v4048_v17 = vmul.f32 0.03125, %v4042_v13  ;;  %v4055_v25 = vmul.f32 %v4051_v7, %v4051_v7 }
 0xdf2   :  { %v4052_v45 = vsub.f32 %v4030_v2, %v4048_v17  ;;  %v4061_v18 = vsel %vm247_vm0, %v4055_v25, 0.0 }
 0xdf3   :  { %4062 = vadd.xlane.f32.xlu0 %v4061_v18  ;;  %v4045_v15 = vpop.xlane.xlu0 %4044 }
 0xdf4   :  { %v4049_v27 = vmul.f32 0.03125, %v4045_v15  ;;  %v4056_v8 = vmul.f32 %v4052_v45, %v4052_v45 }
 0xdf6   :  { %v4053_v10 = vsub.f32 %v4031_v3, %v4049_v27  ;;  %v4064_v6 = vsel %vm247_vm0, %v4056_v8, 0.0 }
 0xdf7   :  { %4065 = vadd.xlane.f32.xlu0 %v4064_v6 }
 0xdf8   :  { %v4057_v9 = vmul.f32 %v4053_v10, %v4053_v10 }
 0xdfa   :  { %v4067_v19 = vsel %vm247_vm0, %v4057_v9, 0.0 }
 0xdfb   :  { %4068 = vadd.xlane.f32.xlu0 %v4067_v19 }
 0xe7c   :  { %v4060_v29 = vpop.xlane.xlu0 %4059 }
 0xe7d   :  { %v4070_v34 = vmul.f32 0.03125, %v4060_v29 }
 0xe7f   :  { %v4074_v16 = vadd.f32 1e-05, %v4070_v34 }
 0xe80   :  { %v4063_v36 = vpop.xlane.xlu0 %4062 }
 0xe81   :  { %5025 = vrsqrt.f32 %v4074_v16  ;;  %v4071_v50 = vmul.f32 0.03125, %v4063_v36 }
 0xe83   :  { %v4075_v26 = vadd.f32 1e-05, %v4071_v50 }
 0xe84   :  { %v4066_v56 = vpop.xlane.xlu0 %4065 }
 0xe85   :  { %5027 = vrsqrt.f32 %v4075_v26  ;;  %v4072_v12 = vmul.f32 0.03125, %v4066_v56 }
 0xe87   :  { %v4076_v47 = vadd.f32 1e-05, %v4072_v12 }
 0xe88   :  { %v4069_v37 = vpop.xlane.xlu0 %4068 }
 0xe89   :  { %5029 = vrsqrt.f32 %v4076_v47  ;;  %v4073_v42 = vmul.f32 0.03125, %v4069_v37 }
 0xe8b   :  { %v5026_v11 = vpop.eup %5025  ;;  %v4077_v0 = vadd.f32 1e-05, %v4073_v42 }
 0xe8c   :  { %v4082_v41 = vmul.f32 %v5026_v11, %v4050_v63 }
 0xe8d   :  { %5031 = vrsqrt.f32 %v4077_v0 }
 0xe8e   :  { %v4092_v4 = vmul.f32 %v4357_v40, %v4082_v41 }
 0xe8f   :  { %v5028_v60 = vpop.eup %5027 }
 0xe90   :  { %v4083_v39 = vmul.f32 %v5028_v60, %v4051_v7  ;;  %v4102_v1 = vadd.f32 %v4358_v20, %v4092_v4 }
 0xe92   :  { %v4093_v28 = vmul.f32 %v4357_v40, %v4083_v39  ;;  %v4363_v44 = vpack.c.bf16 %v4102_v1, %v4102_v1 }
 0xe93   :  { %v5030_v30 = vpop.eup %5029 }
 0xe94   :  { %v4084_v14 = vmul.f32 %v5030_v30, %v4052_v45  ;;  %v4103_v24 = vadd.f32 %v4358_v20, %v4093_v28  ;;  %4123 = vst.msk [vmem:[#allocation23] sm:$0xf] %vm4122_vm5, %v4363_v44 }
 0xe96   :  { %v4094_v46 = vmul.f32 %v4357_v40, %v4084_v14  ;;  %v4364_v48 = vpack.c.bf16 %v4103_v24, %v4103_v24 }
 0xe97   :  { %v5032_v51 = vpop.eup %5031 }
 0xe98   :  { %v4085_v52 = vmul.f32 %v5032_v51, %v4053_v10  ;;  %v4104_v22 = vadd.f32 %v4358_v20, %v4094_v46  ;;  %4124 = vst.msk [vmem:[#allocation23 + $0x4] sm:$0xf] %vm4122_vm5, %v4364_v48 }
 0xe9a   :  { %v4095_v53 = vmul.f32 %v4357_v40, %v4085_v52  ;;  %v4365_v54 = vpack.c.bf16 %v4104_v22, %v4104_v22 }
 0xe9c   :  { %v4105_v55 = vadd.f32 %v4358_v20, %v4095_v53  ;;  %4125 = vst.msk [vmem:[#allocation23 + $0x8] sm:$0xf] %vm4122_vm5, %v4365_v54 }
 0xe9e   :  { %v4366_v57 = vpack.c.bf16 %v4105_v55, %v4105_v55 }
 0xea0   :  { %4126 = vst.msk [vmem:[#allocation23 + $0xc] sm:$0xf] %vm4122_vm5, %v4366_v57 }
 0xea1   :  { %5332 = shalt.err (!%p5329_p10)
}
 0xea2   :  { %s5333_s16 = scalar_lea.hbm %s6134_s13, 256 }
 0xea3   :  { %p5334_p11 = scmp.ne.s32.totalorder %s6134_s13, %s5333_s16  ;;  %p5337_p12 = scmp.lt.u32.totalorder %s5333_s16, %s6134_s13 }
 0xea5   :  { %p5339_p13 = pnand %p5337_p12, %p5334_p11 }
 0xea7   :  { %5342 = shalt.err (!%p5339_p13)
}
 0xea8   :  { %4138 = dma.vmem_to_hbm [thread:$0]  %s4133_s6, 256, %s6134_s13, [#allocation4], %s5361_s20, %s5361_s20, %s5362_s21  }
 0xea9   :  { %5357 = dma.done.wait [#allocation4], 256  }
 0xeaa   :  { %5358 = vsyncadd [#allocation4], 4294967040 }
 0xeab   :  { %4142 = vsyncpa [#allocation3], 1 }
 0xeac   :  { %4143 = vsyncpa [#allocation6], 1 }
 0xead   :  { %4144 = vsyncpa [#allocation9], 1 }
 0xeae   :  { %4145 = vsyncpa [#allocation12], 1 }
 0xeaf   :  { %4146 = vsyncpa [#allocation15], 1 }
 0xeb0   :  { %4147 = vsyncpa [#allocation18], 1 }
 0xeb1   :  { %4148 = vsyncpa [#allocation21], 1 }
 0xeb2   :  { %4149 = vsyncpa [#allocation4], 1 }

</bundles_post_ra>
